<compile_context>
chip_gen: v7x
topology: tpu7x:2x2x1
jax: 0.10.0
libtpu: 0.0.40
codegen_flags: <defaults>
</compile_context>

<pallas_src>
import functools
import math

import jax
import jax.numpy as jnp
from jax.experimental import pallas as pl
from jax.experimental.pallas import tpu as pltpu


# --------------------------- in-kernel helper math ---------------------------

def _ln(x, g, b, eps):
    """LayerNorm over the last dim. x: [R, d], g/b: [1, d]. f32 math."""
    mu = jnp.mean(x, axis=-1, keepdims=True)
    var = jnp.mean((x - mu) ** 2, axis=-1, keepdims=True)
    return (x - mu) * jax.lax.rsqrt(var + eps) * g + b


def _mha(q, k, v, wo_ref, bo_ref, *, nb, sq, skv, nhead, scale, mask):
    """Multi-head attention over a chunk of `nb` batch elements.

    q: [nb*sq, d], k/v: [nb*skv, d] (f32); wo_ref: block ref [1, d, d] (bf16);
    bo_ref: block ref [1, 1, d] (f32); mask: [sq, skv] additive or None.

    All (batch, head) groups are processed by ONE batched dot_general for the
    scores, ONE fused softmax, ONE batched PV matmul and ONE batched
    out-projection (per-head row blocks of W_o stacked on the leading axis).
    """
    d = q.shape[-1]
    dh = d // nhead
    g = nb * nhead

    def heads(t, rows):
        return jnp.stack(
            [t[b * rows:(b + 1) * rows, h * dh:(h + 1) * dh]
             for b in range(nb) for h in range(nhead)], axis=0)

    qh = heads(q, sq)                                   # [g, sq, dh]
    kh = heads(k, skv)                                  # [g, skv, dh]
    vh = heads(v, skv)                                  # [g, skv, dh]

    # scores for all (batch, head) groups in one batched matmul
    s = jax.lax.dot_general(qh, kh, (((2,), (2,)), ((0,), (0,))),
                            preferred_element_type=jnp.float32) * scale
    if mask is not None:
        s = s + mask[None, :, :]
    m = jnp.max(s, axis=-1, keepdims=True)
    p = jnp.exp(s - m)
    p = p / jnp.sum(p, axis=-1, keepdims=True)          # exact divide (torch parity)

    # PV for all groups in one batched matmul
    o = jax.lax.dot_general(p, vh, (((2,), (1,)), ((0,), (0,))),
                            preferred_element_type=jnp.float32)   # [g, sq, dh]

    # out-projection: stack per-head row blocks of W_o (sublane-aligned slices)
    wo = wo_ref[0]                                      # [d, d] bf16
    woh = jnp.stack([wo[h * dh:(h + 1) * dh, :] for h in range(nhead)] * nb,
                    axis=0)                             # [g, dh, d]
    proj = jax.lax.dot_general(o.astype(wo.dtype), woh,
                               (((2,), (1,)), ((0,), (0,))),
                               preferred_element_type=jnp.float32)  # [g, sq, d]

    outs = []
    for b in range(nb):
        ob = proj[b * nhead]
        for h in range(1, nhead):
            ob = ob + proj[b * nhead + h]
        outs.append(ob)
    out = outs[0] if nb == 1 else jnp.concatenate(outs, axis=0)     # [nb*sq, d]
    return out + bo_ref[0]


# ----------------------------- fused stack kernels ----------------------------

def _enc_kernel(x0_ref, pe_ref, eps_ref,
                wqkv_ref, bqkv_ref, wo_ref, bo_ref, ln1g_ref, ln1b_ref,
                w1_ref, b1_ref, w2_ref, b2_ref, ln2g_ref, ln2b_ref,
                wmu_ref, bmu_ref, wlv_ref, blv_ref, wz_ref, bz_ref,
                mu_ref, lv_ref, z_ref, mem_ref,
                xc_ref, *, nb, S, nhead, nlayers, eps_ln):
    l = pl.program_id(1)
    d = xc_ref.shape[-1]
    scale = 1.0 / math.sqrt(d // nhead)
    bf = wqkv_ref.dtype

    # --- init: fused positional-encoding add, activation into VMEM carrier ---
    @pl.when(l == 0)
    def _():
        pe = pe_ref[...]
        pe_full = pe if nb == 1 else jnp.concatenate([pe] * nb, axis=0)
        xc_ref[...] = x0_ref[...] + pe_full

    x = xc_ref[...]                                     # [nb*S, d] f32 residual stream

    # --- self-attention (fused QKV matmul, batched heads) ---
    qkv = jnp.dot(x.astype(bf), wqkv_ref[0],
                  preferred_element_type=jnp.float32) + bqkv_ref[0]
    sa = _mha(qkv[:, :d], qkv[:, d:2 * d], qkv[:, 2 * d:], wo_ref, bo_ref,
              nb=nb, sq=S, skv=S, nhead=nhead, scale=scale, mask=None)
    x = _ln(x + sa, ln1g_ref[0], ln1b_ref[0], eps_ln)

    # --- feed-forward (ReLU) + fused residual LayerNorm ---
    h = jnp.maximum(
        jnp.dot(x.astype(bf), w1_ref[0],
                preferred_element_type=jnp.float32) + b1_ref[0], 0.0)
    f = jnp.dot(h.astype(bf), w2_ref[0],
                preferred_element_type=jnp.float32) + b2_ref[0]
    x = _ln(x + f, ln2g_ref[0], ln2b_ref[0], eps_ln)

    xc_ref[...] = x

    # --- latent head fused into the final layer step ---
    @pl.when(l == nlayers - 1)
    def _():
        if nb == 1:
            h0 = x[0:1, :]                              # sequence position 0
        else:
            h0 = jnp.concatenate([x[b * S:b * S + 1, :] for b in range(nb)], axis=0)
        mu = jnp.dot(h0, wmu_ref[...], preferred_element_type=jnp.float32) + bmu_ref[...]
        lv = jnp.dot(h0, wlv_ref[...], preferred_element_type=jnp.float32) + blv_ref[...]
        z = eps_ref[0] * jnp.exp(0.5 * lv) + mu         # reparameterize
        mem = jnp.dot(z, wz_ref[...], preferred_element_type=jnp.float32) + bz_ref[...]
        mu_ref[0] = mu
        lv_ref[0] = lv
        z_ref[0] = z
        mem_ref[0] = mem


def _dec_kernel(x0_ref, pe_ref, mem_ref, mask_ref,
                s_wqkv_ref, s_bqkv_ref, s_wo_ref, s_bo_ref, ln1g_ref, ln1b_ref,
                c_wq_ref, c_bq_ref, c_wkv_ref, c_bkv_ref, c_wo_ref, c_bo_ref,
                ln2g_ref, ln2b_ref,
                w1_ref, b1_ref, w2_ref, b2_ref, ln3g_ref, ln3b_ref,
                pw_ref, pb_ref,
                logits_ref, xc_ref, *, nb, T, nhead, nlayers, eps_ln):
    l = pl.program_id(1)
    d = xc_ref.shape[-1]
    scale = 1.0 / math.sqrt(d // nhead)
    bf = s_wqkv_ref.dtype

    @pl.when(l == 0)
    def _():
        pe = pe_ref[...]
        pe_full = pe if nb == 1 else jnp.concatenate([pe] * nb, axis=0)
        xc_ref[...] = x0_ref[...] + pe_full

    x = xc_ref[...]                                     # [nb*T, d]
    mem = mem_ref[...]                                  # [nb*T, d] (quirk-interleaved)
    mask = mask_ref[...]                                # [T, T] additive causal

    # --- causal self-attention ---
    qkv = jnp.dot(x.astype(bf), s_wqkv_ref[0],
                  preferred_element_type=jnp.float32) + s_bqkv_ref[0]
    sa = _mha(qkv[:, :d], qkv[:, d:2 * d], qkv[:, 2 * d:], s_wo_ref, s_bo_ref,
              nb=nb, sq=T, skv=T, nhead=nhead, scale=scale, mask=mask)
    x = _ln(x + sa, ln1g_ref[0], ln1b_ref[0], eps_ln)

    # --- cross-attention with the memory slab (fused KV matmul) ---
    q = jnp.dot(x.astype(bf), c_wq_ref[0],
                preferred_element_type=jnp.float32) + c_bq_ref[0]
    kv = jnp.dot(mem.astype(bf), c_wkv_ref[0],
                 preferred_element_type=jnp.float32) + c_bkv_ref[0]
    ca = _mha(q, kv[:, :d], kv[:, d:], c_wo_ref, c_bo_ref,
              nb=nb, sq=T, skv=T, nhead=nhead, scale=scale, mask=None)
    x = _ln(x + ca, ln2g_ref[0], ln2b_ref[0], eps_ln)

    # --- feed-forward ---
    h = jnp.maximum(
        jnp.dot(x.astype(bf), w1_ref[0],
                preferred_element_type=jnp.float32) + b1_ref[0], 0.0)
    f = jnp.dot(h.astype(bf), w2_ref[0],
                preferred_element_type=jnp.float32) + b2_ref[0]
    x = _ln(x + f, ln3g_ref[0], ln3b_ref[0], eps_ln)

    xc_ref[...] = x

    # --- vocab projection fused into the final layer step ---
    @pl.when(l == nlayers - 1)
    def _():
        logits_ref[...] = (jnp.dot(x, pw_ref[...],
                                   preferred_element_type=jnp.float32) + pb_ref[...])


# ------------------------------ pallas_call wrappers ---------------------------

def encoder_forward(x0, pe_s, eps3, enc_p, lat_p, *, B, S, nhead, nlayers,
                    b_chunks, eps_ln=1e-5):
    """x0: [B*S, d] batch-major embedded tokens -> (mu, logvar, z, mem)."""
    d = x0.shape[-1]
    ff = enc_p["w1"].shape[-1]
    Z = lat_p["h2mu_w"].shape[1]
    chunk = B // b_chunks

    kernel = functools.partial(_enc_kernel, nb=chunk, S=S, nhead=nhead,
                               nlayers=nlayers, eps_ln=eps_ln)

    def wsp(r, c):
        # NOTE(v5e): if per-layer weight DMA shows up exposed at scale, add
        # pipeline_mode=pl.Buffered(3) here.
        return pl.BlockSpec((1, r, c), lambda bc, l: (l, 0, 0))

    def full2d(shape):
        return pl.BlockSpec(shape, lambda bc, l: (0, 0))

    in_specs = [
        pl.BlockSpec((chunk * S, d), lambda bc, l: (bc, 0)),     # embedded tokens
        full2d((S, d)),                                          # positional encoding
        pl.BlockSpec((1, chunk, Z), lambda bc, l: (bc, 0, 0)),   # reparam noise
        wsp(d, 3 * d), wsp(1, 3 * d), wsp(d, d), wsp(1, d),      # self-attn
        wsp(1, d), wsp(1, d),                                    # ln1
        wsp(d, ff), wsp(1, ff), wsp(ff, d), wsp(1, d),           # ffn
        wsp(1, d), wsp(1, d),                                    # ln2
        full2d((d, Z)), full2d((1, Z)),                          # h2mu
        full2d((d, Z)), full2d((1, Z)),                          # h2logvar
        full2d((Z, d)), full2d((1, d)),                          # z2emb
    ]

    def lat_spec(c):
        return pl.BlockSpec((1, chunk, c), lambda bc, l: (bc, 0, 0))

    out_specs = [lat_spec(Z), lat_spec(Z), lat_spec(Z), lat_spec(d)]
    out_shape = [jax.ShapeDtypeStruct((b_chunks, chunk, Z), jnp.float32),
                 jax.ShapeDtypeStruct((b_chunks, chunk, Z), jnp.float32),
                 jax.ShapeDtypeStruct((b_chunks, chunk, Z), jnp.float32),
                 jax.ShapeDtypeStruct((b_chunks, chunk, d), jnp.float32)]

    mu, lv, z, mem = pl.pallas_call(
        kernel,
        grid=(b_chunks, nlayers),
        in_specs=in_specs,
        out_specs=out_specs,
        out_shape=out_shape,
        scratch_shapes=[pltpu.VMEM((chunk * S, d), jnp.float32)],   # activation carrier
        compiler_params=pltpu.CompilerParams(
            dimension_semantics=("parallel", "arbitrary")),
    )(x0, pe_s, eps3,
      enc_p["wqkv"], enc_p["bqkv"], enc_p["wo"], enc_p["bo"],
      enc_p["ln1_g"], enc_p["ln1_b"],
      enc_p["w1"], enc_p["b1"], enc_p["w2"], enc_p["b2"],
      enc_p["ln2_g"], enc_p["ln2_b"],
      lat_p["h2mu_w"], lat_p["h2mu_b"],
      lat_p["h2logvar_w"], lat_p["h2logvar_b"],
      lat_p["z2emb_w"], lat_p["z2emb_b"])
    return (mu.reshape(B, Z), lv.reshape(B, Z), z.reshape(B, Z), mem.reshape(B, d))


def decoder_forward(xd0, pe_t, mem0, mask, dec_p, proj_w, proj_b, *, B, T,
                    nhead, nlayers, b_chunks, eps_ln=1e-5):
    """xd0, mem0: [B*T, d] batch-major; mask: [T, T] additive -> logits [B*T, V]."""
    d = xd0.shape[-1]
    ff = dec_p["w1"].shape[-1]
    V = proj_w.shape[1]
    chunk = B // b_chunks

    kernel = functools.partial(_dec_kernel, nb=chunk, T=T, nhead=nhead,
                               nlayers=nlayers, eps_ln=eps_ln)

    def wsp(r, c):
        return pl.BlockSpec((1, r, c), lambda bc, l: (l, 0, 0))

    def full2d(shape):
        return pl.BlockSpec(shape, lambda bc, l: (0, 0))

    act = pl.BlockSpec((chunk * T, d), lambda bc, l: (bc, 0))
    in_specs = [
        act,                       # embedded target tokens
        full2d((T, d)),            # positional encoding
        act,                       # memory slab (torch repeat quirk, interleaved)
        full2d((T, T)),            # causal mask
        wsp(d, 3 * d), wsp(1, 3 * d), wsp(d, d), wsp(1, d),      # self-attn
        wsp(1, d), wsp(1, d),                                    # ln1
        wsp(d, d), wsp(1, d), wsp(d, 2 * d), wsp(1, 2 * d),      # cross q, kv
        wsp(d, d), wsp(1, d),                                    # cross out
        wsp(1, d), wsp(1, d),                                    # ln2
        wsp(d, ff), wsp(1, ff), wsp(ff, d), wsp(1, d),           # ffn
        wsp(1, d), wsp(1, d),                                    # ln3
        full2d((d, V)), full2d((1, V)),                          # vocab projection
    ]
    return pl.pallas_call(
        kernel,
        grid=(b_chunks, nlayers),
        in_specs=in_specs,
        out_specs=pl.BlockSpec((chunk * T, V), lambda bc, l: (bc, 0)),
        out_shape=jax.ShapeDtypeStruct((B * T, V), jnp.float32),
        scratch_shapes=[pltpu.VMEM((chunk * T, d), jnp.float32)],   # activation carrier
        compiler_params=pltpu.CompilerParams(
            dimension_semantics=("parallel", "arbitrary")),
    )(xd0, pe_t, mem0, mask,
      dec_p["s_wqkv"], dec_p["s_bqkv"], dec_p["s_wo"], dec_p["s_bo"],
      dec_p["ln1_g"], dec_p["ln1_b"],
      dec_p["c_wq"], dec_p["c_bq"], dec_p["c_wkv"], dec_p["c_bkv"],
      dec_p["c_wo"], dec_p["c_bo"],
      dec_p["ln2_g"], dec_p["ln2_b"],
      dec_p["w1"], dec_p["b1"], dec_p["w2"], dec_p["b2"],
      dec_p["ln3_g"], dec_p["ln3_b"],
      proj_w, proj_b)


# ------------------------------- misc helpers ----------------------------------

def positional_encoding(d_model, max_len):
    position = jnp.arange(max_len, dtype=jnp.float32)[:, None]
    div_term = jnp.exp(jnp.arange(0, d_model, 2, dtype=jnp.float32)
                       * (-math.log(10000.0) / d_model))
    ang = position * div_term
    pe = jnp.zeros((max_len, 1, d_model), jnp.float32)
    pe = pe.at[:, 0, 0::2].set(jnp.sin(ang))
    pe = pe.at[:, 0, 1::2].set(jnp.cos(ang))
    return pe


def generate_square_subsequent_mask(sz):
    return jnp.triu(jnp.full((sz, sz), -jnp.inf, jnp.float32), k=1)


# ------------------------------- forward pass ----------------------------------

def transformer_vae_forward(params, enc_inputs, dec_inputs, targets, eps, cfg, pe):
    del targets  # only used for losses
    d, nhead, nlayers = cfg["dim_h"], cfg["nhead"], cfg["nlayers"]
    b_chunks = cfg["b_chunks"]

    # ---------------- encoder (+ fused latent head) ----------------
    S, B = enc_inputs.shape
    assert B % b_chunks == 0
    # embedding gather stays in XLA (token-id lookup); PE add is fused in-kernel
    x0 = jnp.take(params["embed"], enc_inputs.T, axis=0).reshape(B * S, d)
    mu, logvar, z, mem = encoder_forward(
        x0, pe[:S, 0, :], eps.reshape(b_chunks, B // b_chunks, -1),
        params["enc"], params, B=B, S=S, nhead=nhead, nlayers=nlayers,
        b_chunks=b_chunks)

    # ---------------- decoder (+ fused vocab projection) ----------------
    T, Bt = dec_inputs.shape
    xd0 = jnp.take(params["embed"], dec_inputs.T, axis=0).reshape(Bt * T, d)
    # exact replica of the torch quirk: memory.repeat(1, T).reshape(T, B, -1),
    # then flattened batch-major for the kernel's activation layout
    mem0 = jnp.tile(mem, (1, T)).reshape(T, Bt, d).transpose(1, 0, 2).reshape(Bt * T, d)
    mask = generate_square_subsequent_mask(T)
    logits2d = decoder_forward(
        xd0, pe[:T, 0, :], mem0, mask, params["dec"],
        params["proj_w"], params["proj_b"], B=Bt, T=T, nhead=nhead,
        nlayers=nlayers, b_chunks=b_chunks)

    V = params["proj_w"].shape[1]
    logits = logits2d.reshape(Bt, T, V).transpose(1, 0, 2)      # [T, B, V]
    return mu, logvar, z, logits


# ------------------------------ parameter init ----------------------------------

def init_params(key, cfg):
    d, ff = cfg["dim_h"], cfg["dim_feedforward"]
    V, Z, L = cfg["vocab_size"], cfg["dim_z"], cfg["nlayers"]
    wdt = jnp.bfloat16     # streamed stacked layer weights (f32 accumulation in-kernel)
    keys = iter(jax.random.split(key, 256))

    def u(shape, scale=0.1, dtype=jnp.float32):
        return jax.random.uniform(next(keys), shape, jnp.float32,
                                  -scale, scale).astype(dtype)

    z32 = lambda shape: jnp.zeros(shape, jnp.float32)
    o32 = lambda shape: jnp.ones(shape, jnp.float32)

    enc = {
        "wqkv": u((L, d, 3 * d), dtype=wdt), "bqkv": z32((L, 1, 3 * d)),
        "wo": u((L, d, d), dtype=wdt), "bo": z32((L, 1, d)),
        "ln1_g": o32((L, 1, d)), "ln1_b": z32((L, 1, d)),
        "w1": u((L, d, ff), dtype=wdt), "b1": z32((L, 1, ff)),
        "w2": u((L, ff, d), dtype=wdt), "b2": z32((L, 1, d)),
        "ln2_g": o32((L, 1, d)), "ln2_b": z32((L, 1, d)),
    }
    dec = {
        "s_wqkv": u((L, d, 3 * d), dtype=wdt), "s_bqkv": z32((L, 1, 3 * d)),
        "s_wo": u((L, d, d), dtype=wdt), "s_bo": z32((L, 1, d)),
        "ln1_g": o32((L, 1, d)), "ln1_b": z32((L, 1, d)),
        "c_wq": u((L, d, d), dtype=wdt), "c_bq": z32((L, 1, d)),
        "c_wkv": u((L, d, 2 * d), dtype=wdt), "c_bkv": z32((L, 1, 2 * d)),
        "c_wo": u((L, d, d), dtype=wdt), "c_bo": z32((L, 1, d)),
        "ln2_g": o32((L, 1, d)), "ln2_b": z32((L, 1, d)),
        "w1": u((L, d, ff), dtype=wdt), "b1": z32((L, 1, ff)),
        "w2": u((L, ff, d), dtype=wdt), "b2": z32((L, 1, d)),
        "ln3_g": o32((L, 1, d)), "ln3_b": z32((L, 1, d)),
    }
    return {
        "embed": u((V, d)),
        "h2mu_w": u((d, Z)), "h2mu_b": z32((1, Z)),
        "h2logvar_w": u((d, Z)), "h2logvar_b": z32((1, Z)),
        "z2emb_w": u((Z, d)), "z2emb_b": z32((1, d)),
        "proj_w": u((d, V)), "proj_b": z32((1, V)),
        "enc": enc,
        "dec": dec,
    }


# ----------------------------------- main ---------------------------------------

if __name__ == "__main__":
    cfg = dict(
        vocab_size=32,
        dim_h=32,
        dim_z=16,
        dim_feedforward=64,
        nhead=4,
        nlayers=2,
        pe_max_len=64,
        b_chunks=2,   # size-2 "parallel" batch axis -> both v7x TensorCores usable
    )
    seq_len, batch = 8, 2

    root = jax.random.PRNGKey(0)
    k_param, k_enc, k_dec, k_tgt, k_eps = jax.random.split(root, 5)

    params = init_params(k_param, cfg)
    pe = positional_encoding(cfg["dim_h"], cfg["pe_max_len"])

    enc_inputs = jax.random.randint(k_enc, (seq_len, batch), 0, cfg["vocab_size"], jnp.int32)
    dec_inputs = jax.random.randint(k_dec, (seq_len, batch), 0, cfg["vocab_size"], jnp.int32)
    targets = jax.random.randint(k_tgt, (seq_len, batch), 0, cfg["vocab_size"], jnp.int32)
    eps = jax.random.normal(k_eps, (batch, cfg["dim_z"]), jnp.float32)

    fwd = jax.jit(functools.partial(transformer_vae_forward, cfg=cfg, pe=pe))
    mu, logvar, z, logits = fwd(params, enc_inputs, dec_inputs, targets, eps)
    jax.block_until_ready((mu, logvar, z, logits))

    assert mu.shape == (batch, cfg["dim_z"])
    assert logvar.shape == (batch, cfg["dim_z"])
    assert z.shape == (batch, cfg["dim_z"])
    assert logits.shape == (seq_len, batch, cfg["vocab_size"])
    assert bool(jnp.all(jnp.isfinite(logits)))

    print("KERNEL_OK")
</pallas_src>

<mosaic_0001>
module attributes {stable_mosaic.version = 11 : i64} {
  func.func @_enc_kernel(%arg0: i32, %arg1: i32, %arg2: memref<8x32xf32, #tpu.memory_space<vmem>>, %arg3: memref<8x32xf32, #tpu.memory_space<vmem>>, %arg4: memref<1x1x16xf32, #tpu.memory_space<vmem>>, %arg5: memref<1x32x96xbf16, #tpu.memory_space<vmem>>, %arg6: memref<1x1x96xf32, #tpu.memory_space<vmem>>, %arg7: memref<1x32x32xbf16, #tpu.memory_space<vmem>>, %arg8: memref<1x1x32xf32, #tpu.memory_space<vmem>>, %arg9: memref<1x1x32xf32, #tpu.memory_space<vmem>>, %arg10: memref<1x1x32xf32, #tpu.memory_space<vmem>>, %arg11: memref<1x32x64xbf16, #tpu.memory_space<vmem>>, %arg12: memref<1x1x64xf32, #tpu.memory_space<vmem>>, %arg13: memref<1x64x32xbf16, #tpu.memory_space<vmem>>, %arg14: memref<1x1x32xf32, #tpu.memory_space<vmem>>, %arg15: memref<1x1x32xf32, #tpu.memory_space<vmem>>, %arg16: memref<1x1x32xf32, #tpu.memory_space<vmem>>, %arg17: memref<32x16xf32, #tpu.memory_space<vmem>>, %arg18: memref<1x16xf32, #tpu.memory_space<vmem>>, %arg19: memref<32x16xf32, #tpu.memory_space<vmem>>, %arg20: memref<1x16xf32, #tpu.memory_space<vmem>>, %arg21: memref<16x32xf32, #tpu.memory_space<vmem>>, %arg22: memref<1x32xf32, #tpu.memory_space<vmem>>, %arg23: memref<1x1x16xf32, #tpu.memory_space<vmem>>, %arg24: memref<1x1x16xf32, #tpu.memory_space<vmem>>, %arg25: memref<1x1x16xf32, #tpu.memory_space<vmem>>, %arg26: memref<1x1x32xf32, #tpu.memory_space<vmem>>, %arg27: memref<8x32xf32, #tpu.memory_space<vmem>>) attributes {dimension_semantics = [#tpu.dimension_semantics<parallel>, #tpu.dimension_semantics<arbitrary>], iteration_bounds = array<i64: 2, 2>, scalar_prefetch = 0 : i64, scratch_operands = 1 : i64, tpu.core_type = #tpu.core_type<tc>, window_params = [{transform_indices = @transform_0, window_bounds = array<i64: 8, 32>}, {pipeline_mode = #tpu.pipeline_mode<synchronous>, transform_indices = @transform_1, window_bounds = array<i64: 8, 32>}, {transform_indices = @transform_2, window_bounds = array<i64: 1, 1, 16>}, {transform_indices = @transform_3, window_bounds = array<i64: 1, 32, 96>}, {transform_indices = @transform_4, window_bounds = array<i64: 1, 1, 96>}, {transform_indices = @transform_5, window_bounds = array<i64: 1, 32, 32>}, {transform_indices = @transform_6, window_bounds = array<i64: 1, 1, 32>}, {transform_indices = @transform_7, window_bounds = array<i64: 1, 1, 32>}, {transform_indices = @transform_8, window_bounds = array<i64: 1, 1, 32>}, {transform_indices = @transform_9, window_bounds = array<i64: 1, 32, 64>}, {transform_indices = @transform_10, window_bounds = array<i64: 1, 1, 64>}, {transform_indices = @transform_11, window_bounds = array<i64: 1, 64, 32>}, {transform_indices = @transform_12, window_bounds = array<i64: 1, 1, 32>}, {transform_indices = @transform_13, window_bounds = array<i64: 1, 1, 32>}, {transform_indices = @transform_14, window_bounds = array<i64: 1, 1, 32>}, {pipeline_mode = #tpu.pipeline_mode<synchronous>, transform_indices = @transform_15, window_bounds = array<i64: 32, 16>}, {pipeline_mode = #tpu.pipeline_mode<synchronous>, transform_indices = @transform_16, window_bounds = array<i64: 1, 16>}, {pipeline_mode = #tpu.pipeline_mode<synchronous>, transform_indices = @transform_17, window_bounds = array<i64: 32, 16>}, {pipeline_mode = #tpu.pipeline_mode<synchronous>, transform_indices = @transform_18, window_bounds = array<i64: 1, 16>}, {pipeline_mode = #tpu.pipeline_mode<synchronous>, transform_indices = @transform_19, window_bounds = array<i64: 16, 32>}, {pipeline_mode = #tpu.pipeline_mode<synchronous>, transform_indices = @transform_20, window_bounds = array<i64: 1, 32>}, {transform_indices = @transform_21, window_bounds = array<i64: 1, 1, 16>}, {transform_indices = @transform_22, window_bounds = array<i64: 1, 1, 16>}, {transform_indices = @transform_23, window_bounds = array<i64: 1, 1, 16>}, {transform_indices = @transform_24, window_bounds = array<i64: 1, 1, 32>}]} {
    %c0_i32 = arith.constant 0 : i32
    %0 = arith.cmpi eq, %arg1, %c0_i32 : i32
    %1 = arith.extui %0 : i1 to i32
    %c0_i32_0 = arith.constant 0 : i32
    %2 = arith.cmpi ne, %1, %c0_i32_0 : i32
    scf.if %2 {
      %c0_60 = arith.constant 0 : index
      %c0_61 = arith.constant 0 : index
      %159 = vector.load %arg3[%c0_60, %c0_61] : memref<8x32xf32, #tpu.memory_space<vmem>>, vector<8x32xf32>
      %c0_62 = arith.constant 0 : index
      %c0_63 = arith.constant 0 : index
      %160 = vector.load %arg2[%c0_62, %c0_63] : memref<8x32xf32, #tpu.memory_space<vmem>>, vector<8x32xf32>
      %161 = arith.addf %160, %159 : vector<8x32xf32>
      %c0_64 = arith.constant 0 : index
      %c0_65 = arith.constant 0 : index
      %162 = vector.load %arg27[%c0_64, %c0_65] : memref<8x32xf32, #tpu.memory_space<vmem>>, vector<8x32xf32>
      tpu.vector_store %arg27[%c0_64, %c0_65], %161 {strides = array<i32>} : memref<8x32xf32, #tpu.memory_space<vmem>>, vector<8x32xf32>,
    } else {
    }
    %c0 = arith.constant 0 : index
    %c0_1 = arith.constant 0 : index
    %3 = vector.load %arg27[%c0, %c0_1] : memref<8x32xf32, #tpu.memory_space<vmem>>, vector<8x32xf32>
    %4 = arith.truncf %3 : vector<8x32xf32> to vector<8x32xbf16>
    %c0_2 = arith.constant 0 : index
    %c0_3 = arith.constant 0 : index
    %c0_4 = arith.constant 0 : index
    %5 = vector.load %arg5[%c0_2, %c0_3, %c0_4] : memref<1x32x96xbf16, #tpu.memory_space<vmem>>, vector<1x32x96xbf16>
    %6 = vector.shape_cast %5 : vector<1x32x96xbf16> to vector<32x96xbf16>
    %cst = arith.constant dense<0.000000e+00> : vector<8x96xf32>
    %7 = tpu.matmul %4, %6, %cst {dimension_numbers = #tpu.dot_dimension_numbers<[1], [0], [0], [1], [0, 0, 1, 1], [], []>} : vector<8x32xbf16>, vector<32x96xbf16>, vector<8x96xf32> -> vector<8x96xf32>
    %c0_5 = arith.constant 0 : index
    %c0_6 = arith.constant 0 : index
    %c0_7 = arith.constant 0 : index
    %8 = vector.load %arg6[%c0_5, %c0_6, %c0_7] : memref<1x1x96xf32, #tpu.memory_space<vmem>>, vector<1x1x96xf32>
    %9 = vector.shape_cast %8 : vector<1x1x96xf32> to vector<1x96xf32>
    %10 = vector.broadcast %9 : vector<1x96xf32> to vector<8x96xf32>
    %11 = arith.addf %7, %10 : vector<8x96xf32>
    %12 = vector.extract_strided_slice %11 {offsets = [0, 0], sizes = [8, 32], strides = [1, 1]} : vector<8x96xf32> to vector<8x32xf32>
    %13 = vector.extract_strided_slice %11 {offsets = [0, 32], sizes = [8, 32], strides = [1, 1]} : vector<8x96xf32> to vector<8x32xf32>
    %14 = vector.extract_strided_slice %11 {offsets = [0, 64], sizes = [8, 32], strides = [1, 1]} : vector<8x96xf32> to vector<8x32xf32>
    %15 = vector.extract_strided_slice %12 {offsets = [0, 0], sizes = [8, 8], strides = [1, 1]} : vector<8x32xf32> to vector<8x8xf32>
    %16 = vector.extract_strided_slice %12 {offsets = [0, 8], sizes = [8, 8], strides = [1, 1]} : vector<8x32xf32> to vector<8x8xf32>
    %17 = vector.extract_strided_slice %12 {offsets = [0, 16], sizes = [8, 8], strides = [1, 1]} : vector<8x32xf32> to vector<8x8xf32>
    %18 = vector.extract_strided_slice %12 {offsets = [0, 24], sizes = [8, 8], strides = [1, 1]} : vector<8x32xf32> to vector<8x8xf32>
    %19 = vector.shape_cast %15 : vector<8x8xf32> to vector<1x8x8xf32>
    %20 = vector.shape_cast %16 : vector<8x8xf32> to vector<1x8x8xf32>
    %21 = vector.shape_cast %17 : vector<8x8xf32> to vector<1x8x8xf32>
    %22 = vector.shape_cast %18 : vector<8x8xf32> to vector<1x8x8xf32>
    %23 = tpu.concatenate %19, %20, %21, %22 in 0 : vector<1x8x8xf32>, vector<1x8x8xf32>, vector<1x8x8xf32>, vector<1x8x8xf32> -> vector<4x8x8xf32>
    %24 = vector.extract_strided_slice %13 {offsets = [0, 0], sizes = [8, 8], strides = [1, 1]} : vector<8x32xf32> to vector<8x8xf32>
    %25 = vector.extract_strided_slice %13 {offsets = [0, 8], sizes = [8, 8], strides = [1, 1]} : vector<8x32xf32> to vector<8x8xf32>
    %26 = vector.extract_strided_slice %13 {offsets = [0, 16], sizes = [8, 8], strides = [1, 1]} : vector<8x32xf32> to vector<8x8xf32>
    %27 = vector.extract_strided_slice %13 {offsets = [0, 24], sizes = [8, 8], strides = [1, 1]} : vector<8x32xf32> to vector<8x8xf32>
    %28 = vector.shape_cast %24 : vector<8x8xf32> to vector<1x8x8xf32>
    %29 = vector.shape_cast %25 : vector<8x8xf32> to vector<1x8x8xf32>
    %30 = vector.shape_cast %26 : vector<8x8xf32> to vector<1x8x8xf32>
    %31 = vector.shape_cast %27 : vector<8x8xf32> to vector<1x8x8xf32>
    %32 = tpu.concatenate %28, %29, %30, %31 in 0 : vector<1x8x8xf32>, vector<1x8x8xf32>, vector<1x8x8xf32>, vector<1x8x8xf32> -> vector<4x8x8xf32>
    %33 = vector.extract_strided_slice %14 {offsets = [0, 0], sizes = [8, 8], strides = [1, 1]} : vector<8x32xf32> to vector<8x8xf32>
    %34 = vector.extract_strided_slice %14 {offsets = [0, 8], sizes = [8, 8], strides = [1, 1]} : vector<8x32xf32> to vector<8x8xf32>
    %35 = vector.extract_strided_slice %14 {offsets = [0, 16], sizes = [8, 8], strides = [1, 1]} : vector<8x32xf32> to vector<8x8xf32>
    %36 = vector.extract_strided_slice %14 {offsets = [0, 24], sizes = [8, 8], strides = [1, 1]} : vector<8x32xf32> to vector<8x8xf32>
    %37 = vector.shape_cast %33 : vector<8x8xf32> to vector<1x8x8xf32>
    %38 = vector.shape_cast %34 : vector<8x8xf32> to vector<1x8x8xf32>
    %39 = vector.shape_cast %35 : vector<8x8xf32> to vector<1x8x8xf32>
    %40 = vector.shape_cast %36 : vector<8x8xf32> to vector<1x8x8xf32>
    %41 = tpu.concatenate %37, %38, %39, %40 in 0 : vector<1x8x8xf32>, vector<1x8x8xf32>, vector<1x8x8xf32>, vector<1x8x8xf32> -> vector<4x8x8xf32>
    %cst_8 = arith.constant dense<0.000000e+00> : vector<4x8x8xf32>
    %42 = tpu.matmul %23, %32, %cst_8 {dimension_numbers = #tpu.dot_dimension_numbers<[2], [2], [1], [1], [0, 0, 0, 1, 1, 1], [0], [0]>} : vector<4x8x8xf32>, vector<4x8x8xf32>, vector<4x8x8xf32> -> vector<4x8x8xf32>
    %cst_9 = arith.constant 0.353553385 : f32
    %43 = vector.broadcast %cst_9 : f32 to vector<4x8x8xf32>
    %44 = arith.mulf %42, %43 : vector<4x8x8xf32>
    %cst_10 = arith.constant dense<0xFF800000> : vector<4x8xf32>
    %45 = vector.multi_reduction <maximumf>, %44, %cst_10 [2] : vector<4x8x8xf32> to vector<4x8xf32>
    %46 = vector.shape_cast %45 : vector<4x8xf32> to vector<4x8x1xf32>
    %47 = vector.broadcast %46 : vector<4x8x1xf32> to vector<4x8x8xf32>
    %48 = arith.subf %44, %47 : vector<4x8x8xf32>
    %49 = math.exp %48 : vector<4x8x8xf32>
    %cst_11 = arith.constant dense<0.000000e+00> : vector<4x8xf32>
    %50 = vector.multi_reduction <add>, %49, %cst_11 [2] : vector<4x8x8xf32> to vector<4x8xf32>
    %51 = vector.shape_cast %50 : vector<4x8xf32> to vector<4x8x1xf32>
    %52 = vector.broadcast %51 : vector<4x8x1xf32> to vector<4x8x8xf32>
    %53 = arith.divf %49, %52 : vector<4x8x8xf32>
    %cst_12 = arith.constant dense<0.000000e+00> : vector<4x8x8xf32>
    %54 = tpu.matmul %53, %41, %cst_12 {dimension_numbers = #tpu.dot_dimension_numbers<[2], [1], [1], [2], [0, 0, 0, 1, 1, 2], [0], [0]>} : vector<4x8x8xf32>, vector<4x8x8xf32>, vector<4x8x8xf32> -> vector<4x8x8xf32>
    %c0_13 = arith.constant 0 : index
    %c0_14 = arith.constant 0 : index
    %c0_15 = arith.constant 0 : index
    %55 = vector.load %arg7[%c0_13, %c0_14, %c0_15] : memref<1x32x32xbf16, #tpu.memory_space<vmem>>, vector<1x32x32xbf16>
    %56 = vector.shape_cast %55 : vector<1x32x32xbf16> to vector<32x32xbf16>
    %57 = vector.extract_strided_slice %56 {offsets = [0, 0], sizes = [8, 32], strides = [1, 1]} : vector<32x32xbf16> to vector<8x32xbf16>
    %58 = vector.extract_strided_slice %56 {offsets = [8, 0], sizes = [8, 32], strides = [1, 1]} : vector<32x32xbf16> to vector<8x32xbf16>
    %59 = vector.extract_strided_slice %56 {offsets = [16, 0], sizes = [8, 32], strides = [1, 1]} : vector<32x32xbf16> to vector<8x32xbf16>
    %60 = vector.extract_strided_slice %56 {offsets = [24, 0], sizes = [8, 32], strides = [1, 1]} : vector<32x32xbf16> to vector<8x32xbf16>
    %61 = vector.shape_cast %57 : vector<8x32xbf16> to vector<1x8x32xbf16>
    %62 = vector.shape_cast %58 : vector<8x32xbf16> to vector<1x8x32xbf16>
    %63 = vector.shape_cast %59 : vector<8x32xbf16> to vector<1x8x32xbf16>
    %64 = vector.shape_cast %60 : vector<8x32xbf16> to vector<1x8x32xbf16>
    %65 = tpu.concatenate %61, %62, %63, %64 in 0 : vector<1x8x32xbf16>, vector<1x8x32xbf16>, vector<1x8x32xbf16>, vector<1x8x32xbf16> -> vector<4x8x32xbf16>
    %66 = arith.truncf %54 : vector<4x8x8xf32> to vector<4x8x8xbf16>
    %cst_16 = arith.constant dense<0.000000e+00> : vector<4x8x32xf32>
    %67 = tpu.matmul %66, %65, %cst_16 {dimension_numbers = #tpu.dot_dimension_numbers<[2], [1], [1], [2], [0, 0, 0, 1, 1, 2], [0], [0]>} : vector<4x8x8xbf16>, vector<4x8x32xbf16>, vector<4x8x32xf32> -> vector<4x8x32xf32>
    %68 = vector.extract_strided_slice %67 {offsets = [0, 0, 0], sizes = [1, 8, 32], strides = [1, 1, 1]} : vector<4x8x32xf32> to vector<1x8x32xf32>
    %69 = vector.shape_cast %68 : vector<1x8x32xf32> to vector<8x32xf32>
    %70 = vector.extract_strided_slice %67 {offsets = [1, 0, 0], sizes = [1, 8, 32], strides = [1, 1, 1]} : vector<4x8x32xf32> to vector<1x8x32xf32>
    %71 = vector.shape_cast %70 : vector<1x8x32xf32> to vector<8x32xf32>
    %72 = arith.addf %69, %71 : vector<8x32xf32>
    %73 = vector.extract_strided_slice %67 {offsets = [2, 0, 0], sizes = [1, 8, 32], strides = [1, 1, 1]} : vector<4x8x32xf32> to vector<1x8x32xf32>
    %74 = vector.shape_cast %73 : vector<1x8x32xf32> to vector<8x32xf32>
    %75 = arith.addf %72, %74 : vector<8x32xf32>
    %76 = vector.extract_strided_slice %67 {offsets = [3, 0, 0], sizes = [1, 8, 32], strides = [1, 1, 1]} : vector<4x8x32xf32> to vector<1x8x32xf32>
    %77 = vector.shape_cast %76 : vector<1x8x32xf32> to vector<8x32xf32>
    %78 = arith.addf %75, %77 : vector<8x32xf32>
    %c0_17 = arith.constant 0 : index
    %c0_18 = arith.constant 0 : index
    %c0_19 = arith.constant 0 : index
    %79 = vector.load %arg8[%c0_17, %c0_18, %c0_19] : memref<1x1x32xf32, #tpu.memory_space<vmem>>, vector<1x1x32xf32>
    %80 = vector.shape_cast %79 : vector<1x1x32xf32> to vector<1x32xf32>
    %81 = vector.broadcast %80 : vector<1x32xf32> to vector<8x32xf32>
    %82 = arith.addf %78, %81 : vector<8x32xf32>
    %83 = arith.addf %3, %82 : vector<8x32xf32>
    %c0_20 = arith.constant 0 : index
    %c0_21 = arith.constant 0 : index
    %c0_22 = arith.constant 0 : index
    %84 = vector.load %arg9[%c0_20, %c0_21, %c0_22] : memref<1x1x32xf32, #tpu.memory_space<vmem>>, vector<1x1x32xf32>
    %85 = vector.shape_cast %84 : vector<1x1x32xf32> to vector<1x32xf32>
    %c0_23 = arith.constant 0 : index
    %c0_24 = arith.constant 0 : index
    %c0_25 = arith.constant 0 : index
    %86 = vector.load %arg10[%c0_23, %c0_24, %c0_25] : memref<1x1x32xf32, #tpu.memory_space<vmem>>, vector<1x1x32xf32>
    %87 = vector.shape_cast %86 : vector<1x1x32xf32> to vector<1x32xf32>
    %cst_26 = arith.constant dense<0.000000e+00> : vector<8xf32>
    %88 = vector.multi_reduction <add>, %83, %cst_26 [1] : vector<8x32xf32> to vector<8xf32>
    %89 = vector.shape_cast %88 : vector<8xf32> to vector<8x1xf32>
    %cst_27 = arith.constant 3.200000e+01 : f32
    %90 = vector.broadcast %cst_27 : f32 to vector<8x1xf32>
    %91 = arith.divf %89, %90 : vector<8x1xf32>
    %92 = vector.broadcast %91 : vector<8x1xf32> to vector<8x32xf32>
    %93 = arith.subf %83, %92 : vector<8x32xf32>
    %94 = arith.mulf %93, %93 : vector<8x32xf32>
    %cst_28 = arith.constant dense<0.000000e+00> : vector<8xf32>
    %95 = vector.multi_reduction <add>, %94, %cst_28 [1] : vector<8x32xf32> to vector<8xf32>
    %96 = vector.shape_cast %95 : vector<8xf32> to vector<8x1xf32>
    %cst_29 = arith.constant 3.200000e+01 : f32
    %97 = vector.broadcast %cst_29 : f32 to vector<8x1xf32>
    %98 = arith.divf %96, %97 : vector<8x1xf32>
    %99 = vector.broadcast %91 : vector<8x1xf32> to vector<8x32xf32>
    %100 = arith.subf %83, %99 : vector<8x32xf32>
    %cst_30 = arith.constant 9.99999974E-6 : f32
    %101 = vector.broadcast %cst_30 : f32 to vector<8x1xf32>
    %102 = arith.addf %98, %101 : vector<8x1xf32>
    %103 = math.rsqrt %102 : vector<8x1xf32>
    %104 = vector.broadcast %103 : vector<8x1xf32> to vector<8x32xf32>
    %105 = arith.mulf %100, %104 : vector<8x32xf32>
    %106 = vector.broadcast %85 : vector<1x32xf32> to vector<8x32xf32>
    %107 = arith.mulf %105, %106 : vector<8x32xf32>
    %108 = vector.broadcast %87 : vector<1x32xf32> to vector<8x32xf32>
    %109 = arith.addf %107, %108 : vector<8x32xf32>
    %110 = arith.truncf %109 : vector<8x32xf32> to vector<8x32xbf16>
    %c0_31 = arith.constant 0 : index
    %c0_32 = arith.constant 0 : index
    %c0_33 = arith.constant 0 : index
    %111 = vector.load %arg11[%c0_31, %c0_32, %c0_33] : memref<1x32x64xbf16, #tpu.memory_space<vmem>>, vector<1x32x64xbf16>
    %112 = vector.shape_cast %111 : vector<1x32x64xbf16> to vector<32x64xbf16>
    %cst_34 = arith.constant dense<0.000000e+00> : vector<8x64xf32>
    %113 = tpu.matmul %110, %112, %cst_34 {dimension_numbers = #tpu.dot_dimension_numbers<[1], [0], [0], [1], [0, 0, 1, 1], [], []>} : vector<8x32xbf16>, vector<32x64xbf16>, vector<8x64xf32> -> vector<8x64xf32>
    %c0_35 = arith.constant 0 : index
    %c0_36 = arith.constant 0 : index
    %c0_37 = arith.constant 0 : index
    %114 = vector.load %arg12[%c0_35, %c0_36, %c0_37] : memref<1x1x64xf32, #tpu.memory_space<vmem>>, vector<1x1x64xf32>
    %115 = vector.shape_cast %114 : vector<1x1x64xf32> to vector<1x64xf32>
    %116 = vector.broadcast %115 : vector<1x64xf32> to vector<8x64xf32>
    %117 = arith.addf %113, %116 : vector<8x64xf32>
    %cst_38 = arith.constant 0.000000e+00 : f32
    %118 = vector.broadcast %cst_38 : f32 to vector<8x64xf32>
    %119 = arith.maximumf %117, %118 : vector<8x64xf32>
    %120 = arith.truncf %119 : vector<8x64xf32> to vector<8x64xbf16>
    %c0_39 = arith.constant 0 : index
    %c0_40 = arith.constant 0 : index
    %c0_41 = arith.constant 0 : index
    %121 = vector.load %arg13[%c0_39, %c0_40, %c0_41] : memref<1x64x32xbf16, #tpu.memory_space<vmem>>, vector<1x64x32xbf16>
    %122 = vector.shape_cast %121 : vector<1x64x32xbf16> to vector<64x32xbf16>
    %cst_42 = arith.constant dense<0.000000e+00> : vector<8x32xf32>
    %123 = tpu.matmul %120, %122, %cst_42 {dimension_numbers = #tpu.dot_dimension_numbers<[1], [0], [0], [1], [0, 0, 1, 1], [], []>} : vector<8x64xbf16>, vector<64x32xbf16>, vector<8x32xf32> -> vector<8x32xf32>
    %c0_43 = arith.constant 0 : index
    %c0_44 = arith.constant 0 : index
    %c0_45 = arith.constant 0 : index
    %124 = vector.load %arg14[%c0_43, %c0_44, %c0_45] : memref<1x1x32xf32, #tpu.memory_space<vmem>>, vector<1x1x32xf32>
    %125 = vector.shape_cast %124 : vector<1x1x32xf32> to vector<1x32xf32>
    %126 = vector.broadcast %125 : vector<1x32xf32> to vector<8x32xf32>
    %127 = arith.addf %123, %126 : vector<8x32xf32>
    %128 = arith.addf %109, %127 : vector<8x32xf32>
    %c0_46 = arith.constant 0 : index
    %c0_47 = arith.constant 0 : index
    %c0_48 = arith.constant 0 : index
    %129 = vector.load %arg15[%c0_46, %c0_47, %c0_48] : memref<1x1x32xf32, #tpu.memory_space<vmem>>, vector<1x1x32xf32>
    %130 = vector.shape_cast %129 : vector<1x1x32xf32> to vector<1x32xf32>
    %c0_49 = arith.constant 0 : index
    %c0_50 = arith.constant 0 : index
    %c0_51 = arith.constant 0 : index
    %131 = vector.load %arg16[%c0_49, %c0_50, %c0_51] : memref<1x1x32xf32, #tpu.memory_space<vmem>>, vector<1x1x32xf32>
    %132 = vector.shape_cast %131 : vector<1x1x32xf32> to vector<1x32xf32>
    %cst_52 = arith.constant dense<0.000000e+00> : vector<8xf32>
    %133 = vector.multi_reduction <add>, %128, %cst_52 [1] : vector<8x32xf32> to vector<8xf32>
    %134 = vector.shape_cast %133 : vector<8xf32> to vector<8x1xf32>
    %cst_53 = arith.constant 3.200000e+01 : f32
    %135 = vector.broadcast %cst_53 : f32 to vector<8x1xf32>
    %136 = arith.divf %134, %135 : vector<8x1xf32>
    %137 = vector.broadcast %136 : vector<8x1xf32> to vector<8x32xf32>
    %138 = arith.subf %128, %137 : vector<8x32xf32>
    %139 = arith.mulf %138, %138 : vector<8x32xf32>
    %cst_54 = arith.constant dense<0.000000e+00> : vector<8xf32>
    %140 = vector.multi_reduction <add>, %139, %cst_54 [1] : vector<8x32xf32> to vector<8xf32>
    %141 = vector.shape_cast %140 : vector<8xf32> to vector<8x1xf32>
    %cst_55 = arith.constant 3.200000e+01 : f32
    %142 = vector.broadcast %cst_55 : f32 to vector<8x1xf32>
    %143 = arith.divf %141, %142 : vector<8x1xf32>
    %144 = vector.broadcast %136 : vector<8x1xf32> to vector<8x32xf32>
    %145 = arith.subf %128, %144 : vector<8x32xf32>
    %cst_56 = arith.constant 9.99999974E-6 : f32
    %146 = vector.broadcast %cst_56 : f32 to vector<8x1xf32>
    %147 = arith.addf %143, %146 : vector<8x1xf32>
    %148 = math.rsqrt %147 : vector<8x1xf32>
    %149 = vector.broadcast %148 : vector<8x1xf32> to vector<8x32xf32>
    %150 = arith.mulf %145, %149 : vector<8x32xf32>
    %151 = vector.broadcast %130 : vector<1x32xf32> to vector<8x32xf32>
    %152 = arith.mulf %150, %151 : vector<8x32xf32>
    %153 = vector.broadcast %132 : vector<1x32xf32> to vector<8x32xf32>
    %154 = arith.addf %152, %153 : vector<8x32xf32>
    %c0_57 = arith.constant 0 : index
    %c0_58 = arith.constant 0 : index
    %155 = vector.load %arg27[%c0_57, %c0_58] : memref<8x32xf32, #tpu.memory_space<vmem>>, vector<8x32xf32>
    tpu.vector_store %arg27[%c0_57, %c0_58], %154 {strides = array<i32>} : memref<8x32xf32, #tpu.memory_space<vmem>>, vector<8x32xf32>,
    %c1_i32 = arith.constant 1 : i32
    %156 = arith.cmpi eq, %arg1, %c1_i32 : i32
    %157 = arith.extui %156 : i1 to i32
    %c0_i32_59 = arith.constant 0 : i32
    %158 = arith.cmpi ne, %157, %c0_i32_59 : i32
    scf.if %158 {
      %159 = vector.extract_strided_slice %154 {offsets = [0, 0], sizes = [1, 32], strides = [1, 1]} : vector<8x32xf32> to vector<1x32xf32>
      %c0_60 = arith.constant 0 : index
      %c0_61 = arith.constant 0 : index
      %160 = vector.load %arg17[%c0_60, %c0_61] : memref<32x16xf32, #tpu.memory_space<vmem>>, vector<32x16xf32>
      %cst_62 = arith.constant dense<0.000000e+00> : vector<1x16xf32>
      %161 = tpu.matmul %159, %160, %cst_62 {dimension_numbers = #tpu.dot_dimension_numbers<[1], [0], [0], [1], [0, 0, 1, 1], [], []>} : vector<1x32xf32>, vector<32x16xf32>, vector<1x16xf32> -> vector<1x16xf32>
      %c0_63 = arith.constant 0 : index
      %c0_64 = arith.constant 0 : index
      %162 = vector.load %arg18[%c0_63, %c0_64] : memref<1x16xf32, #tpu.memory_space<vmem>>, vector<1x16xf32>
      %163 = arith.addf %161, %162 : vector<1x16xf32>
      %c0_65 = arith.constant 0 : index
      %c0_66 = arith.constant 0 : index
      %164 = vector.load %arg19[%c0_65, %c0_66] : memref<32x16xf32, #tpu.memory_space<vmem>>, vector<32x16xf32>
      %cst_67 = arith.constant dense<0.000000e+00> : vector<1x16xf32>
      %165 = tpu.matmul %159, %164, %cst_67 {dimension_numbers = #tpu.dot_dimension_numbers<[1], [0], [0], [1], [0, 0, 1, 1], [], []>} : vector<1x32xf32>, vector<32x16xf32>, vector<1x16xf32> -> vector<1x16xf32>
      %c0_68 = arith.constant 0 : index
      %c0_69 = arith.constant 0 : index
      %166 = vector.load %arg20[%c0_68, %c0_69] : memref<1x16xf32, #tpu.memory_space<vmem>>, vector<1x16xf32>
      %167 = arith.addf %165, %166 : vector<1x16xf32>
      %c0_70 = arith.constant 0 : index
      %c0_71 = arith.constant 0 : index
      %c0_72 = arith.constant 0 : index
      %168 = vector.load %arg4[%c0_70, %c0_71, %c0_72] : memref<1x1x16xf32, #tpu.memory_space<vmem>>, vector<1x1x16xf32>
      %169 = vector.shape_cast %168 : vector<1x1x16xf32> to vector<1x16xf32>
      %cst_73 = arith.constant 5.000000e-01 : f32
      %170 = vector.broadcast %cst_73 : f32 to vector<1x16xf32>
      %171 = arith.mulf %170, %167 : vector<1x16xf32>
      %172 = math.exp %171 : vector<1x16xf32>
      %173 = arith.mulf %169, %172 : vector<1x16xf32>
      %174 = arith.addf %173, %163 : vector<1x16xf32>
      %c0_74 = arith.constant 0 : index
      %c0_75 = arith.constant 0 : index
      %175 = vector.load %arg21[%c0_74, %c0_75] : memref<16x32xf32, #tpu.memory_space<vmem>>, vector<16x32xf32>
      %cst_76 = arith.constant dense<0.000000e+00> : vector<1x32xf32>
      %176 = tpu.matmul %174, %175, %cst_76 {dimension_numbers = #tpu.dot_dimension_numbers<[1], [0], [0], [1], [0, 0, 1, 1], [], []>} : vector<1x16xf32>, vector<16x32xf32>, vector<1x32xf32> -> vector<1x32xf32>
      %c0_77 = arith.constant 0 : index
      %c0_78 = arith.constant 0 : index
      %177 = vector.load %arg22[%c0_77, %c0_78] : memref<1x32xf32, #tpu.memory_space<vmem>>, vector<1x32xf32>
      %178 = arith.addf %176, %177 : vector<1x32xf32>
      %c0_79 = arith.constant 0 : index
      %c0_80 = arith.constant 0 : index
      %c0_81 = arith.constant 0 : index
      %179 = vector.load %arg23[%c0_79, %c0_80, %c0_81] : memref<1x1x16xf32, #tpu.memory_space<vmem>>, vector<1x1x16xf32>
      %180 = vector.shape_cast %179 : vector<1x1x16xf32> to vector<1x16xf32>
      %181 = vector.shape_cast %163 : vector<1x16xf32> to vector<1x1x16xf32>
      tpu.vector_store %arg23[%c0_79, %c0_80, %c0_81], %181 {strides = array<i32>} : memref<1x1x16xf32, #tpu.memory_space<vmem>>, vector<1x1x16xf32>,
      %c0_82 = arith.constant 0 : index
      %c0_83 = arith.constant 0 : index
      %c0_84 = arith.constant 0 : index
      %182 = vector.load %arg24[%c0_82, %c0_83, %c0_84] : memref<1x1x16xf32, #tpu.memory_space<vmem>>, vector<1x1x16xf32>
      %183 = vector.shape_cast %182 : vector<1x1x16xf32> to vector<1x16xf32>
      %184 = vector.shape_cast %167 : vector<1x16xf32> to vector<1x1x16xf32>
      tpu.vector_store %arg24[%c0_82, %c0_83, %c0_84], %184 {strides = array<i32>} : memref<1x1x16xf32, #tpu.memory_space<vmem>>, vector<1x1x16xf32>,
      %c0_85 = arith.constant 0 : index
      %c0_86 = arith.constant 0 : index
      %c0_87 = arith.constant 0 : index
      %185 = vector.load %arg25[%c0_85, %c0_86, %c0_87] : memref<1x1x16xf32, #tpu.memory_space<vmem>>, vector<1x1x16xf32>
      %186 = vector.shape_cast %185 : vector<1x1x16xf32> to vector<1x16xf32>
      %187 = vector.shape_cast %174 : vector<1x16xf32> to vector<1x1x16xf32>
      tpu.vector_store %arg25[%c0_85, %c0_86, %c0_87], %187 {strides = array<i32>} : memref<1x1x16xf32, #tpu.memory_space<vmem>>, vector<1x1x16xf32>,
      %c0_88 = arith.constant 0 : index
      %c0_89 = arith.constant 0 : index
      %c0_90 = arith.constant 0 : index
      %188 = vector.load %arg26[%c0_88, %c0_89, %c0_90] : memref<1x1x32xf32, #tpu.memory_space<vmem>>, vector<1x1x32xf32>
      %189 = vector.shape_cast %188 : vector<1x1x32xf32> to vector<1x32xf32>
      %190 = vector.shape_cast %178 : vector<1x32xf32> to vector<1x1x32xf32>
      tpu.vector_store %arg26[%c0_88, %c0_89, %c0_90], %190 {strides = array<i32>} : memref<1x1x32xf32, #tpu.memory_space<vmem>>, vector<1x1x32xf32>,
    } else {
    }
    return
  }
  func.func @transform_0(%arg0: i32, %arg1: i32) -> (i32, i32) {
    %c0_i32 = arith.constant 0 : i32
    %c0_i32_0 = arith.constant 0 : i32
    return %arg0, %c0_i32 : i32, i32
  }
  func.func @transform_1(%arg0: i32, %arg1: i32) -> (i32, i32) {
    %c0_i32 = arith.constant 0 : i32
    %c0_i32_0 = arith.constant 0 : i32
    %c0_i32_1 = arith.constant 0 : i32
    return %c0_i32, %c0_i32_0 : i32, i32
  }
  func.func @transform_2(%arg0: i32, %arg1: i32) -> (i32, i32, i32) {
    %c0_i32 = arith.constant 0 : i32
    %c0_i32_0 = arith.constant 0 : i32
    %c0_i32_1 = arith.constant 0 : i32
    return %arg0, %c0_i32, %c0_i32_0 : i32, i32, i32
  }
  func.func @transform_3(%arg0: i32, %arg1: i32) -> (i32, i32, i32) {
    %c0_i32 = arith.constant 0 : i32
    %c0_i32_0 = arith.constant 0 : i32
    %c0_i32_1 = arith.constant 0 : i32
    return %arg1, %c0_i32, %c0_i32_0 : i32, i32, i32
  }
  func.func @transform_4(%arg0: i32, %arg1: i32) -> (i32, i32, i32) {
    %c0_i32 = arith.constant 0 : i32
    %c0_i32_0 = arith.constant 0 : i32
    %c0_i32_1 = arith.constant 0 : i32
    return %arg1, %c0_i32, %c0_i32_0 : i32, i32, i32
  }
  func.func @transform_5(%arg0: i32, %arg1: i32) -> (i32, i32, i32) {
    %c0_i32 = arith.constant 0 : i32
    %c0_i32_0 = arith.constant 0 : i32
    %c0_i32_1 = arith.constant 0 : i32
    return %arg1, %c0_i32, %c0_i32_0 : i32, i32, i32
  }
  func.func @transform_6(%arg0: i32, %arg1: i32) -> (i32, i32, i32) {
    %c0_i32 = arith.constant 0 : i32
    %c0_i32_0 = arith.constant 0 : i32
    %c0_i32_1 = arith.constant 0 : i32
    return %arg1, %c0_i32, %c0_i32_0 : i32, i32, i32
  }
  func.func @transform_7(%arg0: i32, %arg1: i32) -> (i32, i32, i32) {
    %c0_i32 = arith.constant 0 : i32
    %c0_i32_0 = arith.constant 0 : i32
    %c0_i32_1 = arith.constant 0 : i32
    return %arg1, %c0_i32, %c0_i32_0 : i32, i32, i32
  }
  func.func @transform_8(%arg0: i32, %arg1: i32) -> (i32, i32, i32) {
    %c0_i32 = arith.constant 0 : i32
    %c0_i32_0 = arith.constant 0 : i32
    %c0_i32_1 = arith.constant 0 : i32
    return %arg1, %c0_i32, %c0_i32_0 : i32, i32, i32
  }
  func.func @transform_9(%arg0: i32, %arg1: i32) -> (i32, i32, i32) {
    %c0_i32 = arith.constant 0 : i32
    %c0_i32_0 = arith.constant 0 : i32
    %c0_i32_1 = arith.constant 0 : i32
    return %arg1, %c0_i32, %c0_i32_0 : i32, i32, i32
  }
  func.func @transform_10(%arg0: i32, %arg1: i32) -> (i32, i32, i32) {
    %c0_i32 = arith.constant 0 : i32
    %c0_i32_0 = arith.constant 0 : i32
    %c0_i32_1 = arith.constant 0 : i32
    return %arg1, %c0_i32, %c0_i32_0 : i32, i32, i32
  }
  func.func @transform_11(%arg0: i32, %arg1: i32) -> (i32, i32, i32) {
    %c0_i32 = arith.constant 0 : i32
    %c0_i32_0 = arith.constant 0 : i32
    %c0_i32_1 = arith.constant 0 : i32
    return %arg1, %c0_i32, %c0_i32_0 : i32, i32, i32
  }
  func.func @transform_12(%arg0: i32, %arg1: i32) -> (i32, i32, i32) {
    %c0_i32 = arith.constant 0 : i32
    %c0_i32_0 = arith.constant 0 : i32
    %c0_i32_1 = arith.constant 0 : i32
    return %arg1, %c0_i32, %c0_i32_0 : i32, i32, i32
  }
  func.func @transform_13(%arg0: i32, %arg1: i32) -> (i32, i32, i32) {
    %c0_i32 = arith.constant 0 : i32
    %c0_i32_0 = arith.constant 0 : i32
    %c0_i32_1 = arith.constant 0 : i32
    return %arg1, %c0_i32, %c0_i32_0 : i32, i32, i32
  }
  func.func @transform_14(%arg0: i32, %arg1: i32) -> (i32, i32, i32) {
    %c0_i32 = arith.constant 0 : i32
    %c0_i32_0 = arith.constant 0 : i32
    %c0_i32_1 = arith.constant 0 : i32
    return %arg1, %c0_i32, %c0_i32_0 : i32, i32, i32
  }
  func.func @transform_15(%arg0: i32, %arg1: i32) -> (i32, i32) {
    %c0_i32 = arith.constant 0 : i32
    %c0_i32_0 = arith.constant 0 : i32
    %c0_i32_1 = arith.constant 0 : i32
    return %c0_i32, %c0_i32_0 : i32, i32
  }
  func.func @transform_16(%arg0: i32, %arg1: i32) -> (i32, i32) {
    %c0_i32 = arith.constant 0 : i32
    %c0_i32_0 = arith.constant 0 : i32
    %c0_i32_1 = arith.constant 0 : i32
    return %c0_i32, %c0_i32_0 : i32, i32
  }
  func.func @transform_17(%arg0: i32, %arg1: i32) -> (i32, i32) {
    %c0_i32 = arith.constant 0 : i32
    %c0_i32_0 = arith.constant 0 : i32
    %c0_i32_1 = arith.constant 0 : i32
    return %c0_i32, %c0_i32_0 : i32, i32
  }
  func.func @transform_18(%arg0: i32, %arg1: i32) -> (i32, i32) {
    %c0_i32 = arith.constant 0 : i32
    %c0_i32_0 = arith.constant 0 : i32
    %c0_i32_1 = arith.constant 0 : i32
    return %c0_i32, %c0_i32_0 : i32, i32
  }
  func.func @transform_19(%arg0: i32, %arg1: i32) -> (i32, i32) {
    %c0_i32 = arith.constant 0 : i32
    %c0_i32_0 = arith.constant 0 : i32
    %c0_i32_1 = arith.constant 0 : i32
    return %c0_i32, %c0_i32_0 : i32, i32
  }
  func.func @transform_20(%arg0: i32, %arg1: i32) -> (i32, i32) {
    %c0_i32 = arith.constant 0 : i32
    %c0_i32_0 = arith.constant 0 : i32
    %c0_i32_1 = arith.constant 0 : i32
    return %c0_i32, %c0_i32_0 : i32, i32
  }
  func.func @transform_21(%arg0: i32, %arg1: i32) -> (i32, i32, i32) {
    %c0_i32 = arith.constant 0 : i32
    %c0_i32_0 = arith.constant 0 : i32
    %c0_i32_1 = arith.constant 0 : i32
    return %arg0, %c0_i32, %c0_i32_0 : i32, i32, i32
  }
  func.func @transform_22(%arg0: i32, %arg1: i32) -> (i32, i32, i32) {
    %c0_i32 = arith.constant 0 : i32
    %c0_i32_0 = arith.constant 0 : i32
    %c0_i32_1 = arith.constant 0 : i32
    return %arg0, %c0_i32, %c0_i32_0 : i32, i32, i32
  }
  func.func @transform_23(%arg0: i32, %arg1: i32) -> (i32, i32, i32) {
    %c0_i32 = arith.constant 0 : i32
    %c0_i32_0 = arith.constant 0 : i32
    %c0_i32_1 = arith.constant 0 : i32
    return %arg0, %c0_i32, %c0_i32_0 : i32, i32, i32
  }
  func.func @transform_24(%arg0: i32, %arg1: i32) -> (i32, i32, i32) {
    %c0_i32 = arith.constant 0 : i32
    %c0_i32_0 = arith.constant 0 : i32
    %c0_i32_1 = arith.constant 0 : i32
    return %arg0, %c0_i32, %c0_i32_0 : i32, i32, i32
  }
}

module attributes {stable_mosaic.version = 11 : i64} {
  func.func @_dec_kernel(%arg0: i32, %arg1: i32, %arg2: memref<8x32xf32, #tpu.memory_space<vmem>>, %arg3: memref<8x32xf32, #tpu.memory_space<vmem>>, %arg4: memref<8x32xf32, #tpu.memory_space<vmem>>, %arg5: memref<8x8xf32, #tpu.memory_space<vmem>>, %arg6: memref<1x32x96xbf16, #tpu.memory_space<vmem>>, %arg7: memref<1x1x96xf32, #tpu.memory_space<vmem>>, %arg8: memref<1x32x32xbf16, #tpu.memory_space<vmem>>, %arg9: memref<1x1x32xf32, #tpu.memory_space<vmem>>, %arg10: memref<1x1x32xf32, #tpu.memory_space<vmem>>, %arg11: memref<1x1x32xf32, #tpu.memory_space<vmem>>, %arg12: memref<1x32x32xbf16, #tpu.memory_space<vmem>>, %arg13: memref<1x1x32xf32, #tpu.memory_space<vmem>>, %arg14: memref<1x32x64xbf16, #tpu.memory_space<vmem>>, %arg15: memref<1x1x64xf32, #tpu.memory_space<vmem>>, %arg16: memref<1x32x32xbf16, #tpu.memory_space<vmem>>, %arg17: memref<1x1x32xf32, #tpu.memory_space<vmem>>, %arg18: memref<1x1x32xf32, #tpu.memory_space<vmem>>, %arg19: memref<1x1x32xf32, #tpu.memory_space<vmem>>, %arg20: memref<1x32x64xbf16, #tpu.memory_space<vmem>>, %arg21: memref<1x1x64xf32, #tpu.memory_space<vmem>>, %arg22: memref<1x64x32xbf16, #tpu.memory_space<vmem>>, %arg23: memref<1x1x32xf32, #tpu.memory_space<vmem>>, %arg24: memref<1x1x32xf32, #tpu.memory_space<vmem>>, %arg25: memref<1x1x32xf32, #tpu.memory_space<vmem>>, %arg26: memref<32x32xf32, #tpu.memory_space<vmem>>, %arg27: memref<1x32xf32, #tpu.memory_space<vmem>>, %arg28: memref<8x32xf32, #tpu.memory_space<vmem>>, %arg29: memref<8x32xf32, #tpu.memory_space<vmem>>) attributes {dimension_semantics = [#tpu.dimension_semantics<parallel>, #tpu.dimension_semantics<arbitrary>], iteration_bounds = array<i64: 2, 2>, scalar_prefetch = 0 : i64, scratch_operands = 1 : i64, tpu.core_type = #tpu.core_type<tc>, window_params = [{transform_indices = @transform_0, window_bounds = array<i64: 8, 32>}, {pipeline_mode = #tpu.pipeline_mode<synchronous>, transform_indices = @transform_1, window_bounds = array<i64: 8, 32>}, {transform_indices = @transform_2, window_bounds = array<i64: 8, 32>}, {pipeline_mode = #tpu.pipeline_mode<synchronous>, transform_indices = @transform_3, window_bounds = array<i64: 8, 8>}, {transform_indices = @transform_4, window_bounds = array<i64: 1, 32, 96>}, {transform_indices = @transform_5, window_bounds = array<i64: 1, 1, 96>}, {transform_indices = @transform_6, window_bounds = array<i64: 1, 32, 32>}, {transform_indices = @transform_7, window_bounds = array<i64: 1, 1, 32>}, {transform_indices = @transform_8, window_bounds = array<i64: 1, 1, 32>}, {transform_indices = @transform_9, window_bounds = array<i64: 1, 1, 32>}, {transform_indices = @transform_10, window_bounds = array<i64: 1, 32, 32>}, {transform_indices = @transform_11, window_bounds = array<i64: 1, 1, 32>}, {transform_indices = @transform_12, window_bounds = array<i64: 1, 32, 64>}, {transform_indices = @transform_13, window_bounds = array<i64: 1, 1, 64>}, {transform_indices = @transform_14, window_bounds = array<i64: 1, 32, 32>}, {transform_indices = @transform_15, window_bounds = array<i64: 1, 1, 32>}, {transform_indices = @transform_16, window_bounds = array<i64: 1, 1, 32>}, {transform_indices = @transform_17, window_bounds = array<i64: 1, 1, 32>}, {transform_indices = @transform_18, window_bounds = array<i64: 1, 32, 64>}, {transform_indices = @transform_19, window_bounds = array<i64: 1, 1, 64>}, {transform_indices = @transform_20, window_bounds = array<i64: 1, 64, 32>}, {transform_indices = @transform_21, window_bounds = array<i64: 1, 1, 32>}, {transform_indices = @transform_22, window_bounds = array<i64: 1, 1, 32>}, {transform_indices = @transform_23, window_bounds = array<i64: 1, 1, 32>}, {pipeline_mode = #tpu.pipeline_mode<synchronous>, transform_indices = @transform_24, window_bounds = array<i64: 32, 32>}, {pipeline_mode = #tpu.pipeline_mode<synchronous>, transform_indices = @transform_25, window_bounds = array<i64: 1, 32>}, {transform_indices = @transform_26, window_bounds = array<i64: 8, 32>}]} {
    %c0_i32 = arith.constant 0 : i32
    %0 = arith.cmpi eq, %arg1, %c0_i32 : i32
    %1 = arith.extui %0 : i1 to i32
    %c0_i32_0 = arith.constant 0 : i32
    %2 = arith.cmpi ne, %1, %c0_i32_0 : i32
    scf.if %2 {
      %c0_101 = arith.constant 0 : index
      %c0_102 = arith.constant 0 : index
      %277 = vector.load %arg3[%c0_101, %c0_102] : memref<8x32xf32, #tpu.memory_space<vmem>>, vector<8x32xf32>
      %c0_103 = arith.constant 0 : index
      %c0_104 = arith.constant 0 : index
      %278 = vector.load %arg2[%c0_103, %c0_104] : memref<8x32xf32, #tpu.memory_space<vmem>>, vector<8x32xf32>
      %279 = arith.addf %278, %277 : vector<8x32xf32>
      %c0_105 = arith.constant 0 : index
      %c0_106 = arith.constant 0 : index
      %280 = vector.load %arg29[%c0_105, %c0_106] : memref<8x32xf32, #tpu.memory_space<vmem>>, vector<8x32xf32>
      tpu.vector_store %arg29[%c0_105, %c0_106], %279 {strides = array<i32>} : memref<8x32xf32, #tpu.memory_space<vmem>>, vector<8x32xf32>,
    } else {
    }
    %c0 = arith.constant 0 : index
    %c0_1 = arith.constant 0 : index
    %3 = vector.load %arg29[%c0, %c0_1] : memref<8x32xf32, #tpu.memory_space<vmem>>, vector<8x32xf32>
    %c0_2 = arith.constant 0 : index
    %c0_3 = arith.constant 0 : index
    %4 = vector.load %arg4[%c0_2, %c0_3] : memref<8x32xf32, #tpu.memory_space<vmem>>, vector<8x32xf32>
    %c0_4 = arith.constant 0 : index
    %c0_5 = arith.constant 0 : index
    %5 = vector.load %arg5[%c0_4, %c0_5] : memref<8x8xf32, #tpu.memory_space<vmem>>, vector<8x8xf32>
    %6 = arith.truncf %3 : vector<8x32xf32> to vector<8x32xbf16>
    %c0_6 = arith.constant 0 : index
    %c0_7 = arith.constant 0 : index
    %c0_8 = arith.constant 0 : index
    %7 = vector.load %arg6[%c0_6, %c0_7, %c0_8] : memref<1x32x96xbf16, #tpu.memory_space<vmem>>, vector<1x32x96xbf16>
    %8 = vector.shape_cast %7 : vector<1x32x96xbf16> to vector<32x96xbf16>
    %cst = arith.constant dense<0.000000e+00> : vector<8x96xf32>
    %9 = tpu.matmul %6, %8, %cst {dimension_numbers = #tpu.dot_dimension_numbers<[1], [0], [0], [1], [0, 0, 1, 1], [], []>} : vector<8x32xbf16>, vector<32x96xbf16>, vector<8x96xf32> -> vector<8x96xf32>
    %c0_9 = arith.constant 0 : index
    %c0_10 = arith.constant 0 : index
    %c0_11 = arith.constant 0 : index
    %10 = vector.load %arg7[%c0_9, %c0_10, %c0_11] : memref<1x1x96xf32, #tpu.memory_space<vmem>>, vector<1x1x96xf32>
    %11 = vector.shape_cast %10 : vector<1x1x96xf32> to vector<1x96xf32>
    %12 = vector.broadcast %11 : vector<1x96xf32> to vector<8x96xf32>
    %13 = arith.addf %9, %12 : vector<8x96xf32>
    %14 = vector.extract_strided_slice %13 {offsets = [0, 0], sizes = [8, 32], strides = [1, 1]} : vector<8x96xf32> to vector<8x32xf32>
    %15 = vector.extract_strided_slice %13 {offsets = [0, 32], sizes = [8, 32], strides = [1, 1]} : vector<8x96xf32> to vector<8x32xf32>
    %16 = vector.extract_strided_slice %13 {offsets = [0, 64], sizes = [8, 32], strides = [1, 1]} : vector<8x96xf32> to vector<8x32xf32>
    %17 = vector.extract_strided_slice %14 {offsets = [0, 0], sizes = [8, 8], strides = [1, 1]} : vector<8x32xf32> to vector<8x8xf32>
    %18 = vector.extract_strided_slice %14 {offsets = [0, 8], sizes = [8, 8], strides = [1, 1]} : vector<8x32xf32> to vector<8x8xf32>
    %19 = vector.extract_strided_slice %14 {offsets = [0, 16], sizes = [8, 8], strides = [1, 1]} : vector<8x32xf32> to vector<8x8xf32>
    %20 = vector.extract_strided_slice %14 {offsets = [0, 24], sizes = [8, 8], strides = [1, 1]} : vector<8x32xf32> to vector<8x8xf32>
    %21 = vector.shape_cast %17 : vector<8x8xf32> to vector<1x8x8xf32>
    %22 = vector.shape_cast %18 : vector<8x8xf32> to vector<1x8x8xf32>
    %23 = vector.shape_cast %19 : vector<8x8xf32> to vector<1x8x8xf32>
    %24 = vector.shape_cast %20 : vector<8x8xf32> to vector<1x8x8xf32>
    %25 = tpu.concatenate %21, %22, %23, %24 in 0 : vector<1x8x8xf32>, vector<1x8x8xf32>, vector<1x8x8xf32>, vector<1x8x8xf32> -> vector<4x8x8xf32>
    %26 = vector.extract_strided_slice %15 {offsets = [0, 0], sizes = [8, 8], strides = [1, 1]} : vector<8x32xf32> to vector<8x8xf32>
    %27 = vector.extract_strided_slice %15 {offsets = [0, 8], sizes = [8, 8], strides = [1, 1]} : vector<8x32xf32> to vector<8x8xf32>
    %28 = vector.extract_strided_slice %15 {offsets = [0, 16], sizes = [8, 8], strides = [1, 1]} : vector<8x32xf32> to vector<8x8xf32>
    %29 = vector.extract_strided_slice %15 {offsets = [0, 24], sizes = [8, 8], strides = [1, 1]} : vector<8x32xf32> to vector<8x8xf32>
    %30 = vector.shape_cast %26 : vector<8x8xf32> to vector<1x8x8xf32>
    %31 = vector.shape_cast %27 : vector<8x8xf32> to vector<1x8x8xf32>
    %32 = vector.shape_cast %28 : vector<8x8xf32> to vector<1x8x8xf32>
    %33 = vector.shape_cast %29 : vector<8x8xf32> to vector<1x8x8xf32>
    %34 = tpu.concatenate %30, %31, %32, %33 in 0 : vector<1x8x8xf32>, vector<1x8x8xf32>, vector<1x8x8xf32>, vector<1x8x8xf32> -> vector<4x8x8xf32>
    %35 = vector.extract_strided_slice %16 {offsets = [0, 0], sizes = [8, 8], strides = [1, 1]} : vector<8x32xf32> to vector<8x8xf32>
    %36 = vector.extract_strided_slice %16 {offsets = [0, 8], sizes = [8, 8], strides = [1, 1]} : vector<8x32xf32> to vector<8x8xf32>
    %37 = vector.extract_strided_slice %16 {offsets = [0, 16], sizes = [8, 8], strides = [1, 1]} : vector<8x32xf32> to vector<8x8xf32>
    %38 = vector.extract_strided_slice %16 {offsets = [0, 24], sizes = [8, 8], strides = [1, 1]} : vector<8x32xf32> to vector<8x8xf32>
    %39 = vector.shape_cast %35 : vector<8x8xf32> to vector<1x8x8xf32>
    %40 = vector.shape_cast %36 : vector<8x8xf32> to vector<1x8x8xf32>
    %41 = vector.shape_cast %37 : vector<8x8xf32> to vector<1x8x8xf32>
    %42 = vector.shape_cast %38 : vector<8x8xf32> to vector<1x8x8xf32>
    %43 = tpu.concatenate %39, %40, %41, %42 in 0 : vector<1x8x8xf32>, vector<1x8x8xf32>, vector<1x8x8xf32>, vector<1x8x8xf32> -> vector<4x8x8xf32>
    %cst_12 = arith.constant dense<0.000000e+00> : vector<4x8x8xf32>
    %44 = tpu.matmul %25, %34, %cst_12 {dimension_numbers = #tpu.dot_dimension_numbers<[2], [2], [1], [1], [0, 0, 0, 1, 1, 1], [0], [0]>} : vector<4x8x8xf32>, vector<4x8x8xf32>, vector<4x8x8xf32> -> vector<4x8x8xf32>
    %cst_13 = arith.constant 0.353553385 : f32
    %45 = vector.broadcast %cst_13 : f32 to vector<4x8x8xf32>
    %46 = arith.mulf %44, %45 : vector<4x8x8xf32>
    %47 = vector.shape_cast %5 : vector<8x8xf32> to vector<1x8x8xf32>
    %48 = vector.broadcast %47 : vector<1x8x8xf32> to vector<4x8x8xf32>
    %49 = arith.addf %46, %48 : vector<4x8x8xf32>
    %cst_14 = arith.constant dense<0xFF800000> : vector<4x8xf32>
    %50 = vector.multi_reduction <maximumf>, %49, %cst_14 [2] : vector<4x8x8xf32> to vector<4x8xf32>
    %51 = vector.shape_cast %50 : vector<4x8xf32> to vector<4x8x1xf32>
    %52 = vector.broadcast %51 : vector<4x8x1xf32> to vector<4x8x8xf32>
    %53 = arith.subf %49, %52 : vector<4x8x8xf32>
    %54 = math.exp %53 : vector<4x8x8xf32>
    %cst_15 = arith.constant dense<0.000000e+00> : vector<4x8xf32>
    %55 = vector.multi_reduction <add>, %54, %cst_15 [2] : vector<4x8x8xf32> to vector<4x8xf32>
    %56 = vector.shape_cast %55 : vector<4x8xf32> to vector<4x8x1xf32>
    %57 = vector.broadcast %56 : vector<4x8x1xf32> to vector<4x8x8xf32>
    %58 = arith.divf %54, %57 : vector<4x8x8xf32>
    %cst_16 = arith.constant dense<0.000000e+00> : vector<4x8x8xf32>
    %59 = tpu.matmul %58, %43, %cst_16 {dimension_numbers = #tpu.dot_dimension_numbers<[2], [1], [1], [2], [0, 0, 0, 1, 1, 2], [0], [0]>} : vector<4x8x8xf32>, vector<4x8x8xf32>, vector<4x8x8xf32> -> vector<4x8x8xf32>
    %c0_17 = arith.constant 0 : index
    %c0_18 = arith.constant 0 : index
    %c0_19 = arith.constant 0 : index
    %60 = vector.load %arg8[%c0_17, %c0_18, %c0_19] : memref<1x32x32xbf16, #tpu.memory_space<vmem>>, vector<1x32x32xbf16>
    %61 = vector.shape_cast %60 : vector<1x32x32xbf16> to vector<32x32xbf16>
    %62 = vector.extract_strided_slice %61 {offsets = [0, 0], sizes = [8, 32], strides = [1, 1]} : vector<32x32xbf16> to vector<8x32xbf16>
    %63 = vector.extract_strided_slice %61 {offsets = [8, 0], sizes = [8, 32], strides = [1, 1]} : vector<32x32xbf16> to vector<8x32xbf16>
    %64 = vector.extract_strided_slice %61 {offsets = [16, 0], sizes = [8, 32], strides = [1, 1]} : vector<32x32xbf16> to vector<8x32xbf16>
    %65 = vector.extract_strided_slice %61 {offsets = [24, 0], sizes = [8, 32], strides = [1, 1]} : vector<32x32xbf16> to vector<8x32xbf16>
    %66 = vector.shape_cast %62 : vector<8x32xbf16> to vector<1x8x32xbf16>
    %67 = vector.shape_cast %63 : vector<8x32xbf16> to vector<1x8x32xbf16>
    %68 = vector.shape_cast %64 : vector<8x32xbf16> to vector<1x8x32xbf16>
    %69 = vector.shape_cast %65 : vector<8x32xbf16> to vector<1x8x32xbf16>
    %70 = tpu.concatenate %66, %67, %68, %69 in 0 : vector<1x8x32xbf16>, vector<1x8x32xbf16>, vector<1x8x32xbf16>, vector<1x8x32xbf16> -> vector<4x8x32xbf16>
    %71 = arith.truncf %59 : vector<4x8x8xf32> to vector<4x8x8xbf16>
    %cst_20 = arith.constant dense<0.000000e+00> : vector<4x8x32xf32>
    %72 = tpu.matmul %71, %70, %cst_20 {dimension_numbers = #tpu.dot_dimension_numbers<[2], [1], [1], [2], [0, 0, 0, 1, 1, 2], [0], [0]>} : vector<4x8x8xbf16>, vector<4x8x32xbf16>, vector<4x8x32xf32> -> vector<4x8x32xf32>
    %73 = vector.extract_strided_slice %72 {offsets = [0, 0, 0], sizes = [1, 8, 32], strides = [1, 1, 1]} : vector<4x8x32xf32> to vector<1x8x32xf32>
    %74 = vector.shape_cast %73 : vector<1x8x32xf32> to vector<8x32xf32>
    %75 = vector.extract_strided_slice %72 {offsets = [1, 0, 0], sizes = [1, 8, 32], strides = [1, 1, 1]} : vector<4x8x32xf32> to vector<1x8x32xf32>
    %76 = vector.shape_cast %75 : vector<1x8x32xf32> to vector<8x32xf32>
    %77 = arith.addf %74, %76 : vector<8x32xf32>
    %78 = vector.extract_strided_slice %72 {offsets = [2, 0, 0], sizes = [1, 8, 32], strides = [1, 1, 1]} : vector<4x8x32xf32> to vector<1x8x32xf32>
    %79 = vector.shape_cast %78 : vector<1x8x32xf32> to vector<8x32xf32>
    %80 = arith.addf %77, %79 : vector<8x32xf32>
    %81 = vector.extract_strided_slice %72 {offsets = [3, 0, 0], sizes = [1, 8, 32], strides = [1, 1, 1]} : vector<4x8x32xf32> to vector<1x8x32xf32>
    %82 = vector.shape_cast %81 : vector<1x8x32xf32> to vector<8x32xf32>
    %83 = arith.addf %80, %82 : vector<8x32xf32>
    %c0_21 = arith.constant 0 : index
    %c0_22 = arith.constant 0 : index
    %c0_23 = arith.constant 0 : index
    %84 = vector.load %arg9[%c0_21, %c0_22, %c0_23] : memref<1x1x32xf32, #tpu.memory_space<vmem>>, vector<1x1x32xf32>
    %85 = vector.shape_cast %84 : vector<1x1x32xf32> to vector<1x32xf32>
    %86 = vector.broadcast %85 : vector<1x32xf32> to vector<8x32xf32>
    %87 = arith.addf %83, %86 : vector<8x32xf32>
    %88 = arith.addf %3, %87 : vector<8x32xf32>
    %c0_24 = arith.constant 0 : index
    %c0_25 = arith.constant 0 : index
    %c0_26 = arith.constant 0 : index
    %89 = vector.load %arg10[%c0_24, %c0_25, %c0_26] : memref<1x1x32xf32, #tpu.memory_space<vmem>>, vector<1x1x32xf32>
    %90 = vector.shape_cast %89 : vector<1x1x32xf32> to vector<1x32xf32>
    %c0_27 = arith.constant 0 : index
    %c0_28 = arith.constant 0 : index
    %c0_29 = arith.constant 0 : index
    %91 = vector.load %arg11[%c0_27, %c0_28, %c0_29] : memref<1x1x32xf32, #tpu.memory_space<vmem>>, vector<1x1x32xf32>
    %92 = vector.shape_cast %91 : vector<1x1x32xf32> to vector<1x32xf32>
    %cst_30 = arith.constant dense<0.000000e+00> : vector<8xf32>
    %93 = vector.multi_reduction <add>, %88, %cst_30 [1] : vector<8x32xf32> to vector<8xf32>
    %94 = vector.shape_cast %93 : vector<8xf32> to vector<8x1xf32>
    %cst_31 = arith.constant 3.200000e+01 : f32
    %95 = vector.broadcast %cst_31 : f32 to vector<8x1xf32>
    %96 = arith.divf %94, %95 : vector<8x1xf32>
    %97 = vector.broadcast %96 : vector<8x1xf32> to vector<8x32xf32>
    %98 = arith.subf %88, %97 : vector<8x32xf32>
    %99 = arith.mulf %98, %98 : vector<8x32xf32>
    %cst_32 = arith.constant dense<0.000000e+00> : vector<8xf32>
    %100 = vector.multi_reduction <add>, %99, %cst_32 [1] : vector<8x32xf32> to vector<8xf32>
    %101 = vector.shape_cast %100 : vector<8xf32> to vector<8x1xf32>
    %cst_33 = arith.constant 3.200000e+01 : f32
    %102 = vector.broadcast %cst_33 : f32 to vector<8x1xf32>
    %103 = arith.divf %101, %102 : vector<8x1xf32>
    %104 = vector.broadcast %96 : vector<8x1xf32> to vector<8x32xf32>
    %105 = arith.subf %88, %104 : vector<8x32xf32>
    %cst_34 = arith.constant 9.99999974E-6 : f32
    %106 = vector.broadcast %cst_34 : f32 to vector<8x1xf32>
    %107 = arith.addf %103, %106 : vector<8x1xf32>
    %108 = math.rsqrt %107 : vector<8x1xf32>
    %109 = vector.broadcast %108 : vector<8x1xf32> to vector<8x32xf32>
    %110 = arith.mulf %105, %109 : vector<8x32xf32>
    %111 = vector.broadcast %90 : vector<1x32xf32> to vector<8x32xf32>
    %112 = arith.mulf %110, %111 : vector<8x32xf32>
    %113 = vector.broadcast %92 : vector<1x32xf32> to vector<8x32xf32>
    %114 = arith.addf %112, %113 : vector<8x32xf32>
    %115 = arith.truncf %114 : vector<8x32xf32> to vector<8x32xbf16>
    %c0_35 = arith.constant 0 : index
    %c0_36 = arith.constant 0 : index
    %c0_37 = arith.constant 0 : index
    %116 = vector.load %arg12[%c0_35, %c0_36, %c0_37] : memref<1x32x32xbf16, #tpu.memory_space<vmem>>, vector<1x32x32xbf16>
    %117 = vector.shape_cast %116 : vector<1x32x32xbf16> to vector<32x32xbf16>
    %cst_38 = arith.constant dense<0.000000e+00> : vector<8x32xf32>
    %118 = tpu.matmul %115, %117, %cst_38 {dimension_numbers = #tpu.dot_dimension_numbers<[1], [0], [0], [1], [0, 0, 1, 1], [], []>} : vector<8x32xbf16>, vector<32x32xbf16>, vector<8x32xf32> -> vector<8x32xf32>
    %c0_39 = arith.constant 0 : index
    %c0_40 = arith.constant 0 : index
    %c0_41 = arith.constant 0 : index
    %119 = vector.load %arg13[%c0_39, %c0_40, %c0_41] : memref<1x1x32xf32, #tpu.memory_space<vmem>>, vector<1x1x32xf32>
    %120 = vector.shape_cast %119 : vector<1x1x32xf32> to vector<1x32xf32>
    %121 = vector.broadcast %120 : vector<1x32xf32> to vector<8x32xf32>
    %122 = arith.addf %118, %121 : vector<8x32xf32>
    %123 = arith.truncf %4 : vector<8x32xf32> to vector<8x32xbf16>
    %c0_42 = arith.constant 0 : index
    %c0_43 = arith.constant 0 : index
    %c0_44 = arith.constant 0 : index
    %124 = vector.load %arg14[%c0_42, %c0_43, %c0_44] : memref<1x32x64xbf16, #tpu.memory_space<vmem>>, vector<1x32x64xbf16>
    %125 = vector.shape_cast %124 : vector<1x32x64xbf16> to vector<32x64xbf16>
    %cst_45 = arith.constant dense<0.000000e+00> : vector<8x64xf32>
    %126 = tpu.matmul %123, %125, %cst_45 {dimension_numbers = #tpu.dot_dimension_numbers<[1], [0], [0], [1], [0, 0, 1, 1], [], []>} : vector<8x32xbf16>, vector<32x64xbf16>, vector<8x64xf32> -> vector<8x64xf32>
    %c0_46 = arith.constant 0 : index
    %c0_47 = arith.constant 0 : index
    %c0_48 = arith.constant 0 : index
    %127 = vector.load %arg15[%c0_46, %c0_47, %c0_48] : memref<1x1x64xf32, #tpu.memory_space<vmem>>, vector<1x1x64xf32>
    %128 = vector.shape_cast %127 : vector<1x1x64xf32> to vector<1x64xf32>
    %129 = vector.broadcast %128 : vector<1x64xf32> to vector<8x64xf32>
    %130 = arith.addf %126, %129 : vector<8x64xf32>
    %131 = vector.extract_strided_slice %130 {offsets = [0, 0], sizes = [8, 32], strides = [1, 1]} : vector<8x64xf32> to vector<8x32xf32>
    %132 = vector.extract_strided_slice %130 {offsets = [0, 32], sizes = [8, 32], strides = [1, 1]} : vector<8x64xf32> to vector<8x32xf32>
    %133 = vector.extract_strided_slice %122 {offsets = [0, 0], sizes = [8, 8], strides = [1, 1]} : vector<8x32xf32> to vector<8x8xf32>
    %134 = vector.extract_strided_slice %122 {offsets = [0, 8], sizes = [8, 8], strides = [1, 1]} : vector<8x32xf32> to vector<8x8xf32>
    %135 = vector.extract_strided_slice %122 {offsets = [0, 16], sizes = [8, 8], strides = [1, 1]} : vector<8x32xf32> to vector<8x8xf32>
    %136 = vector.extract_strided_slice %122 {offsets = [0, 24], sizes = [8, 8], strides = [1, 1]} : vector<8x32xf32> to vector<8x8xf32>
    %137 = vector.shape_cast %133 : vector<8x8xf32> to vector<1x8x8xf32>
    %138 = vector.shape_cast %134 : vector<8x8xf32> to vector<1x8x8xf32>
    %139 = vector.shape_cast %135 : vector<8x8xf32> to vector<1x8x8xf32>
    %140 = vector.shape_cast %136 : vector<8x8xf32> to vector<1x8x8xf32>
    %141 = tpu.concatenate %137, %138, %139, %140 in 0 : vector<1x8x8xf32>, vector<1x8x8xf32>, vector<1x8x8xf32>, vector<1x8x8xf32> -> vector<4x8x8xf32>
    %142 = vector.extract_strided_slice %131 {offsets = [0, 0], sizes = [8, 8], strides = [1, 1]} : vector<8x32xf32> to vector<8x8xf32>
    %143 = vector.extract_strided_slice %131 {offsets = [0, 8], sizes = [8, 8], strides = [1, 1]} : vector<8x32xf32> to vector<8x8xf32>
    %144 = vector.extract_strided_slice %131 {offsets = [0, 16], sizes = [8, 8], strides = [1, 1]} : vector<8x32xf32> to vector<8x8xf32>
    %145 = vector.extract_strided_slice %131 {offsets = [0, 24], sizes = [8, 8], strides = [1, 1]} : vector<8x32xf32> to vector<8x8xf32>
    %146 = vector.shape_cast %142 : vector<8x8xf32> to vector<1x8x8xf32>
    %147 = vector.shape_cast %143 : vector<8x8xf32> to vector<1x8x8xf32>
    %148 = vector.shape_cast %144 : vector<8x8xf32> to vector<1x8x8xf32>
    %149 = vector.shape_cast %145 : vector<8x8xf32> to vector<1x8x8xf32>
    %150 = tpu.concatenate %146, %147, %148, %149 in 0 : vector<1x8x8xf32>, vector<1x8x8xf32>, vector<1x8x8xf32>, vector<1x8x8xf32> -> vector<4x8x8xf32>
    %151 = vector.extract_strided_slice %132 {offsets = [0, 0], sizes = [8, 8], strides = [1, 1]} : vector<8x32xf32> to vector<8x8xf32>
    %152 = vector.extract_strided_slice %132 {offsets = [0, 8], sizes = [8, 8], strides = [1, 1]} : vector<8x32xf32> to vector<8x8xf32>
    %153 = vector.extract_strided_slice %132 {offsets = [0, 16], sizes = [8, 8], strides = [1, 1]} : vector<8x32xf32> to vector<8x8xf32>
    %154 = vector.extract_strided_slice %132 {offsets = [0, 24], sizes = [8, 8], strides = [1, 1]} : vector<8x32xf32> to vector<8x8xf32>
    %155 = vector.shape_cast %151 : vector<8x8xf32> to vector<1x8x8xf32>
    %156 = vector.shape_cast %152 : vector<8x8xf32> to vector<1x8x8xf32>
    %157 = vector.shape_cast %153 : vector<8x8xf32> to vector<1x8x8xf32>
    %158 = vector.shape_cast %154 : vector<8x8xf32> to vector<1x8x8xf32>
    %159 = tpu.concatenate %155, %156, %157, %158 in 0 : vector<1x8x8xf32>, vector<1x8x8xf32>, vector<1x8x8xf32>, vector<1x8x8xf32> -> vector<4x8x8xf32>
    %cst_49 = arith.constant dense<0.000000e+00> : vector<4x8x8xf32>
    %160 = tpu.matmul %141, %150, %cst_49 {dimension_numbers = #tpu.dot_dimension_numbers<[2], [2], [1], [1], [0, 0, 0, 1, 1, 1], [0], [0]>} : vector<4x8x8xf32>, vector<4x8x8xf32>, vector<4x8x8xf32> -> vector<4x8x8xf32>
    %cst_50 = arith.constant 0.353553385 : f32
    %161 = vector.broadcast %cst_50 : f32 to vector<4x8x8xf32>
    %162 = arith.mulf %160, %161 : vector<4x8x8xf32>
    %cst_51 = arith.constant dense<0xFF800000> : vector<4x8xf32>
    %163 = vector.multi_reduction <maximumf>, %162, %cst_51 [2] : vector<4x8x8xf32> to vector<4x8xf32>
    %164 = vector.shape_cast %163 : vector<4x8xf32> to vector<4x8x1xf32>
    %165 = vector.broadcast %164 : vector<4x8x1xf32> to vector<4x8x8xf32>
    %166 = arith.subf %162, %165 : vector<4x8x8xf32>
    %167 = math.exp %166 : vector<4x8x8xf32>
    %cst_52 = arith.constant dense<0.000000e+00> : vector<4x8xf32>
    %168 = vector.multi_reduction <add>, %167, %cst_52 [2] : vector<4x8x8xf32> to vector<4x8xf32>
    %169 = vector.shape_cast %168 : vector<4x8xf32> to vector<4x8x1xf32>
    %170 = vector.broadcast %169 : vector<4x8x1xf32> to vector<4x8x8xf32>
    %171 = arith.divf %167, %170 : vector<4x8x8xf32>
    %cst_53 = arith.constant dense<0.000000e+00> : vector<4x8x8xf32>
    %172 = tpu.matmul %171, %159, %cst_53 {dimension_numbers = #tpu.dot_dimension_numbers<[2], [1], [1], [2], [0, 0, 0, 1, 1, 2], [0], [0]>} : vector<4x8x8xf32>, vector<4x8x8xf32>, vector<4x8x8xf32> -> vector<4x8x8xf32>
    %c0_54 = arith.constant 0 : index
    %c0_55 = arith.constant 0 : index
    %c0_56 = arith.constant 0 : index
    %173 = vector.load %arg16[%c0_54, %c0_55, %c0_56] : memref<1x32x32xbf16, #tpu.memory_space<vmem>>, vector<1x32x32xbf16>
    %174 = vector.shape_cast %173 : vector<1x32x32xbf16> to vector<32x32xbf16>
    %175 = vector.extract_strided_slice %174 {offsets = [0, 0], sizes = [8, 32], strides = [1, 1]} : vector<32x32xbf16> to vector<8x32xbf16>
    %176 = vector.extract_strided_slice %174 {offsets = [8, 0], sizes = [8, 32], strides = [1, 1]} : vector<32x32xbf16> to vector<8x32xbf16>
    %177 = vector.extract_strided_slice %174 {offsets = [16, 0], sizes = [8, 32], strides = [1, 1]} : vector<32x32xbf16> to vector<8x32xbf16>
    %178 = vector.extract_strided_slice %174 {offsets = [24, 0], sizes = [8, 32], strides = [1, 1]} : vector<32x32xbf16> to vector<8x32xbf16>
    %179 = vector.shape_cast %175 : vector<8x32xbf16> to vector<1x8x32xbf16>
    %180 = vector.shape_cast %176 : vector<8x32xbf16> to vector<1x8x32xbf16>
    %181 = vector.shape_cast %177 : vector<8x32xbf16> to vector<1x8x32xbf16>
    %182 = vector.shape_cast %178 : vector<8x32xbf16> to vector<1x8x32xbf16>
    %183 = tpu.concatenate %179, %180, %181, %182 in 0 : vector<1x8x32xbf16>, vector<1x8x32xbf16>, vector<1x8x32xbf16>, vector<1x8x32xbf16> -> vector<4x8x32xbf16>
    %184 = arith.truncf %172 : vector<4x8x8xf32> to vector<4x8x8xbf16>
    %cst_57 = arith.constant dense<0.000000e+00> : vector<4x8x32xf32>
    %185 = tpu.matmul %184, %183, %cst_57 {dimension_numbers = #tpu.dot_dimension_numbers<[2], [1], [1], [2], [0, 0, 0, 1, 1, 2], [0], [0]>} : vector<4x8x8xbf16>, vector<4x8x32xbf16>, vector<4x8x32xf32> -> vector<4x8x32xf32>
    %186 = vector.extract_strided_slice %185 {offsets = [0, 0, 0], sizes = [1, 8, 32], strides = [1, 1, 1]} : vector<4x8x32xf32> to vector<1x8x32xf32>
    %187 = vector.shape_cast %186 : vector<1x8x32xf32> to vector<8x32xf32>
    %188 = vector.extract_strided_slice %185 {offsets = [1, 0, 0], sizes = [1, 8, 32], strides = [1, 1, 1]} : vector<4x8x32xf32> to vector<1x8x32xf32>
    %189 = vector.shape_cast %188 : vector<1x8x32xf32> to vector<8x32xf32>
    %190 = arith.addf %187, %189 : vector<8x32xf32>
    %191 = vector.extract_strided_slice %185 {offsets = [2, 0, 0], sizes = [1, 8, 32], strides = [1, 1, 1]} : vector<4x8x32xf32> to vector<1x8x32xf32>
    %192 = vector.shape_cast %191 : vector<1x8x32xf32> to vector<8x32xf32>
    %193 = arith.addf %190, %192 : vector<8x32xf32>
    %194 = vector.extract_strided_slice %185 {offsets = [3, 0, 0], sizes = [1, 8, 32], strides = [1, 1, 1]} : vector<4x8x32xf32> to vector<1x8x32xf32>
    %195 = vector.shape_cast %194 : vector<1x8x32xf32> to vector<8x32xf32>
    %196 = arith.addf %193, %195 : vector<8x32xf32>
    %c0_58 = arith.constant 0 : index
    %c0_59 = arith.constant 0 : index
    %c0_60 = arith.constant 0 : index
    %197 = vector.load %arg17[%c0_58, %c0_59, %c0_60] : memref<1x1x32xf32, #tpu.memory_space<vmem>>, vector<1x1x32xf32>
    %198 = vector.shape_cast %197 : vector<1x1x32xf32> to vector<1x32xf32>
    %199 = vector.broadcast %198 : vector<1x32xf32> to vector<8x32xf32>
    %200 = arith.addf %196, %199 : vector<8x32xf32>
    %201 = arith.addf %114, %200 : vector<8x32xf32>
    %c0_61 = arith.constant 0 : index
    %c0_62 = arith.constant 0 : index
    %c0_63 = arith.constant 0 : index
    %202 = vector.load %arg18[%c0_61, %c0_62, %c0_63] : memref<1x1x32xf32, #tpu.memory_space<vmem>>, vector<1x1x32xf32>
    %203 = vector.shape_cast %202 : vector<1x1x32xf32> to vector<1x32xf32>
    %c0_64 = arith.constant 0 : index
    %c0_65 = arith.constant 0 : index
    %c0_66 = arith.constant 0 : index
    %204 = vector.load %arg19[%c0_64, %c0_65, %c0_66] : memref<1x1x32xf32, #tpu.memory_space<vmem>>, vector<1x1x32xf32>
    %205 = vector.shape_cast %204 : vector<1x1x32xf32> to vector<1x32xf32>
    %cst_67 = arith.constant dense<0.000000e+00> : vector<8xf32>
    %206 = vector.multi_reduction <add>, %201, %cst_67 [1] : vector<8x32xf32> to vector<8xf32>
    %207 = vector.shape_cast %206 : vector<8xf32> to vector<8x1xf32>
    %cst_68 = arith.constant 3.200000e+01 : f32
    %208 = vector.broadcast %cst_68 : f32 to vector<8x1xf32>
    %209 = arith.divf %207, %208 : vector<8x1xf32>
    %210 = vector.broadcast %209 : vector<8x1xf32> to vector<8x32xf32>
    %211 = arith.subf %201, %210 : vector<8x32xf32>
    %212 = arith.mulf %211, %211 : vector<8x32xf32>
    %cst_69 = arith.constant dense<0.000000e+00> : vector<8xf32>
    %213 = vector.multi_reduction <add>, %212, %cst_69 [1] : vector<8x32xf32> to vector<8xf32>
    %214 = vector.shape_cast %213 : vector<8xf32> to vector<8x1xf32>
    %cst_70 = arith.constant 3.200000e+01 : f32
    %215 = vector.broadcast %cst_70 : f32 to vector<8x1xf32>
    %216 = arith.divf %214, %215 : vector<8x1xf32>
    %217 = vector.broadcast %209 : vector<8x1xf32> to vector<8x32xf32>
    %218 = arith.subf %201, %217 : vector<8x32xf32>
    %cst_71 = arith.constant 9.99999974E-6 : f32
    %219 = vector.broadcast %cst_71 : f32 to vector<8x1xf32>
    %220 = arith.addf %216, %219 : vector<8x1xf32>
    %221 = math.rsqrt %220 : vector<8x1xf32>
    %222 = vector.broadcast %221 : vector<8x1xf32> to vector<8x32xf32>
    %223 = arith.mulf %218, %222 : vector<8x32xf32>
    %224 = vector.broadcast %203 : vector<1x32xf32> to vector<8x32xf32>
    %225 = arith.mulf %223, %224 : vector<8x32xf32>
    %226 = vector.broadcast %205 : vector<1x32xf32> to vector<8x32xf32>
    %227 = arith.addf %225, %226 : vector<8x32xf32>
    %228 = arith.truncf %227 : vector<8x32xf32> to vector<8x32xbf16>
    %c0_72 = arith.constant 0 : index
    %c0_73 = arith.constant 0 : index
    %c0_74 = arith.constant 0 : index
    %229 = vector.load %arg20[%c0_72, %c0_73, %c0_74] : memref<1x32x64xbf16, #tpu.memory_space<vmem>>, vector<1x32x64xbf16>
    %230 = vector.shape_cast %229 : vector<1x32x64xbf16> to vector<32x64xbf16>
    %cst_75 = arith.constant dense<0.000000e+00> : vector<8x64xf32>
    %231 = tpu.matmul %228, %230, %cst_75 {dimension_numbers = #tpu.dot_dimension_numbers<[1], [0], [0], [1], [0, 0, 1, 1], [], []>} : vector<8x32xbf16>, vector<32x64xbf16>, vector<8x64xf32> -> vector<8x64xf32>
    %c0_76 = arith.constant 0 : index
    %c0_77 = arith.constant 0 : index
    %c0_78 = arith.constant 0 : index
    %232 = vector.load %arg21[%c0_76, %c0_77, %c0_78] : memref<1x1x64xf32, #tpu.memory_space<vmem>>, vector<1x1x64xf32>
    %233 = vector.shape_cast %232 : vector<1x1x64xf32> to vector<1x64xf32>
    %234 = vector.broadcast %233 : vector<1x64xf32> to vector<8x64xf32>
    %235 = arith.addf %231, %234 : vector<8x64xf32>
    %cst_79 = arith.constant 0.000000e+00 : f32
    %236 = vector.broadcast %cst_79 : f32 to vector<8x64xf32>
    %237 = arith.maximumf %235, %236 : vector<8x64xf32>
    %238 = arith.truncf %237 : vector<8x64xf32> to vector<8x64xbf16>
    %c0_80 = arith.constant 0 : index
    %c0_81 = arith.constant 0 : index
    %c0_82 = arith.constant 0 : index
    %239 = vector.load %arg22[%c0_80, %c0_81, %c0_82] : memref<1x64x32xbf16, #tpu.memory_space<vmem>>, vector<1x64x32xbf16>
    %240 = vector.shape_cast %239 : vector<1x64x32xbf16> to vector<64x32xbf16>
    %cst_83 = arith.constant dense<0.000000e+00> : vector<8x32xf32>
    %241 = tpu.matmul %238, %240, %cst_83 {dimension_numbers = #tpu.dot_dimension_numbers<[1], [0], [0], [1], [0, 0, 1, 1], [], []>} : vector<8x64xbf16>, vector<64x32xbf16>, vector<8x32xf32> -> vector<8x32xf32>
    %c0_84 = arith.constant 0 : index
    %c0_85 = arith.constant 0 : index
    %c0_86 = arith.constant 0 : index
    %242 = vector.load %arg23[%c0_84, %c0_85, %c0_86] : memref<1x1x32xf32, #tpu.memory_space<vmem>>, vector<1x1x32xf32>
    %243 = vector.shape_cast %242 : vector<1x1x32xf32> to vector<1x32xf32>
    %244 = vector.broadcast %243 : vector<1x32xf32> to vector<8x32xf32>
    %245 = arith.addf %241, %244 : vector<8x32xf32>
    %246 = arith.addf %227, %245 : vector<8x32xf32>
    %c0_87 = arith.constant 0 : index
    %c0_88 = arith.constant 0 : index
    %c0_89 = arith.constant 0 : index
    %247 = vector.load %arg24[%c0_87, %c0_88, %c0_89] : memref<1x1x32xf32, #tpu.memory_space<vmem>>, vector<1x1x32xf32>
    %248 = vector.shape_cast %247 : vector<1x1x32xf32> to vector<1x32xf32>
    %c0_90 = arith.constant 0 : index
    %c0_91 = arith.constant 0 : index
    %c0_92 = arith.constant 0 : index
    %249 = vector.load %arg25[%c0_90, %c0_91, %c0_92] : memref<1x1x32xf32, #tpu.memory_space<vmem>>, vector<1x1x32xf32>
    %250 = vector.shape_cast %249 : vector<1x1x32xf32> to vector<1x32xf32>
    %cst_93 = arith.constant dense<0.000000e+00> : vector<8xf32>
    %251 = vector.multi_reduction <add>, %246, %cst_93 [1] : vector<8x32xf32> to vector<8xf32>
    %252 = vector.shape_cast %251 : vector<8xf32> to vector<8x1xf32>
    %cst_94 = arith.constant 3.200000e+01 : f32
    %253 = vector.broadcast %cst_94 : f32 to vector<8x1xf32>
    %254 = arith.divf %252, %253 : vector<8x1xf32>
    %255 = vector.broadcast %254 : vector<8x1xf32> to vector<8x32xf32>
    %256 = arith.subf %246, %255 : vector<8x32xf32>
    %257 = arith.mulf %256, %256 : vector<8x32xf32>
    %cst_95 = arith.constant dense<0.000000e+00> : vector<8xf32>
    %258 = vector.multi_reduction <add>, %257, %cst_95 [1] : vector<8x32xf32> to vector<8xf32>
    %259 = vector.shape_cast %258 : vector<8xf32> to vector<8x1xf32>
    %cst_96 = arith.constant 3.200000e+01 : f32
    %260 = vector.broadcast %cst_96 : f32 to vector<8x1xf32>
    %261 = arith.divf %259, %260 : vector<8x1xf32>
    %262 = vector.broadcast %254 : vector<8x1xf32> to vector<8x32xf32>
    %263 = arith.subf %246, %262 : vector<8x32xf32>
    %cst_97 = arith.constant 9.99999974E-6 : f32
    %264 = vector.broadcast %cst_97 : f32 to vector<8x1xf32>
    %265 = arith.addf %261, %264 : vector<8x1xf32>
    %266 = math.rsqrt %265 : vector<8x1xf32>
    %267 = vector.broadcast %266 : vector<8x1xf32> to vector<8x32xf32>
    %268 = arith.mulf %263, %267 : vector<8x32xf32>
    %269 = vector.broadcast %248 : vector<1x32xf32> to vector<8x32xf32>
    %270 = arith.mulf %268, %269 : vector<8x32xf32>
    %271 = vector.broadcast %250 : vector<1x32xf32> to vector<8x32xf32>
    %272 = arith.addf %270, %271 : vector<8x32xf32>
    %c0_98 = arith.constant 0 : index
    %c0_99 = arith.constant 0 : index
    %273 = vector.load %arg29[%c0_98, %c0_99] : memref<8x32xf32, #tpu.memory_space<vmem>>, vector<8x32xf32>
    tpu.vector_store %arg29[%c0_98, %c0_99], %272 {strides = array<i32>} : memref<8x32xf32, #tpu.memory_space<vmem>>, vector<8x32xf32>,
    %c1_i32 = arith.constant 1 : i32
    %274 = arith.cmpi eq, %arg1, %c1_i32 : i32
    %275 = arith.extui %274 : i1 to i32
    %c0_i32_100 = arith.constant 0 : i32
    %276 = arith.cmpi ne, %275, %c0_i32_100 : i32
    scf.if %276 {
      %c0_101 = arith.constant 0 : index
      %c0_102 = arith.constant 0 : index
      %277 = vector.load %arg26[%c0_101, %c0_102] : memref<32x32xf32, #tpu.memory_space<vmem>>, vector<32x32xf32>
      %cst_103 = arith.constant dense<0.000000e+00> : vector<8x32xf32>
      %278 = tpu.matmul %272, %277, %cst_103 {dimension_numbers = #tpu.dot_dimension_numbers<[1], [0], [0], [1], [0, 0, 1, 1], [], []>} : vector<8x32xf32>, vector<32x32xf32>, vector<8x32xf32> -> vector<8x32xf32>
      %c0_104 = arith.constant 0 : index
      %c0_105 = arith.constant 0 : index
      %279 = vector.load %arg27[%c0_104, %c0_105] : memref<1x32xf32, #tpu.memory_space<vmem>>, vector<1x32xf32>
      %280 = vector.broadcast %279 : vector<1x32xf32> to vector<8x32xf32>
      %281 = arith.addf %278, %280 : vector<8x32xf32>
      %c0_106 = arith.constant 0 : index
      %c0_107 = arith.constant 0 : index
      %282 = vector.load %arg28[%c0_106, %c0_107] : memref<8x32xf32, #tpu.memory_space<vmem>>, vector<8x32xf32>
      tpu.vector_store %arg28[%c0_106, %c0_107], %281 {strides = array<i32>} : memref<8x32xf32, #tpu.memory_space<vmem>>, vector<8x32xf32>,
    } else {
    }
    return
  }
  func.func @transform_0(%arg0: i32, %arg1: i32) -> (i32, i32) {
    %c0_i32 = arith.constant 0 : i32
    %c0_i32_0 = arith.constant 0 : i32
    return %arg0, %c0_i32 : i32, i32
  }
  func.func @transform_1(%arg0: i32, %arg1: i32) -> (i32, i32) {
    %c0_i32 = arith.constant 0 : i32
    %c0_i32_0 = arith.constant 0 : i32
    %c0_i32_1 = arith.constant 0 : i32
    return %c0_i32, %c0_i32_0 : i32, i32
  }
  func.func @transform_2(%arg0: i32, %arg1: i32) -> (i32, i32) {
    %c0_i32 = arith.constant 0 : i32
    %c0_i32_0 = arith.constant 0 : i32
    return %arg0, %c0_i32 : i32, i32
  }
  func.func @transform_3(%arg0: i32, %arg1: i32) -> (i32, i32) {
    %c0_i32 = arith.constant 0 : i32
    %c0_i32_0 = arith.constant 0 : i32
    %c0_i32_1 = arith.constant 0 : i32
    return %c0_i32, %c0_i32_0 : i32, i32
  }
  func.func @transform_4(%arg0: i32, %arg1: i32) -> (i32, i32, i32) {
    %c0_i32 = arith.constant 0 : i32
    %c0_i32_0 = arith.constant 0 : i32
    %c0_i32_1 = arith.constant 0 : i32
    return %arg1, %c0_i32, %c0_i32_0 : i32, i32, i32
  }
  func.func @transform_5(%arg0: i32, %arg1: i32) -> (i32, i32, i32) {
    %c0_i32 = arith.constant 0 : i32
    %c0_i32_0 = arith.constant 0 : i32
    %c0_i32_1 = arith.constant 0 : i32
    return %arg1, %c0_i32, %c0_i32_0 : i32, i32, i32
  }
  func.func @transform_6(%arg0: i32, %arg1: i32) -> (i32, i32, i32) {
    %c0_i32 = arith.constant 0 : i32
    %c0_i32_0 = arith.constant 0 : i32
    %c0_i32_1 = arith.constant 0 : i32
    return %arg1, %c0_i32, %c0_i32_0 : i32, i32, i32
  }
  func.func @transform_7(%arg0: i32, %arg1: i32) -> (i32, i32, i32) {
    %c0_i32 = arith.constant 0 : i32
    %c0_i32_0 = arith.constant 0 : i32
    %c0_i32_1 = arith.constant 0 : i32
    return %arg1, %c0_i32, %c0_i32_0 : i32, i32, i32
  }
  func.func @transform_8(%arg0: i32, %arg1: i32) -> (i32, i32, i32) {
    %c0_i32 = arith.constant 0 : i32
    %c0_i32_0 = arith.constant 0 : i32
    %c0_i32_1 = arith.constant 0 : i32
    return %arg1, %c0_i32, %c0_i32_0 : i32, i32, i32
  }
  func.func @transform_9(%arg0: i32, %arg1: i32) -> (i32, i32, i32) {
    %c0_i32 = arith.constant 0 : i32
    %c0_i32_0 = arith.constant 0 : i32
    %c0_i32_1 = arith.constant 0 : i32
    return %arg1, %c0_i32, %c0_i32_0 : i32, i32, i32
  }
  func.func @transform_10(%arg0: i32, %arg1: i32) -> (i32, i32, i32) {
    %c0_i32 = arith.constant 0 : i32
    %c0_i32_0 = arith.constant 0 : i32
    %c0_i32_1 = arith.constant 0 : i32
    return %arg1, %c0_i32, %c0_i32_0 : i32, i32, i32
  }
  func.func @transform_11(%arg0: i32, %arg1: i32) -> (i32, i32, i32) {
    %c0_i32 = arith.constant 0 : i32
    %c0_i32_0 = arith.constant 0 : i32
    %c0_i32_1 = arith.constant 0 : i32
    return %arg1, %c0_i32, %c0_i32_0 : i32, i32, i32
  }
  func.func @transform_12(%arg0: i32, %arg1: i32) -> (i32, i32, i32) {
    %c0_i32 = arith.constant 0 : i32
    %c0_i32_0 = arith.constant 0 : i32
    %c0_i32_1 = arith.constant 0 : i32
    return %arg1, %c0_i32, %c0_i32_0 : i32, i32, i32
  }
  func.func @transform_13(%arg0: i32, %arg1: i32) -> (i32, i32, i32) {
    %c0_i32 = arith.constant 0 : i32
    %c0_i32_0 = arith.constant 0 : i32
    %c0_i32_1 = arith.constant 0 : i32
    return %arg1, %c0_i32, %c0_i32_0 : i32, i32, i32
  }
  func.func @transform_14(%arg0: i32, %arg1: i32) -> (i32, i32, i32) {
    %c0_i32 = arith.constant 0 : i32
    %c0_i32_0 = arith.constant 0 : i32
    %c0_i32_1 = arith.constant 0 : i32
    return %arg1, %c0_i32, %c0_i32_0 : i32, i32, i32
  }
  func.func @transform_15(%arg0: i32, %arg1: i32) -> (i32, i32, i32) {
    %c0_i32 = arith.constant 0 : i32
    %c0_i32_0 = arith.constant 0 : i32
    %c0_i32_1 = arith.constant 0 : i32
    return %arg1, %c0_i32, %c0_i32_0 : i32, i32, i32
  }
  func.func @transform_16(%arg0: i32, %arg1: i32) -> (i32, i32, i32) {
    %c0_i32 = arith.constant 0 : i32
    %c0_i32_0 = arith.constant 0 : i32
    %c0_i32_1 = arith.constant 0 : i32
    return %arg1, %c0_i32, %c0_i32_0 : i32, i32, i32
  }
  func.func @transform_17(%arg0: i32, %arg1: i32) -> (i32, i32, i32) {
    %c0_i32 = arith.constant 0 : i32
    %c0_i32_0 = arith.constant 0 : i32
    %c0_i32_1 = arith.constant 0 : i32
    return %arg1, %c0_i32, %c0_i32_0 : i32, i32, i32
  }
  func.func @transform_18(%arg0: i32, %arg1: i32) -> (i32, i32, i32) {
    %c0_i32 = arith.constant 0 : i32
    %c0_i32_0 = arith.constant 0 : i32
    %c0_i32_1 = arith.constant 0 : i32
    return %arg1, %c0_i32, %c0_i32_0 : i32, i32, i32
  }
  func.func @transform_19(%arg0: i32, %arg1: i32) -> (i32, i32, i32) {
    %c0_i32 = arith.constant 0 : i32
    %c0_i32_0 = arith.constant 0 : i32
    %c0_i32_1 = arith.constant 0 : i32
    return %arg1, %c0_i32, %c0_i32_0 : i32, i32, i32
  }
  func.func @transform_20(%arg0: i32, %arg1: i32) -> (i32, i32, i32) {
    %c0_i32 = arith.constant 0 : i32
    %c0_i32_0 = arith.constant 0 : i32
    %c0_i32_1 = arith.constant 0 : i32
    return %arg1, %c0_i32, %c0_i32_0 : i32, i32, i32
  }
  func.func @transform_21(%arg0: i32, %arg1: i32) -> (i32, i32, i32) {
    %c0_i32 = arith.constant 0 : i32
    %c0_i32_0 = arith.constant 0 : i32
    %c0_i32_1 = arith.constant 0 : i32
    return %arg1, %c0_i32, %c0_i32_0 : i32, i32, i32
  }
  func.func @transform_22(%arg0: i32, %arg1: i32) -> (i32, i32, i32) {
    %c0_i32 = arith.constant 0 : i32
    %c0_i32_0 = arith.constant 0 : i32
    %c0_i32_1 = arith.constant 0 : i32
    return %arg1, %c0_i32, %c0_i32_0 : i32, i32, i32
  }
  func.func @transform_23(%arg0: i32, %arg1: i32) -> (i32, i32, i32) {
    %c0_i32 = arith.constant 0 : i32
    %c0_i32_0 = arith.constant 0 : i32
    %c0_i32_1 = arith.constant 0 : i32
    return %arg1, %c0_i32, %c0_i32_0 : i32, i32, i32
  }
  func.func @transform_24(%arg0: i32, %arg1: i32) -> (i32, i32) {
    %c0_i32 = arith.constant 0 : i32
    %c0_i32_0 = arith.constant 0 : i32
    %c0_i32_1 = arith.constant 0 : i32
    return %c0_i32, %c0_i32_0 : i32, i32
  }
  func.func @transform_25(%arg0: i32, %arg1: i32) -> (i32, i32) {
    %c0_i32 = arith.constant 0 : i32
    %c0_i32_0 = arith.constant 0 : i32
    %c0_i32_1 = arith.constant 0 : i32
    return %c0_i32, %c0_i32_0 : i32, i32
  }
  func.func @transform_26(%arg0: i32, %arg1: i32) -> (i32, i32) {
    %c0_i32 = arith.constant 0 : i32
    %c0_i32_0 = arith.constant 0 : i32
    return %arg0, %c0_i32 : i32, i32
  }
}

</mosaic_0001>

<bundles_post_ra>
// kernel: transformer_vae_forward.2
= control target key start
LH: loop header
LB: loop body
LE: loop exit
PB: predicated region body
PF: predicated region fallthrough
CT: control target
= control target key end

     0   :  { %s3877_s0 = inlined_call_operand.vmem [shape: f32[16,32], index: 0, kind: input, shape index: {}]   ;;  %s3878_s1 = inlined_call_operand.vmem [shape: f32[8,32], index: 1, kind: input, shape index: {}]   ;;  %s3879_s2 = inlined_call_operand.vmem [shape: f32[2,1,16], index: 2, kind: input, shape index: {}]   ;;  %s3880_s3 = inlined_call_operand.vmem [shape: bf16[2,32,96], index: 3, kind: input, shape index: {}]   ;;  %s3881_s4 = inlined_call_operand.vmem [shape: f32[2,1,96], index: 4, kind: input, shape index: {}]   ;;  %s3882_s5 = inlined_call_operand.vmem [shape: bf16[2,32,32], index: 5, kind: input, shape index: {}]   ;;  %s3883_s6 = inlined_call_operand.vmem [shape: f32[2,1,32], index: 6, kind: input, shape index: {}]   ;;  %s3884_s7 = inlined_call_operand.vmem [shape: f32[2,1,32], index: 7, kind: input, shape index: {}]   ;;  %s3885_s8 = inlined_call_operand.vmem [shape: f32[2,1,32], index: 8, kind: input, shape index: {}]   ;;  %s3886_s9 = inlined_call_operand.vmem [shape: bf16[2,32,64], index: 9, kind: input, shape index: {}]   ;;  %s3887_s10 = inlined_call_operand.vmem [shape: f32[2,1,64], index: 10, kind: input, shape index: {}]   ;;  %s3888_s11 = inlined_call_operand.vmem [shape: bf16[2,64,32], index: 11, kind: input, shape index: {}]   ;;  %s3889_s12 = inlined_call_operand.vmem [shape: f32[2,1,32], index: 12, kind: input, shape index: {}]   ;;  %s3890_s13 = inlined_call_operand.vmem [shape: f32[2,1,32], index: 13, kind: input, shape index: {}]   ;;  %s3891_s14 = inlined_call_operand.vmem [shape: f32[2,1,32], index: 14, kind: input, shape index: {}]   ;;  %s3892_s15 = inlined_call_operand.vmem [shape: f32[32,16], index: 15, kind: input, shape index: {}]   ;;  %s3893_s16 = inlined_call_operand.vmem [shape: f32[1,16], index: 16, kind: input, shape index: {}]   ;;  %s3894_s17 = inlined_call_operand.vmem [shape: f32[32,16], index: 17, kind: input, shape index: {}]   ;;  %s3895_s18 = inlined_call_operand.vmem [shape: f32[1,16], index: 18, kind: input, shape index: {}]   ;;  %s3896_s19 = inlined_call_operand.vmem [shape: f32[16,32], index: 19, kind: input, shape index: {}]   ;;  %s3897_s20 = inlined_call_operand.vmem [shape: f32[1,32], index: 20, kind: input, shape index: {}]   ;;  %s3898_s21 = inlined_call_operand.hbm [shape: f32[2,1,16], index: 21, kind: output, shape index: {0}]   ;;  %s3899_s22 = inlined_call_operand.hbm [shape: f32[2,1,16], index: 22, kind: output, shape index: {1}]   ;;  %s3900_s23 = inlined_call_operand.hbm [shape: f32[2,1,16], index: 23, kind: output, shape index: {2}]   ;;  %s3901_s24 = inlined_call_operand.vmem [shape: f32[2,1,32], index: 24, kind: output, shape index: {3}]  }
   0x1   :  { %3923 = sst [smem:[#allocation23_spill]] %s3877_s0 }
   0x2   :  { %3924 = sst [smem:[#allocation24_spill]] %s3878_s1 }
   0x3   :  { %3925 = sst [smem:[#allocation25_spill]] %s3879_s2 }
   0x4   :  { %3926 = sst [smem:[#allocation26_spill]] %s3880_s3 }
   0x5   :  { %3927 = sst [smem:[#allocation27_spill]] %s3881_s4 }
   0x6   :  { %3928 = sst [smem:[#allocation28_spill]] %s3882_s5 }
   0x7   :  { %3929 = sst [smem:[#allocation29_spill]] %s3883_s6 }
   0x8   :  { %3930 = sst [smem:[#allocation30_spill]] %s3884_s7 }
   0x9   :  { %3931 = sst [smem:[#allocation31_spill]] %s3885_s8 }
   0xa   :  { %3932 = sst [smem:[#allocation32_spill]] %s3891_s14 }
   0xb   :  { %3933 = sst [smem:[#allocation33_spill]] %s3892_s15 }
   0xc   :  { %3934 = sst [smem:[#allocation34_spill]] %s3893_s16 }
   0xd   :  { %3935 = sst [smem:[#allocation35_spill]] %s3894_s17 }
   0xe   :  { %3936 = sst [smem:[#allocation36_spill]] %s3895_s18 }
   0xf   :  { %3937 = sst [smem:[#allocation37_spill]] %s3896_s19 }
  0x10   :  { %3938 = sst [smem:[#allocation38_spill]] %s3897_s20 }
  0x11   :  { %3939 = sst [smem:[#allocation39_spill]] %s3898_s21 }
  0x12   :  { %3940 = sst [smem:[#allocation40_spill]] %s3899_s22 }
  0x13   :  { %3941 = sst [smem:[#allocation41_spill]] %s3900_s23 }
  0x14   :  { %3942 = sst [smem:[#allocation42_spill]] %s3901_s24 }
  0x15   :  { %30 = vsyncpa [#allocation4], 0 }
  0x16   :  { %32 = vsyncpa [#allocation4 + $0x1], 0 }
  0x17   :  { %33 = vsyncpa [#allocation6], 0 }
  0x18   :  { %35 = vsyncpa [#allocation6 + $0x1], 0  ;;  %s3363_s5 = smov 0   ;;  %s3365_s26 = smov 0  }
  0x19   :  { %s3367_s27 = smov 0   ;;  %s3369_s28 = smov 0  }
  0x1a   :  { %s3371_s6 = smov 0   ;;  %s3373_s2 = smov 0  }
  0x1b   :  { %s3375_s29 = smov 0   ;;  %s3377_s0 = smov 0  }
  0x1c LB: > { %3943 = sst [smem:[#allocation10_spill]] %s3195_s5  ;;  %s3902_s7 = sadd.s32 4294967295, %s3223_s0   ;;  %s3223_s0 = sphi %s3377_s0, %s41_s0   ;;  %s3219_s29 = sphi %s3375_s29, %s4012_s29   ;;  %s3215_s2 = sphi %s3373_s2, %s4011_s2   ;;  %s3211_s6 = sphi %s3371_s6, %s4010_s6   ;;  %s3207_s28 = sphi %s3369_s28, %s4009_s28   ;;  %s3203_s27 = sphi %s3367_s27, %s4008_s27   ;;  %s3199_s26 = sphi %s3365_s26, %s4007_s26   ;;  %s3195_s5 = sphi %s3363_s5, %s4006_s5  }
  0x1d   : > { %3944 = sst [smem:[#allocation11_spill]] %s3199_s26  ;;  %s3903_s30 = sadd.s32 4294967294, %s3223_s0  }
  0x1e   : > { %3945 = sst [smem:[#allocation12_spill]] %s3203_s27  ;;  %s50_s3 = sadd.s32 1, %s3215_s2 }
  0x1f   : > { %3946 = sst [smem:[#allocation13_spill]] %s3207_s28  ;;  %p51_p0 = scmp.ge.s32.totalorder %s50_s3, 2 }
  0x20   : > { %3947 = sst [smem:[#allocation14_spill]] %s3211_s6  ;;  %s53_s25 = sadd.s32 1, %s3219_s29 }
  0x21   : > { %3948 = sst [smem:[#allocation15_spill]] %s3215_s2  ;;  %p581_p1 = scmp.ne.s32.totalorder %s3203_s27, %s3199_s26 }
  0x22   : > { %3949 = sst [smem:[#allocation16_spill]] %s3219_s29  ;;  %p582_p2 = scmp.eq.s32.totalorder %s3902_s7, 3 }
  0x23   : > { %3950 = sst [smem:[#allocation17_spill]] %s3223_s0  ;;  %s4014_s3 = smov (%p51_p0, %s50_s3), 0 }
  0x24   : > { %3951 = sst [smem:[#allocation18_spill]] %s4014_s3  ;;  %s4016_s25 = smov (!%p51_p0, %s53_s25), %s3219_s29 }
  0x25   : > { %p3414_p3 = por %p582_p2, %p581_p1  ;;  %p587_p4 = scmp.ne.s32.totalorder %s3199_s26, %s3195_s5 }
  0x26   : > { %p55_p5 = scmp.ge.s32.totalorder %s4016_s25, 2  ;;  %p588_p6 = scmp.eq.s32.totalorder %s3903_s30, 3 }
  0x27   : > { %s3952_s8 = scalar_select %p3414_p3, 1, 0 }
  0x28   : > { %p2705_p7 = scmp.ge.s32.totalorder %s3223_s0, 1  ;;  %p798_p8 = scmp.lt.s32.totalorder %s3223_s0, 5 }
  0x29   : > { %3953 = sst [smem:[#allocation19_spill]] %s3952_s8  ;;  %s4018_s25 = smov (%p55_p5, %s4016_s25), 0 }
  0x2a   : > { %3954 = sst [smem:[#allocation20_spill]] %s4018_s25  ;;  %p3426_p9 = por %p588_p6, %p587_p4 }
  0x2b   : > { %p799_p10 = pnand %p2705_p7, %p798_p8  ;;  %s568_s1 = ssub.s32 %s3219_s29, %s4018_s25 }
  0x2c   : > { %s3955_s4 = scalar_select %p3426_p9, 1, 0 }
  0x2d   : > { %s571_s7 = sadd.s32 1, %s3203_s27  ;;  %p569_p11 = scmp.eq.s32.totalorder %s568_s1, 0 }
  0x2e   : > { %3956 = sst [smem:[#allocation21_spill]] %s3955_s4  ;;  %802 = sbr.rel (%p799_p10) target bundleno = 3089 (0xc11), region = 104 }
  0x2f   : > { %s3434_s3 = scalar_select %p569_p11, %s3203_s27, %s571_s7  }
  0x30   : > { %s3437_s30 = sand.u32 (!%p799_p10), 1, %s3199_s26   ;;  %p920_p12 = scmp.lt.s32.totalorder (!%p799_p10), %s3211_s6, 1 }
  0x31   : > { %3957 = sst [smem:[#allocation22_spill]] %s3434_s3  ;;  %p927_p13 = scmp.lt.s32.totalorder (!%p799_p10), %s3207_s28, 1 }
  0x32   : > { %s3959_s5 = sld [smem:[#allocation23_spill]] (!%p799_p10)  ;;  %s3962_s29 = sld [smem:[#allocation28_spill]] (!%p799_p10) }
  0x33   : > { %s3966_s20 = sld [smem:[#allocation32_spill]] (!%p799_p10)  ;;  %s908_s26 = scalar_lea.vmem (!%p799_p10), [#allocation5], %s3437_s30 }
  0x34   : > { %s914_s27 = scalar_lea.vmem (!%p799_p10), [#allocation7], %s3437_s30 }
  0x35   : > { %s3442_s2 = scalar_select %p920_p12, %s3211_s6, 1 }
  0x36   : > { %s3445_s4 = scalar_select %p927_p13, %s3207_s28, 1 }
  0x37   : > { %s2706_s7 = sshll.u32 %s3442_s2, 3  ;;  %s3960_s6 = sld [smem:[#allocation26_spill]] }
  0x38   : > { %s923_s23 = scalar_lea.vmem %s3959_s5, %s2706_s7  ;;  %s2760_s21 = sshll.u32 %s3445_s4, 4 }
  0x39   : > { %s3466_s3 = scalar_lea.vmem %s3962_s29, %s2760_s21  ;;  %s3483_s18 = scalar_lea.vmem %s3886_s9, %s2760_s21 }
  0x3a   : > { %s2763_s19 = sshll.u32 %s3445_s4, 5  ;;  %s970_s14 = scalar_lea.vmem %s3966_s20, %s3445_s4 }
  0x3b   : > { %s3497_s28 = scalar_lea.vmem %s3888_s11, %s2763_s19  ;;  %s3967_s29 = sld [smem:[#allocation42_spill]] }
  0x3c   : > { %s902_s7 = scalar_lea.vmem [#allocation3], %s3437_s30  ;;  %s3968_s5 = sld [smem:[#allocation13_spill]] }
  0x3d   : > { %s931_s0 = scalar_lea.vmem %s3960_s6, %s2760_s21  ;;  %s967_s6 = scalar_lea.vmem %s3890_s13, %s3445_s4 }
  0x41   : > { %s973_s22 = scalar_lea.vmem %s3967_s29, %s3442_s2 }
  0x42   : > { %p2715_p0 = scmp.ne.s32.totalorder %s3968_s5, 0 }
  0x43   : > { %s3969_s17 = sld [smem:[#allocation24_spill]] (!%p2715_p0)  ;;  %v980_v1 = vld [vmem:[%s923_s23] sm:$0xff] (!%p2715_p0)  ;;  %vm982_vm0 = vcmask (!%p2715_p0), 261120  }
  0x44   : > { %978 = sbr.rel (%p2715_p0) target bundleno = 77 (0x4d), region = 108 }
  0x49   : > { %v979_v0 = vld [vmem:[%s3969_s17] sm:$0xff] (!%p2715_p0) }
  0x4a   : > { %v981_v2 = vadd.f32 (!%p2715_p0), %v980_v1, %v979_v0 }
  0x4c   : > { %983 = vst.msk [vmem:[#allocation2] sm:$0xff] %vm982_vm0, %v981_v2 }
  0x4d PF: > { %v3039_v3 = vld [vmem:[%s931_s0] sm:$0xff]   ;;  %v3225_v4 = vmov 0.0   ;;  %v3040_v5 = vld [vmem:[%s931_s0 + $0x8] sm:$0xff]   ;;  %vm3226_vm1 = vmmov 0   ;;  %vm1009_vm2 = vcmask 261120   ;;  %s3970_s29 = sld [smem:[#allocation27_spill]]  ;;  %s3979_s25 = scalar_lea.vmem %s3889_s12, %s3445_s4 }
  0x4e   : > { %2812 = vmatprep.subr.bf16.mxu0 %v3225_v4  ;;  %2820 = vmatprep.subr.mxu1 %v3225_v4  ;;  %s3227_s24 = smov 104   ;;  %s3228_s8 = smov 120   ;;  %vm1062_vm3 = vcmask 64512   ;;  %vm1728_vm4 = vcmask 1043456   ;;  %vm2060_vm5 = vcmask 523264  }
  0x4f   : > { %2813 = vmatpush3.bf16.msra.mxu0 %v3039_v3  ;;  %2816 = vmatprep.mubr.msk.bf16.mxu0 %vm3226_vm1, %v3225_v4  ;;  %s3229_s21 = smov 96   ;;  %s3230_s16 = smov 112  }
  0x50   : > { %2814 = vmatprep.subr.bf16.mxu0 %v3225_v4  ;;  %2822 = vmatprep.mubr.msk.f32.mxu1 %vm3226_vm1, %v3225_v4  ;;  %s3231_s20 = smov 64   ;;  %s3972_s1 = sld [smem:[#allocation29_spill]] }
  0x53   : > { %v3522_v6 = vld [vmem:[#allocation2] sm:$0xff]  ;;  %2815 = vmatpush3.bf16.msra.mxu0 %v3040_v5  ;;  %s3971_s5 = scalar_lea.vmem %s3970_s29, %s3445_s4 }
  0x54   : > { %v985_v7 = vpack.c.bf16 %v3522_v6, %v3522_v6  ;;  %2845 = vmatprep.subr.mxu0 %v3225_v4  ;;  %v2716_v8 = vld [vmem:[%s3971_s5] ss:$0 sm:$0xff]  ;;  %s3976_s5 = sld [smem:[#allocation31_spill]] }
  0x56   : > { %2817 = vmatmul.mubr.msk.bf16.vlgmr.msra.gmra.mrb[0].mxu0 %vm1009_vm2, %v985_v7  ;;  %v1717_v7 = vld [vmem:[%s3466_s3] sm:$0xf]  ;;  %s3973_s19 = scalar_lea.vmem %s3972_s1, %s3445_s4 }
  0x57   : > { %2847 = vmatprep.mubr.msk.f32.mxu0 %vm3226_vm1, %v3225_v4 }
 0x129   : > { %v1047_v9 = vpop.f32.mrb[0].mxu0 }
 0x12a   : > { %v3538_v10 = vadd.f32 %v2716_v8, %v1047_v9  ;;  %v2818_v11 = vpop.f32.mrb[1].mxu0 }
 0x12b   : > { %v1050_v12 = vpop.f32.mrb[2].mxu0 }
 0x12c   : > { %1058 = vrot.lane.b32.xlu1 %v3538_v10, %s3227_s24  ;;  %1054 = vrot.lane.b32.xlu0 %v3538_v10, %s3228_s8  ;;  %v2819_v13 = vpop.f32.mrb[3].mxu0  ;;  %s3977_s24 = scalar_lea.vmem %s3976_s5, %s3445_s4 }
 0x12d   : > { %v1718_v13 = vld [vmem:[%s3466_s3 + $0x4] sm:$0xf] }
 0x130   : > { %1060 = vrot.lane.b32.xlu1 %v3538_v10, %s3229_s21  ;;  %1056 = vrot.lane.b32.xlu0 %v3538_v10, %s3230_s16  ;;  %s3978_s16 = scalar_lea.vmem %s3887_s10, %s3445_s4 }
 0x19e   : > { %v3544_v14 = vpop.permute.xlu1 %1058  ;;  %v1055_v15 = vpop.permute.xlu0 %1054 }
 0x19f   : > { %1137 = vrot.lane.b32.xlu0 %v1055_v15, %s3229_s21 }
 0x1a2   : > { %v1061_v16 = vpop.permute.xlu1 %1060  ;;  %v3546_v17 = vpop.permute.xlu0 %1056 }
 0x1a3   : > { %2821 = vmatpush3.xpose.msk.msra.mxu1 %vm1062_vm3, %v1061_v16  ;;  %1289 = vrot.lane.b32.xlu0 %v3544_v14, %s3229_s21 }
 0x1a4   : > { %1213 = vrot.lane.b32.xlu1 %v3546_v17, %s3229_s21  ;;  %2825 = vmatprep.subr.mxu1 %v3225_v4 }
 0x1a6   : > { %2823 = vmatmul.mubr.msk.f32.vlgmr.msra.gmra.mrb[0].mxu1 %vm1062_vm3, %v3538_v10 }
 0x1a7   : > { %2827 = vmatprep.mubr.msk.f32.mxu1 %vm3226_vm1, %v3225_v4 }
 0x211   : > { %v1138_v18 = vpop.permute.xlu0 %1137 }
 0x212   : > { %2826 = vmatpush3.xpose.msk.msra.mxu1 %vm1062_vm3, %v1138_v18 }
 0x213   : > { %2830 = vmatprep.subr.mxu1 %v3225_v4 }
 0x215   : > { %2828 = vmatmul.mubr.msk.f32.vlgmr.msra.gmra.mrb[2].mxu1 %vm1062_vm3, %v1055_v15  ;;  %v1290_v20 = vpop.permute.xlu0 %1289 }
 0x216   : > { %v1214_v19 = vpop.permute.xlu1 %1213  ;;  %2832 = vmatprep.mubr.msk.f32.mxu1 %vm3226_vm1, %v3225_v4 }
 0x217   : > { %2831 = vmatpush3.xpose.msk.msra.mxu1 %vm1062_vm3, %v1214_v19 }
 0x218   : > { %2835 = vmatprep.subr.mxu1 %v3225_v4 }
 0x21a   : > { %2833 = vmatmul.mubr.msk.f32.vlgmr.msra.gmra.mrb[4].mxu1 %vm1062_vm3, %v3546_v17 }
 0x21b   : > { %2836 = vmatpush3.xpose.msk.msra.mxu1 %vm1062_vm3, %v1290_v20  ;;  %2837 = vmatprep.mubr.msk.f32.mxu1 %vm3226_vm1, %v3225_v4  ;;  %v1720_v20 = vld [vmem:[%s3466_s3 + $0xc] sm:$0xf] }
 0x21c   : > { %2840 = vmatprep.subr.mxu1 %v3225_v4 }
 0x21e   : > { %2838 = vmatmul.mubr.msk.f32.vlgmr.msra.gmra.mrb[6].mxu1 %vm1062_vm3, %v3544_v14 }
 0x21f   : > { %2842 = vmatprep.mubr.msk.f32.mxu1 %vm3226_vm1, %v3225_v4 }
 0x279   : > { %v1133_v21 = vpop.f32.mrb[0].mxu1 }
 0x27a   : > { %v1365_v22 = vmul.f32 0.35355338, %v1133_v21  ;;  %v2824_v23 = vpop.f32.mrb[1].mxu1 }
 0x27c   : > { %v1369_v24 = vsel %vm1062_vm3, %v1365_v22, -inf }
 0x27d   : > { %1370 = vmax.xlane.f32.xlu1 %v1369_v24  ;;  %v1868_v24 = vsel %vm1728_vm4, %v1720_v20, 0 }
 0x2e8   : > { %v1209_v25 = vpop.f32.mrb[2].mxu1 }
 0x2e9   : > { %v1366_v26 = vmul.f32 0.35355338, %v1209_v25  ;;  %v2829_v27 = vpop.f32.mrb[3].mxu1 }
 0x2eb   : > { %v1372_v28 = vsel %vm1062_vm3, %v1366_v26, -inf }
 0x2ec   : > { %1373 = vmax.xlane.f32.xlu0 %v1372_v28 }
 0x2ed   : > { %v1285_v29 = vpop.f32.mrb[4].mxu1 }
 0x2ee   : > { %v1367_v30 = vmul.f32 0.35355338, %v1285_v29  ;;  %v2834_v31 = vpop.f32.mrb[5].mxu1 }
 0x2f0   : > { %v1375_v32 = vsel %vm1062_vm3, %v1367_v30, -inf }
 0x2f1   : > { %1376 = vmax.xlane.f32.xlu0 %v1375_v32  ;;  %v1361_v33 = vpop.f32.mrb[6].mxu1 }
 0x2f2   : > { %v1368_v34 = vmul.f32 0.35355338, %v1361_v33  ;;  %v2839_v35 = vpop.f32.mrb[7].mxu1 }
 0x2f4   : > { %v1378_v36 = vsel %vm1062_vm3, %v1368_v34, -inf }
 0x2f5   : > { %1379 = vmax.xlane.f32.xlu1 %v1378_v36 }
 0x306   : > { %1489 = vrot.lane.b32.xlu1 %v1055_v15, %s3231_s20  ;;  %v1719_v15 = vld [vmem:[%s3466_s3 + $0x8] sm:$0xf] }
 0x307   : > { %v1822_v19 = vsel %vm1728_vm4, %v1719_v15, 0 }
 0x30a   : > { %v1371_v37 = vpop.xlane.xlu1 %1370 }
 0x30b   : > { %v1381_v38 = vsub.f32 %v1365_v22, %v1371_v37 }
 0x30d   : > { %v1385_v39 = vmul.f32 1.442695, %v1381_v38 }
 0x30f   : > { %3047 = vpow2.f32 %v1385_v39 }
 0x319   : > { %v3048_v40 = vpop.eup %3047 }
 0x31a   : > { %v1393_v41 = vsel %vm1062_vm3, %v3048_v40, 0.0 }
 0x31b   : > { %1394 = vadd.xlane.f32.xlu0 %v1393_v41 }
 0x331   : > { %1413 = vrot.lane.b32.xlu0 %v3538_v10, %s3231_s20  ;;  %v1730_v10 = vsel %vm1728_vm4, %v1717_v7, 0 }
 0x379   : > { %v1374_v42 = vpop.xlane.xlu0 %1373 }
 0x37a   : > { %v1382_v43 = vsub.f32 %v1366_v26, %v1374_v42 }
 0x37c   : > { %v1387_v44 = vmul.f32 1.442695, %v1382_v43 }
 0x37e   : > { %3049 = vpow2.f32 %v1387_v44  ;;  %v1377_v45 = vpop.xlane.xlu0 %1376 }
 0x37f   : > { %v1383_v46 = vsub.f32 %v1367_v30, %v1377_v45 }
 0x381   : > { %v1389_v47 = vmul.f32 1.442695, %v1383_v46  ;;  %v2736_v46 = vld [vmem:[%s3973_s19] ss:$0 sm:$0xff] }
 0x382   : > { %v1380_v48 = vpop.xlane.xlu1 %1379 }
 0x383   : > { %3051 = vpow2.f32 %v1389_v47  ;;  %v1384_v49 = vsub.f32 %v1368_v34, %v1380_v48 }
 0x385   : > { %v1391_v50 = vmul.f32 1.442695, %v1384_v49 }
 0x386   : > { %v1490_v51 = vpop.permute.xlu1 %1489 }
 0x387   : > { %3053 = vpow2.f32 %v1391_v50  ;;  %2846 = vmatpush3.msra.mxu0 %v1490_v51 }
 0x388   : > { %v3050_v52 = vpop.eup %3049  ;;  %2855 = vmatprep.subr.mxu0 %v3225_v4 }
 0x389   : > { %v1396_v53 = vsel %vm1062_vm3, %v3050_v52, 0.0 }
 0x38a   : > { %1397 = vadd.xlane.f32.xlu1 %v1396_v53 }
 0x38d   : > { %v3052_v54 = vpop.eup %3051 }
 0x38e   : > { %v1399_v55 = vsel %vm1062_vm3, %v3052_v54, 0.0 }
 0x38f   : > { %1400 = vadd.xlane.f32.xlu0 %v1399_v55 }
 0x391   : > { %v3054_v56 = vpop.eup %3053 }
 0x392   : > { %v1402_v57 = vsel %vm1062_vm3, %v3054_v56, 0.0 }
 0x393   : > { %1403 = vadd.xlane.f32.xlu1 %v1402_v57 }
 0x3a4   : > { %1565 = vrot.lane.b32.xlu1 %v3546_v17, %s3231_s20 }
 0x3a5   : > { %1641 = vrot.lane.b32.xlu0 %v3544_v14, %s3231_s20  ;;  %v1776_v14 = vsel %vm1728_vm4, %v1718_v13, 0 }
 0x3a8   : > { %v1395_v58 = vpop.xlane.xlu0 %1394 }
 0x3a9   : > { %3055 = vrcp.f32 %v1395_v58 }
 0x3ac   : > { %v1414_v59 = vpop.permute.xlu0 %1413 }
 0x3ad   : > { %2841 = vmatpush3.msra.mxu1 %v1414_v59  ;;  %v3041_v59 = vld [vmem:[%s3483_s18] sm:$0xff]  }
 0x3ae   : > { %2850 = vmatprep.subr.mxu1 %v3225_v4 }
 0x3b3   : > { %v3056_v60 = vpop.eup %3055 }
 0x3b4   : > { %v1406_v61 = vmul.f32 %v3056_v60, %v3048_v40  ;;  %v3042_v60 = vld [vmem:[%s3483_s18 + $0x8] sm:$0xff]   ;;  %s3974_s18 = sld [smem:[#allocation30_spill]] }
 0x3b6   : > { %2843 = vmatmul.mubr.msk.f32.vlgmr.msra.gmra.mrb[8].mxu1 %vm1062_vm3, %v1406_v61  ;;  %v3044_v61 = vld [vmem:[%s3497_s28 + $0x8] sm:$0xff]  }
 0x3b7   : > { %2852 = vmatprep.mubr.msk.f32.mxu1 %vm3226_vm1, %v3225_v4 }
 0x3ba   : > { %s3975_s23 = scalar_lea.vmem %s3974_s18, %s3445_s4  ;;  %s3981_s18 = sld [smem:[#allocation13_spill]] }
 0x3c0   : > { %p2751_p1 = scmp.ne.s32.totalorder %s3981_s18, 1 }
 0x3c1   : > { %s3982_s29 = sld [smem:[#allocation35_spill]] (!%p2751_p1)  ;;  %vm3233_vm6 = vmmov (!%p2751_p1), 0   ;;  %s3984_s3 = sld [smem:[#allocation33_spill]] (!%p2751_p1)  ;;  %vm2375_vm7 = vcmask (!%p2751_p1), 122880   ;;  %vm2301_vm8 = vcmask (!%p2751_p1), 130048   ;;  %vm2379_vm9 = vcmask (!%p2751_p1), 253952  }
 0x3c2   : > { %s3985_s0 = sld [smem:[#allocation37_spill]] (!%p2751_p1)  ;;  %s3988_s20 = sld [smem:[#allocation34_spill]] (!%p2751_p1) }
 0x3c3   : > { %s3989_s1 = sld [smem:[#allocation25_spill]] (!%p2751_p1)  ;;  %s3991_s18 = sld [smem:[#allocation38_spill]] (!%p2751_p1) }
 0x3c8   : > { %s3986_s8 = smov (!%p2751_p1), %s3985_s0 }
 0x3c9   : > { %s3990_s19 = scalar_lea.vmem (!%p2751_p1), %s3989_s1, %s3442_s2 }
 0x417   : > { %v1398_v62 = vpop.xlane.xlu1 %1397 }
 0x418   : > { %3057 = vrcp.f32 %v1398_v62 }
 0x41c   : > { %v1401_v63 = vpop.xlane.xlu0 %1400 }
 0x41d   : > { %3059 = vrcp.f32 %v1401_v63 }
 0x420   : > { %v1404_v0 = vpop.xlane.xlu1 %1403  ;;  %v1642_v5 = vpop.permute.xlu0 %1641 }
 0x421   : > { %3061 = vrcp.f32 %v1404_v0 }
 0x422   : > { %v3058_v1 = vpop.eup %3057 }
 0x423   : > { %v1408_v2 = vmul.f32 %v3058_v1, %v3050_v52 }
 0x424   : > { %v1566_v3 = vpop.permute.xlu1 %1565 }
 0x425   : > { %2851 = vmatpush3.msra.mxu1 %v1566_v3  ;;  %2848 = vmatmul.mubr.msk.f32.vlgmr.msra.gmra.mrb[4].mxu0 %vm1062_vm3, %v1408_v2  ;;  %v2737_v2 = vld [vmem:[%s3975_s23] ss:$0 sm:$0xff] }
 0x426   : > { %2856 = vmatpush3.msra.mxu0 %v1642_v5  ;;  %2857 = vmatprep.mubr.msk.f32.mxu0 %vm3226_vm1, %v3225_v4  ;;  %v2738_v5 = vld [vmem:[%s3977_s24] ss:$0 sm:$0xff]  ;;  %s3983_s24 = smov (!%p2751_p1), %s3982_s29 }
 0x427   : > { %v3060_v8 = vpop.eup %3059  ;;  %2860 = vmatprep.subr.bf16.mxu1 %v3225_v4  ;;  %2866 = vmatprep.subr.bf16.mxu0 %v3225_v4 }
 0x428   : > { %v1410_v9 = vmul.f32 %v3060_v8, %v3052_v54 }
 0x42a   : > { %2853 = vmatmul.mubr.msk.f32.vlgmr.msra.gmra.mrb[10].mxu1 %vm1062_vm3, %v1410_v9 }
 0x42b   : > { %v3062_v11 = vpop.eup %3061  ;;  %2861 = vmatpush3.bf16.msra.mxu1 %v1730_v10  ;;  %2862 = vmatprep.mubr.msk.bf16.mxu1 %vm3226_vm1, %v3225_v4  ;;  %v3045_v10 = vld [vmem:[%s3497_s28 + $0x10] sm:$0xff]  }
 0x42c   : > { %v1412_v12 = vmul.f32 %v3062_v11, %v3054_v56  ;;  %2872 = vmatprep.subr.bf16.mxu1 %v3225_v4  ;;  %v3046_v11 = vld [vmem:[%s3497_s28 + $0x18] sm:$0xff]  }
 0x42e   : > { %2858 = vmatmul.mubr.msk.f32.vlgmr.msra.gmra.mrb[6].mxu0 %vm1062_vm3, %v1412_v12  ;;  %v2739_v12 = vld [vmem:[%s3978_s16] ss:$0 sm:$0xff] }
 0x42f   : > { %2868 = vmatprep.mubr.msk.bf16.mxu0 %vm3226_vm1, %v3225_v4  ;;  %2867 = vmatpush3.bf16.msra.mxu0 %v1776_v14 }
 0x430   : > { %2878 = vmatprep.subr.bf16.mxu0 %v3225_v4 }
 0x489   : > { %v1485_v16 = vpop.f32.mrb[8].mxu1 }
 0x48a   : > { %v1721_v17 = vpack.c.bf16 %v1485_v16, %v1485_v16  ;;  %v2844_v18 = vpop.f32.mrb[9].mxu1 }
 0x48c   : > { %2863 = vmatmul.mubr.msk.bf16.vlgmr.msra.gmra.mrb[12].mxu1 %vm1062_vm3, %v1721_v17 }
 0x48d   : > { %2873 = vmatpush3.bf16.msra.mxu1 %v1822_v19  ;;  %2874 = vmatprep.mubr.msk.bf16.mxu1 %vm3226_vm1, %v3225_v4 }
 0x48e   : > { %2884 = vmatprep.subr.bf16.mxu1 %v3225_v4 }
 0x4f8   : > { %v1561_v21 = vpop.f32.mrb[4].mxu0 }
 0x4f9   : > { %v1722_v22 = vpack.c.bf16 %v1561_v21, %v1561_v21  ;;  %v2849_v23 = vpop.f32.mrb[5].mxu0 }
 0x4fb   : > { %2869 = vmatmul.mubr.msk.bf16.vlgmr.msra.gmra.mrb[8].mxu0 %vm1062_vm3, %v1722_v22 }
 0x4fc   : > { %2879 = vmatpush3.bf16.msra.mxu0 %v1868_v24  ;;  %2880 = vmatprep.mubr.msk.bf16.mxu0 %vm3226_vm1, %v3225_v4 }
 0x4fd   : > { %v1637_v25 = vpop.f32.mrb[10].mxu1  ;;  %2892 = vmatprep.subr.bf16.mxu0 %v3225_v4 }
 0x4fe   : > { %v1723_v26 = vpack.c.bf16 %v1637_v25, %v1637_v25  ;;  %v2854_v27 = vpop.f32.mrb[11].mxu1 }
 0x500   : > { %2875 = vmatmul.mubr.msk.bf16.vlgmr.msra.gmra.mrb[16].mxu1 %vm1062_vm3, %v1723_v26 }
 0x501   : > { %v1713_v28 = vpop.f32.mrb[6].mxu0  ;;  %2888 = vmatprep.mubr.msk.bf16.mxu1 %vm3226_vm1, %v3225_v4  ;;  %2885 = vmatpush3.bf16.msra.mxu1 %v3041_v59  ;;  %v2143_v59 = vld [vmem:[%s3988_s20] sm:$0x1] (!%p2751_p1) }
 0x502   : > { %v1724_v29 = vpack.c.bf16 %v1713_v28, %v1713_v28  ;;  %v2859_v30 = vpop.f32.mrb[7].mxu0  ;;  %2886 = vmatprep.subr.bf16.mxu1 %v3225_v4 }
 0x504   : > { %2881 = vmatmul.mubr.msk.bf16.vlgmr.msra.gmra.mrb[12].mxu0 %vm1062_vm3, %v1724_v29 }
 0x505   : > { %2900 = vmatprep.mubr.msk.bf16.mxu0 %vm3226_vm1, %v3225_v4  ;;  %2887 = vmatpush3.bf16.msra.mxu1 %v3042_v60 }
 0x55f   : > { %v1766_v31 = vpop.f32.mrb[12].mxu1 }
 0x560   : > { %v2864_v32 = vpop.f32.mrb[13].mxu1 }
 0x561   : > { %v1769_v33 = vpop.f32.mrb[14].mxu1 }
 0x562   : > { %v2865_v34 = vpop.f32.mrb[15].mxu1 }
 0x5ce   : > { %v1812_v35 = vpop.f32.mrb[8].mxu0 }
 0x5cf   : > { %v1910_v36 = vadd.f32 %v1812_v35, %v1766_v31  ;;  %v2870_v37 = vpop.f32.mrb[9].mxu0 }
 0x5d0   : > { %v1815_v38 = vpop.f32.mrb[10].mxu0 }
 0x5d1   : > { %v2871_v39 = vpop.f32.mrb[11].mxu0  ;;  %v2750_v38 = vld [vmem:[%s970_s14] ss:$0 sm:$0xff]  ;;  %s3987_s14 = sld [smem:[#allocation36_spill]] (!%p2751_p1) }
 0x5d3   : > { %v1858_v40 = vpop.f32.mrb[16].mxu1 }
 0x5d4   : > { %v1911_v41 = vadd.f32 %v1910_v36, %v1858_v40  ;;  %v2876_v42 = vpop.f32.mrb[17].mxu1  ;;  %v2749_v36 = vld [vmem:[%s967_s6] ss:$0 sm:$0xff] }
 0x5d5   : > { %v1861_v43 = vpop.f32.mrb[18].mxu1  ;;  %v2218_v42 = vld [vmem:[%s3983_s24 + $0x8] sm:$0xff] (!%p2751_p1) }
 0x5d6   : > { %v2877_v44 = vpop.f32.mrb[19].mxu1  ;;  %v2219_v43 = vld [vmem:[%s3983_s24 + $0x10] sm:$0xff] (!%p2751_p1) }
 0x5d7   : > { %v1904_v45 = vpop.f32.mrb[12].mxu0  ;;  %v3232_v44 = vmov (!%p2751_p1), 0.0|0.0  }
 0x5d8   : > { %v1912_v47 = vadd.f32 %v1911_v41, %v1904_v45  ;;  %v2882_v48 = vpop.f32.mrb[13].mxu0  ;;  %v2217_v41 = vld [vmem:[%s3982_s29] sm:$0xff] (!%p2751_p1)  ;;  %2939 = vmatprep.subr.bf16.mxu1 (!%p2751_p1), %v3232_v44 }
 0x5d9   : > { %v1907_v49 = vpop.f32.mrb[14].mxu0  ;;  %v2940_v45 = vpack.c.bf16 (!%p2751_p1), %v2218_v42, %v2217_v41  ;;  %v2139_v48 = vld [vmem:[%s3984_s3] sm:$0xff] (!%p2751_p1) }
 0x5da   : > { %v1920_v50 = vadd.f32 %v2736_v46, %v1912_v47  ;;  %v2883_v51 = vpop.f32.mrb[15].mxu0  ;;  %v2220_v46 = vld [vmem:[%s3983_s24 + $0x18] sm:$0xff] (!%p2751_p1)  ;;  %v3234_v47 = vmov (!%p2751_p1), 0.0   ;;  %v2140_v49 = vld [vmem:[%s3984_s3 + $0x8] sm:$0xff] (!%p2751_p1) }
 0x5db   : > { %v2141_v51 = vld [vmem:[%s3984_s3 + $0x10] sm:$0xff] (!%p2751_p1) }
 0x5dc   : > { %v1921_v52 = vadd.f32 %v1920_v50, %v3522_v6  ;;  %v3043_v6 = vld [vmem:[%s3497_s28] sm:$0xff]   ;;  %v2934_v50 = vpack.c.bf16 (!%p2751_p1), %v2140_v49, %v2139_v48 }
 0x5dd   : > { %2893 = vmatpush3.bf16.msra.mxu0 %v3043_v6 }
 0x5de   : > { %v1924_v53 = vsel %vm1009_vm2, %v1921_v52, 0.0  ;;  %2894 = vmatprep.subr.bf16.mxu0 %v3225_v4 }
 0x5df   : > { %1925 = vadd.xlane.f32.xlu1 %v1924_v53  ;;  %v2943_v53 = vpack.c.bf16 (!%p2751_p1), %v2220_v46, %v2219_v43 }
 0x5e1   : > { %2895 = vmatpush3.bf16.msra.mxu0 %v3044_v61 }
 0x5e2   : > { %2896 = vmatprep.subr.bf16.mxu0 %v3225_v4 }
 0x5e5   : > { %2897 = vmatpush3.bf16.msra.mxu0 %v3045_v10 }
 0x5e6   : > { %2898 = vmatprep.subr.bf16.mxu0 %v3225_v4  ;;  %v2743_v4 = vld [vmem:[%s3979_s25] ss:$0 sm:$0xff] }
 0x5e9   : > { %2899 = vmatpush3.bf16.msra.mxu0 %v3046_v11 }
 0x5ea   : > { %2933 = vmatprep.subr.bf16.mxu0 (!%p2751_p1), %v3232_v44 }
 0x66c   : > { %v1926_v54 = vpop.xlane.xlu1 %1925 }
 0x66d   : > { %v1928_v55 = vmul.f32 0.03125, %v1926_v54 }
 0x66f   : > { %v1929_v56 = vsub.f32 %v1921_v52, %v1928_v55  ;;  %v2142_v52 = vld [vmem:[%s3984_s3 + $0x18] sm:$0xff] (!%p2751_p1)  ;;  %v2298_v55 = vld [vmem:[%s3985_s0] sm:$0xff] (!%p2751_p1) }
 0x670   : > { %v2937_v54 = vpack.c.bf16 (!%p2751_p1), %v2142_v52, %v2141_v51 }
 0x671   : > { %v1930_v57 = vmul.f32 %v1929_v56, %v1929_v56 }
 0x673   : > { %v1931_v58 = vsel %vm1009_vm2, %v1930_v57, 0.0 }
 0x674   : > { %1932 = vadd.xlane.f32.xlu0 %v1931_v58  ;;  %v2221_v58 = vld [vmem:[%s3987_s14] sm:$0x1] (!%p2751_p1) }
 0x701   : > { %v1933_v62 = vpop.xlane.xlu0 %1932 }
 0x702   : > { %v1934_v63 = vmul.f32 0.03125, %v1933_v62 }
 0x704   : > { %v1935_v0 = vadd.f32 1e-05, %v1934_v63 }
 0x706   : > { %3063 = vrsqrt.f32 %v1935_v0 }
 0x710   : > { %v3064_v1 = vpop.eup %3063 }
 0x711   : > { %v1937_v3 = vmul.f32 %v3064_v1, %v1929_v56  ;;  %v2299_v56 = vld [vmem:[%s3986_s8 + $0x8] sm:$0xff] (!%p2751_p1) }
 0x712   : > { %v2946_v57 = vpack.c.bf16 (!%p2751_p1), %v2299_v56, %v2298_v55 }
 0x713   : > { %v1944_v7 = vmul.f32 %v2737_v2, %v1937_v3  ;;  %v2292_v3 = vld [vmem:[%s3990_s19] sm:$0x1] (!%p2751_p1) }
 0x715   : > { %v1951_v8 = vadd.f32 %v2738_v5, %v1944_v7 }
 0x717   : > { %v1952_v9 = vpack.c.bf16 %v1951_v8, %v1951_v8 }
 0x719   : > { %2889 = vmatmul.mubr.msk.bf16.vlgmr.msra.gmra.mrb[20].mxu1 %vm1009_vm2, %v1952_v9  ;;  %v2300_v9 = vld [vmem:[%s3991_s18] sm:$0x1] (!%p2751_p1) }
 0x71a   : > { %2923 = vmatprep.mubr.msk.f32.mxu1 (!%p2751_p1), %vm3233_vm6, %v3234_v47  ;;  %2941 = vmatpush3.bf16.msra.mxu1 (!%p2751_p1), %v2940_v45 }
 0x71b   : > { %2942 = vmatprep.subr.bf16.mxu1 (!%p2751_p1), %v3232_v44 }
 0x71e   : > { %2944 = vmatpush3.bf16.msra.mxu1 (!%p2751_p1), %v2943_v53 }
 0x7ec   : > { %v2013_v13 = vpop.f32.mrb[20].mxu1 }
 0x7ed   : > { %v2014_v14 = vadd.f32 %v2739_v12, %v2013_v13  ;;  %v2890_v15 = vpop.f32.mrb[21].mxu1 }
 0x7ee   : > { %v2016_v16 = vpop.f32.mrb[22].mxu1 }
 0x7ef   : > { %v2019_v17 = vmax.f32 %v2014_v14, 0.0  ;;  %v2891_v18 = vpop.f32.mrb[23].mxu1 }
 0x7f1   : > { %v2020_v19 = vpack.c.bf16 %v2019_v17, %v2019_v17 }
 0x7f3   : > { %2901 = vmatmul.mubr.msk.bf16.vlgmr.msra.gmra.mrb[16].mxu0 %vm2060_vm5, %v2020_v19 }
 0x7f4   : > { %2912 = vmatprep.mubr.msk.f32.mxu0 (!%p2751_p1), %vm3233_vm6, %v3234_v47  ;;  %2935 = vmatpush3.bf16.msra.mxu0 (!%p2751_p1), %v2934_v50 }
 0x7f5   : > { %2936 = vmatprep.subr.bf16.mxu0 (!%p2751_p1), %v3232_v44 }
 0x7f8   : > { %2938 = vmatpush3.bf16.msra.mxu0 (!%p2751_p1), %v2937_v54 }
 0x7f9   : > { %2945 = vmatprep.subr.bf16.mxu0 (!%p2751_p1), %v3232_v44 }
 0x8c6   : > { %v2098_v20 = vpop.f32.mrb[16].mxu0 }
 0x8c7   : > { %v2099_v21 = vadd.f32 %v2743_v4, %v2098_v20  ;;  %v2902_v22 = vpop.f32.mrb[17].mxu0 }
 0x8c8   : > { %v2101_v23 = vpop.f32.mrb[18].mxu0 }
 0x8c9   : > { %v2903_v24 = vpop.f32.mrb[19].mxu0  ;;  %v2104_v25 = vadd.f32 %v2099_v21, %v1951_v8 }
 0x8cb   : > { %v2107_v26 = vsel %vm1009_vm2, %v2104_v25, 0.0 }
 0x8cc   : > { %2108 = vadd.xlane.f32.xlu0 %v2107_v26 }
 0x959   : > { %v2109_v27 = vpop.xlane.xlu0 %2108 }
 0x95a   : > { %v2110_v28 = vmul.f32 0.03125, %v2109_v27 }
 0x95c   : > { %v2111_v29 = vsub.f32 %v2104_v25, %v2110_v28 }
 0x95e   : > { %v2112_v30 = vmul.f32 %v2111_v29, %v2111_v29 }
 0x960   : > { %v2113_v31 = vsel %vm1009_vm2, %v2112_v30, 0.0 }
 0x961   : > { %2114 = vadd.xlane.f32.xlu1 %v2113_v31 }
 0x9ee   : > { %v2115_v32 = vpop.xlane.xlu1 %2114 }
 0x9ef   : > { %v2116_v33 = vmul.f32 0.03125, %v2115_v32 }
 0x9f1   : > { %v2117_v34 = vadd.f32 1e-05, %v2116_v33 }
 0x9f3   : > { %3065 = vrsqrt.f32 %v2117_v34 }
 0x9fd   : > { %v3066_v35 = vpop.eup %3065 }
 0x9fe   : > { %v2119_v37 = vmul.f32 %v3066_v35, %v2111_v29  ;;  %2138 = sbr.rel (%p2751_p1) target bundleno = 3012 (0xbc4), region = 112 }
 0xa00   : > { %v2126_v39 = vmul.f32 %v2749_v36, %v2119_v37 }
 0xa02   : > { %v2133_v40 = vadd.f32 %v2750_v38, %v2126_v39 }
 0xa04   : > { %2134 = vst.msk [vmem:[#allocation2] sm:$0xff] %vm1009_vm2, %v2133_v40  ;;  %2924 = vmatmul.mubr.msk.f32.vlgmr.msra.gmra.mrb[0].mxu1 (!%p2751_p1), %vm1009_vm2, %v2133_v40  ;;  %2913 = vmatmul.mubr.msk.f32.vlgmr.msra.gmra.mrb[0].mxu0 (!%p2751_p1), %vm1009_vm2, %v2133_v40 }
 0xa05   : > { %2930 = vmatprep.mubr.msk.f32.mxu0 %vm3233_vm6, %v3234_v47  ;;  %2947 = vmatpush3.bf16.msra.mxu0 %v2946_v57 }
 0xad7   : > { %v2288_v60 = vpop.f32.mrb[0].mxu1  ;;  %v2213_v62 = vpop.f32.mrb[0].mxu0 }
 0xad8   : > { %v2289_v6 = vadd.f32 %v2288_v60, %v2221_v58  ;;  %v2925_v61 = vpop.f32.mrb[1].mxu1  ;;  %v2214_v63 = vadd.f32 %v2213_v62, %v2143_v59  ;;  %v2914_v0 = vpop.f32.mrb[1].mxu0 }
 0xada   : > { %v2293_v1 = vmul.f32 0.5, %v2289_v6  ;;  %2377 = vst.msk [vmem:[%s908_s26] sm:$0x1] %vm2375_vm7, %v2289_v6  ;;  %2376 = vst.msk [vmem:[%s902_s7] sm:$0x1] %vm2375_vm7, %v2214_v63 }
 0xadc   : > { %v2294_v2 = vmul.f32 1.442695, %v2293_v1 }
 0xade   : > { %3067 = vpow2.f32 %v2294_v2 }
 0xae8   : > { %v3068_v5 = vpop.eup %3067 }
 0xae9   : > { %v2296_v7 = vmul.f32 %v3068_v5, %v2292_v3 }
 0xaeb   : > { %v2297_v8 = vadd.f32 %v2296_v7, %v2214_v63 }
 0xaed   : > { %2378 = vst.msk [vmem:[%s914_s27] sm:$0x1] %vm2375_vm7, %v2297_v8  ;;  %2931 = vmatmul.mubr.msk.f32.vlgmr.msra.gmra.mrb[2].mxu0 %vm2301_vm8, %v2297_v8 }
 0xbc0   : > { %v2371_v10 = vpop.f32.mrb[2].mxu0 }
 0xbc1   : > { %v2372_v11 = vadd.f32 %v2371_v10, %v2300_v9  ;;  %v2932_v12 = vpop.f32.mrb[3].mxu0 }
 0xbc3   : > { %2380 = vst.msk [vmem:[%s973_s22] sm:$0x1] %vm2379_vm9, %v2372_v11 }
 0xbc4 PF: > { %s3993_s5 = sld [smem:[#allocation17_spill]]  ;;  %s3995_s21 = sld [smem:[#allocation14_spill]] }
 0xbc5   : > { %s3997_s28 = sld [smem:[#allocation40_spill]]  ;;  %s2418_s2 = sshll.u32 %s908_s26, 4  ;;  %s3759_s2 = int_to_ptr.vmem [resolvable:$true] %s2418_s2 }
 0xbc6   : > { %s3999_s17 = sld [smem:[#allocation39_spill]]  ;;  %s3069_s0 = scalar_lea.vmem %s3759_s2, 16 }
 0xbc7   : > { %p3070_p2 = scmp.ne.s32.totalorder %s3759_s2, %s3069_s0  ;;  %s3235_s29 = smov [#allocation5]  }
 0xbc9   : > { %p3071_p4 = pnand %p3070_p2, %p3414_p3 }
 0xbca   : > { %s3994_s6 = sadd.s32 4294967295, %s3993_s5   ;;  %s3749_s16 = sshll.u32 %s3995_s21, 4 }
 0xbcb   : > { %s3746_s4 = sand.u32 1, %s3994_s6   ;;  %s3998_s1 = smov %s3997_s28 }
 0xbcc   : > { %s3755_s19 = scalar_lea.hbm %s3997_s28, %s3749_s16  ;;  %s3765_s18 = scalar_lea.hbm %s3999_s17, %s3749_s16 }
 0xbcd   : > { %s2386_s23 = scalar_lea.sflag [#allocation6], %s3746_s4  ;;  %p3072_p5 = pneg %p3071_p4 }
 0xbce   : > { %s3073_s5 = sshll.u32 %s3235_s29, 4  ;;  %s3074_s5 = int_to_ptr.vmem [resolvable:$false] %s3073_s5 }
 0xbcf   : > { %s3075_s26 = scalar_lea.vmem %s3074_s5, 32  ;;  %p3076_p6 = scmp.lt.s32.totalorder %s3759_s2, %s3074_s5 }
 0xbd0   : > { %p3077_p7 = scmp.lt.s32.totalorder %s3075_s26, %s3069_s0 }
 0xbd2   : > { %p3078_p8 = por %p3077_p7, %p3076_p6 }
 0xbd4   : > { %p3079_p10 = pnand %p3078_p8, %p3072_p5 }
 0xbd6   : > { %3082 = shalt.err (!%p3079_p10)
}
 0xbd7   : > { %s3083_s6 = scalar_lea.hbm %s3755_s19, 16  ;;  %s3087_s25 = scalar_lea.hbm %s3998_s1, 32 }
 0xbd8   : > { %p3084_p11 = scmp.ne.s32.totalorder %s3755_s19, %s3083_s6  ;;  %p3088_p0 = scmp.lt.u32.totalorder %s3755_s19, %s3998_s1 }
 0xbd9   : > { %p3089_p1 = scmp.lt.u32.totalorder %s3087_s25, %s3083_s6  ;;  %p3091_p4 = scmp.lt.u32.totalorder %s3083_s6, %s3755_s19 }
 0xbda   : > { %p3085_p12 = pnand %p3084_p11, %p3414_p3 }
 0xbdb   : > { %p3090_p2 = por %p3089_p1, %p3088_p0 }
 0xbdc   : > { %p3086_p13 = pneg %p3085_p12 }
 0xbdd   : > { %p3092_p5 = por %p3091_p4, %p3090_p2 }
 0xbdf   : > { %p3093_p6 = pnand %p3092_p5, %p3086_p13 }
 0xbe1   : > { %3096 = shalt.err (!%p3093_p6)
}
 0xbe2   : > { %2949 = dma.vmem_to_hbm [thread:$0]  (%p3414_p3), %s3759_s2, 16, %s3755_s19, %s2386_s23  }
 0xbe3   : > { %s2405_s15 = sshll.u32 %s902_s7, 4  ;;  %s4000_s5 = sld [smem:[#allocation41_spill]]  ;;  %s3799_s15 = int_to_ptr.vmem [resolvable:$true] %s2405_s15 }
 0xbe4   : > { %s3803_s6 = sshll.u32 %s914_s27, 4  ;;  %s2382_s20 = scalar_lea.sflag [#allocation4], %s3437_s30  ;;  %s2432_s6 = int_to_ptr.vmem [resolvable:$true] %s3803_s6 }
 0xbe5   : > { %s3097_s25 = scalar_lea.vmem %s3799_s15, 16  ;;  %s3236_s7 = smov [#allocation3]  }
 0xbe6   : > { %p3098_p7 = scmp.ne.s32.totalorder %s3799_s15, %s3097_s25  ;;  %s3101_s19 = sshll.u32 %s3236_s7, 4  ;;  %s3102_s19 = int_to_ptr.vmem [resolvable:$false] %s3101_s19 }
 0xbe7   : > { %s3103_s2 = scalar_lea.vmem %s3102_s19, 32  ;;  %p3104_p11 = scmp.lt.s32.totalorder %s3799_s15, %s3102_s19 }
 0xbe8   : > { %p3099_p8 = pnand %p3098_p7, %p3414_p3  ;;  %p3105_p12 = scmp.lt.s32.totalorder %s3103_s2, %s3097_s25 }
 0xbe9   : > { %s4001_s21 = smov %s4000_s5  ;;  %s3797_s26 = scalar_lea.hbm %s4000_s5, %s3749_s16 }
 0xbea   : > { %p3100_p10 = pneg %p3099_p8  ;;  %p3106_p13 = por %p3105_p12, %p3104_p11 }
 0xbec   : > { %p3107_p0 = pnand %p3106_p13, %p3100_p10 }
 0xbee   : > { %3110 = shalt.err (!%p3107_p0)
}
 0xbef   : > { %s3111_s30 = scalar_lea.hbm %s3765_s18, 16  ;;  %s3115_s28 = scalar_lea.hbm %s3999_s17, 32 }
 0xbf0   : > { %p3112_p1 = scmp.ne.s32.totalorder %s3765_s18, %s3111_s30  ;;  %p3116_p5 = scmp.lt.u32.totalorder %s3765_s18, %s3999_s17 }
 0xbf1   : > { %p3117_p6 = scmp.lt.u32.totalorder %s3115_s28, %s3111_s30  ;;  %p3119_p8 = scmp.lt.u32.totalorder %s3111_s30, %s3765_s18 }
 0xbf2   : > { %p3113_p2 = pnand %p3112_p1, %p3414_p3 }
 0xbf3   : > { %p3118_p7 = por %p3117_p6, %p3116_p5 }
 0xbf4   : > { %p3114_p4 = pneg %p3113_p2 }
 0xbf5   : > { %p3120_p10 = por %p3119_p8, %p3118_p7 }
 0xbf7   : > { %p3121_p11 = pnand %p3120_p10, %p3114_p4 }
 0xbf9   : > { %3124 = shalt.err (!%p3121_p11)
}
 0xbfa   : > { %2948 = dma.vmem_to_hbm [thread:$0]  (%p3414_p3), %s3799_s15, 16, %s3765_s18, %s2382_s20  }
 0xbfb   : > { %s3125_s29 = scalar_lea.vmem %s2432_s6, 16  ;;  %s3237_s5 = smov [#allocation7]  }
 0xbfc   : > { %p3126_p12 = scmp.ne.s32.totalorder %s2432_s6, %s3125_s29  ;;  %s3129_s25 = sshll.u32 %s3237_s5, 4  ;;  %s3130_s25 = int_to_ptr.vmem [resolvable:$false] %s3129_s25 }
 0xbfd   : > { %s3131_s7 = scalar_lea.vmem %s3130_s25, 32  ;;  %p3132_p1 = scmp.lt.s32.totalorder %s2432_s6, %s3130_s25 }
 0xbfe   : > { %p3127_p13 = pnand %p3126_p12, %p3414_p3  ;;  %p3133_p2 = scmp.lt.s32.totalorder %s3131_s7, %s3125_s29 }
 0xc00   : > { %p3128_p0 = pneg %p3127_p13  ;;  %p3134_p4 = por %p3133_p2, %p3132_p1 }
 0xc02   : > { %p3135_p5 = pnand %p3134_p4, %p3128_p0 }
 0xc04   : > { %3138 = shalt.err (!%p3135_p5)
}
 0xc05   : > { %s3139_s18 = scalar_lea.hbm %s3797_s26, 16  ;;  %s3143_s19 = scalar_lea.hbm %s4001_s21, 32 }
 0xc06   : > { %p3140_p6 = scmp.ne.s32.totalorder %s3797_s26, %s3139_s18  ;;  %p3144_p10 = scmp.lt.u32.totalorder %s3797_s26, %s4001_s21 }
 0xc07   : > { %p3145_p11 = scmp.lt.u32.totalorder %s3143_s19, %s3139_s18  ;;  %p3147_p13 = scmp.lt.u32.totalorder %s3139_s18, %s3797_s26 }
 0xc08   : > { %p3141_p7 = pnand %p3140_p6, %p3414_p3 }
 0xc09   : > { %p3146_p12 = por %p3145_p11, %p3144_p10 }
 0xc0a   : > { %p3142_p8 = pneg %p3141_p7 }
 0xc0b   : > { %p3148_p0 = por %p3147_p13, %p3146_p12 }
 0xc0d   : > { %p3149_p1 = pnand %p3148_p0, %p3142_p8 }
 0xc0f   : > { %3152 = shalt.err (!%p3149_p1)
}
 0xc10   : > { %2950 = dma.vmem_to_hbm [thread:$0]  (%p3414_p3), %s2432_s6, 16, %s3797_s26, %s2386_s23  }
 0xc11 PF: > { %s4002_s27 = sld [smem:[#allocation17_spill]]  ;;  %s4003_s16 = sld [smem:[#allocation10_spill]] }
 0xc17   : > { %p2964_p2 = scmp.ge.s32.totalorder %s4002_s27, 2  ;;  %s2446_s22 = sand.u32 1, %s4003_s16  }
 0xc18   : > { %s2447_s0 = scalar_lea.sflag [#allocation4], %s2446_s22 }
 0xc19   : > { %p2955_p4 = pnand %p2964_p2, %p3426_p9 }
 0xc1b   : > { %3186 = dma.done.wait (!%p2955_p4), %s2447_s0, 16  }
 0xc1c   : > { %3188 = vsyncadd (!%p2955_p4), %s2447_s0, 4294967280  ;;  %s4005_s29 = sadd.s32 4294967294, %s4002_s27  }
 0xc1d   : > { %s2454_s5 = sand.u32 1, %s4005_s29  }
 0xc1e   : > { %s2455_s25 = scalar_lea.sflag [#allocation6], %s2454_s5 }
 0xc1f   : > { %3190 = dma.done.wait (!%p2955_p4), %s2455_s25, 32  }
 0xc20   : > { %3192 = vsyncadd (!%p2955_p4), %s2455_s25, 4294967264  ;;  %s41_s0 = sadd.s32 1, %s4002_s27   ;;  %s4006_s5 = sld [smem:[#allocation11_spill]] }
 0xc21   : > { %p38_p3 = scmp.ge.s32.totalorder %s41_s0, 6   ;;  %s4007_s26 = sld [smem:[#allocation12_spill]] }
 0xc22   : > { %s4008_s27 = sld [smem:[#allocation22_spill]]  ;;  %s4009_s28 = sld [smem:[#allocation15_spill]] }
 0xc23   : > { %s4010_s6 = sld [smem:[#allocation16_spill]]  ;;  %s4011_s2 = sld [smem:[#allocation18_spill]] }
 0xc24   : > { %s4012_s29 = sld [smem:[#allocation20_spill]]  ;;  %40 = sbr.rel (!%p38_p3) target bundleno = 28 (0x1c), region = 230 }
 0xc2b   :  { %2473 = vsyncpa [#allocation4], 1 }
 0xc2c   :  { %2475 = vsyncpa [#allocation4 + $0x1], 1 }
 0xc2d   :  { %2476 = vsyncpa [#allocation6], 1 }
 0xc2e   :  { %2478 = vsyncpa [#allocation6 + $0x1], 1 }

// kernel: transformer_vae_forward.3
= control target key start
LH: loop header
LB: loop body
LE: loop exit
PB: predicated region body
PF: predicated region fallthrough
CT: control target
= control target key end

     0   :  { %s4341_s27 = smov 0   ;;  %s4347_s28 = smov 0   ;;  %s4836_s0 = inlined_call_operand.vmem [shape: f32[16,32], index: 0, kind: input, shape index: {}]   ;;  %s4837_s1 = inlined_call_operand.vmem [shape: f32[8,32], index: 1, kind: input, shape index: {}]   ;;  %s4838_s2 = inlined_call_operand.vmem [shape: f32[16,32], index: 2, kind: input, shape index: {}]   ;;  %s4839_s3 = inlined_call_operand.vmem [shape: f32[8,8], index: 3, kind: input, shape index: {}]   ;;  %s4840_s4 = inlined_call_operand.vmem [shape: bf16[2,32,96], index: 4, kind: input, shape index: {}]   ;;  %s4841_s5 = inlined_call_operand.vmem [shape: f32[2,1,96], index: 5, kind: input, shape index: {}]   ;;  %s4842_s6 = inlined_call_operand.vmem [shape: bf16[2,32,32], index: 6, kind: input, shape index: {}]   ;;  %s4843_s7 = inlined_call_operand.vmem [shape: f32[2,1,32], index: 7, kind: input, shape index: {}]   ;;  %s4844_s8 = inlined_call_operand.vmem [shape: f32[2,1,32], index: 8, kind: input, shape index: {}]   ;;  %s4845_s9 = inlined_call_operand.vmem [shape: f32[2,1,32], index: 9, kind: input, shape index: {}]   ;;  %s4846_s10 = inlined_call_operand.vmem [shape: bf16[2,32,32], index: 10, kind: input, shape index: {}]   ;;  %s4847_s11 = inlined_call_operand.vmem [shape: f32[2,1,32], index: 11, kind: input, shape index: {}]   ;;  %s4848_s12 = inlined_call_operand.vmem [shape: bf16[2,32,64], index: 12, kind: input, shape index: {}]   ;;  %s4849_s13 = inlined_call_operand.vmem [shape: f32[2,1,64], index: 13, kind: input, shape index: {}]   ;;  %s4850_s14 = inlined_call_operand.vmem [shape: bf16[2,32,32], index: 14, kind: input, shape index: {}]   ;;  %s4851_s15 = inlined_call_operand.vmem [shape: f32[2,1,32], index: 15, kind: input, shape index: {}]   ;;  %s4852_s16 = inlined_call_operand.vmem [shape: f32[2,1,32], index: 16, kind: input, shape index: {}]   ;;  %s4853_s17 = inlined_call_operand.vmem [shape: f32[2,1,32], index: 17, kind: input, shape index: {}]   ;;  %s4854_s18 = inlined_call_operand.vmem [shape: bf16[2,32,64], index: 18, kind: input, shape index: {}]   ;;  %s4855_s19 = inlined_call_operand.vmem [shape: f32[2,1,64], index: 19, kind: input, shape index: {}]   ;;  %s4856_s20 = inlined_call_operand.vmem [shape: bf16[2,64,32], index: 20, kind: input, shape index: {}]   ;;  %s4857_s21 = inlined_call_operand.vmem [shape: f32[2,1,32], index: 21, kind: input, shape index: {}]   ;;  %s4858_s22 = inlined_call_operand.vmem [shape: f32[2,1,32], index: 22, kind: input, shape index: {}]   ;;  %s4859_s23 = inlined_call_operand.vmem [shape: f32[2,1,32], index: 23, kind: input, shape index: {}]   ;;  %s4860_s24 = inlined_call_operand.vmem [shape: f32[32,32], index: 24, kind: input, shape index: {}]   ;;  %s4861_s25 = inlined_call_operand.vmem [shape: f32[1,32], index: 25, kind: input, shape index: {}]   ;;  %s4862_s26 = inlined_call_operand.vmem [shape: f32[16,32], index: 26, kind: output, shape index: {}]  }
   0x1   :  { %4870 = sst [smem:[#allocation11_spill]] %s4836_s0 }
   0x2   :  { %4871 = sst [smem:[#allocation12_spill]] %s4837_s1 }
   0x3   :  { %4872 = sst [smem:[#allocation13_spill]] %s4838_s2 }
   0x4   :  { %4873 = sst [smem:[#allocation14_spill]] %s4839_s3  ;;  %s4343_s3 = smov 0  }
   0x5   :  { %4874 = sst [smem:[#allocation15_spill]] %s4840_s4 }
   0x6   :  { %4875 = sst [smem:[#allocation16_spill]] %s4841_s5 }
   0x7   :  { %4876 = sst [smem:[#allocation17_spill]] %s4842_s6 }
   0x8   :  { %4877 = sst [smem:[#allocation18_spill]] %s4843_s7  ;;  %s4345_s7 = smov 0  }
   0x9   :  { %4878 = sst [smem:[#allocation19_spill]] %s4844_s8  ;;  %s4349_s8 = smov 0  }
   0xa   :  { %4879 = sst [smem:[#allocation20_spill]] %s4845_s9 }
   0xb   :  { %4880 = sst [smem:[#allocation21_spill]] %s4846_s10 }
   0xc   :  { %4881 = sst [smem:[#allocation22_spill]] %s4848_s12 }
   0xd   :  { %4882 = sst [smem:[#allocation23_spill]] %s4850_s14 }
   0xe   :  { %4883 = sst [smem:[#allocation24_spill]] %s4851_s15 }
   0xf   :  { %4884 = sst [smem:[#allocation25_spill]] %s4852_s16 }
  0x10   :  { %4885 = sst [smem:[#allocation26_spill]] %s4853_s17 }
  0x11   :  { %4886 = sst [smem:[#allocation27_spill]] %s4854_s18 }
  0x12   :  { %4887 = sst [smem:[#allocation28_spill]] %s4855_s19 }
  0x13   :  { %4888 = sst [smem:[#allocation29_spill]] %s4856_s20 }
  0x14   :  { %4889 = sst [smem:[#allocation30_spill]] %s4857_s21 }
  0x15   :  { %4890 = sst [smem:[#allocation31_spill]] %s4858_s22 }
  0x16   :  { %4891 = sst [smem:[#allocation32_spill]] %s4859_s23 }
  0x17   :  { %4892 = sst [smem:[#allocation33_spill]] %s4860_s24 }
  0x18   :  { %4893 = sst [smem:[#allocation34_spill]] %s4861_s25 }
  0x19   :  { %4894 = sst [smem:[#allocation35_spill]] %s4862_s26 }
  0x1a LB: > { %4895 = sst [smem:[#allocation3_spill]] %s4178_s27  ;;  %s45_s4 = sadd.s32 1, %s4186_s7  ;;  %s4194_s8 = sphi %s4349_s8, %s36_s8   ;;  %s4190_s28 = sphi %s4347_s28, %s4960_s28   ;;  %s4186_s7 = sphi %s4345_s7, %s4959_s7   ;;  %s4182_s3 = sphi %s4343_s3, %s4958_s3   ;;  %s4178_s27 = sphi %s4341_s27, %s4957_s27  }
  0x1b   : > { %4896 = sst [smem:[#allocation4_spill]] %s4186_s7  ;;  %s48_s29 = sadd.s32 1, %s4190_s28 }
  0x1c   : > { %4897 = sst [smem:[#allocation5_spill]] %s4190_s28  ;;  %p46_p0 = scmp.ge.s32.totalorder %s45_s4, 2 }
  0x1d   : > { %4898 = sst [smem:[#allocation6_spill]] %s4194_s8  ;;  %p3704_p1 = scmp.ge.s32.totalorder %s4194_s8, 1 }
  0x1e   : > { %p906_p2 = scmp.lt.s32.totalorder %s4194_s8, 5  ;;  %s4962_s4 = smov (%p46_p0, %s45_s4), 0 }
  0x1f   : > { %4899 = sst [smem:[#allocation7_spill]] %s4962_s4  ;;  %s4964_s29 = smov (!%p46_p0, %s48_s29), %s4190_s28 }
  0x20   : > { %p907_p3 = pnand %p3704_p1, %p906_p2  ;;  %p50_p4 = scmp.ge.s32.totalorder %s4964_s29, 2 }
  0x22   : > { %s4966_s29 = smov (%p50_p4, %s4964_s29), 0  ;;  %910 = sbr.rel (%p907_p3) target bundleno = 4396 (0x112c), region = 124 }
  0x23   : > { %4900 = sst [smem:[#allocation8_spill]] %s4966_s29 }
  0x29   : > { %p1052_p5 = scmp.lt.s32.totalorder %s4182_s3, 1  ;;  %p1060_p6 = scmp.lt.s32.totalorder %s4178_s27, 1 }
  0x2a   : > { %s4901_s5 = sld [smem:[#allocation11_spill]]  ;;  %s4904_s26 = sld [smem:[#allocation15_spill]] }
  0x2b   : > { %s4968_s3 = smov (!%p1052_p5, %s4182_s3), 1  ;;  %s4910_s30 = sld [smem:[#allocation21_spill]] }
  0x2c   : > { %s4375_s0 = scalar_select %p1060_p6, %s4178_s27, 1 }
  0x2d   : > { %s4377_s9 = sshll.u32 %s4968_s3, 3  ;;  %s4911_s12 = sld [smem:[#allocation22_spill]] }
  0x2e   : > { %s3790_s28 = sshll.u32 %s4375_s0, 4  ;;  %s4912_s14 = sld [smem:[#allocation23_spill]] }
  0x2f   : > { %s4916_s18 = sld [smem:[#allocation27_spill]]  ;;  %s4920_s1 = sld [smem:[#allocation30_spill]] }
  0x30   : > { %s1055_s10 = scalar_lea.vmem %s4901_s5, %s4377_s9  ;;  %s4395_s23 = scalar_lea.vmem %s4904_s26, %s3790_s28 }
  0x31   : > { %4905 = sst [smem:[#allocation9_spill]] %s4395_s23  ;;  %s4906_s5 = sld [smem:[#allocation17_spill]] }
  0x32   : > { %s4417_s2 = scalar_lea.vmem %s4910_s30, %s3790_s28  ;;  %s4919_s26 = sld [smem:[#allocation29_spill]] }
  0x33   : > { %s4426_s21 = scalar_lea.vmem %s4911_s12, %s3790_s28  ;;  %s4921_s17 = sld [smem:[#allocation31_spill]] }
  0x34   : > { %s4435_s20 = scalar_lea.vmem %s4912_s14, %s3790_s28  ;;  %s3796_s14 = sshll.u32 %s4375_s0, 5 }
  0x35   : > { %s4452_s8 = scalar_lea.vmem %s4916_s18, %s3790_s28  ;;  %s1127_s4 = scalar_lea.vmem %s4920_s1, %s4375_s0 }
  0x36   : > { %4917 = sst [smem:[#allocation10_spill]] %s4452_s8  ;;  %s4922_s18 = sld [smem:[#allocation32_spill]] }
  0x37   : > { %s4400_s22 = scalar_lea.vmem %s4906_s5, %s3790_s28  ;;  %s4923_s24 = sld [smem:[#allocation35_spill]] }
  0x38   : > { %s4462_s15 = scalar_lea.vmem %s4919_s26, %s3796_s14  ;;  %s4924_s8 = sld [smem:[#allocation3_spill]] }
  0x39   : > { %s1130_s12 = scalar_lea.vmem %s4921_s17, %s4375_s0 }
  0x3c   : > { %s1133_s16 = scalar_lea.vmem %s4922_s18, %s4375_s0 }
  0x3d   : > { %s1137_s19 = scalar_lea.vmem %s4923_s24, %s4377_s9 }
  0x3e   : > { %p3722_p7 = scmp.ne.s32.totalorder %s4924_s8, 0 }
  0x3f   : > { %s4925_s23 = sld [smem:[#allocation12_spill]] (!%p3722_p7)  ;;  %v1144_v1 = vld [vmem:[%s1055_s10] sm:$0xff] (!%p3722_p7)  ;;  %vm1146_vm0 = vcmask (!%p3722_p7), 261120  }
  0x40   : > { %1142 = sbr.rel (%p3722_p7) target bundleno = 73 (0x49), region = 128 }
  0x45   : > { %v1143_v0 = vld [vmem:[%s4925_s23] sm:$0xff] (!%p3722_p7) }
  0x46   : > { %v1145_v2 = vadd.f32 (!%p3722_p7), %v1144_v1, %v1143_v0 }
  0x48   : > { %1147 = vst.msk [vmem:[#allocation2] sm:$0xff] %vm1146_vm0, %v1145_v2 }
  0x49 PF: > { %s4926_s17 = sld [smem:[#allocation9_spill]]  ;;  %v4196_v4 = vmov 0.0   ;;  %vm4197_vm1 = vmmov 0   ;;  %vm1175_vm2 = vcmask 261120   ;;  %s4927_s25 = sld [smem:[#allocation16_spill]]  ;;  %vm1228_vm3 = vcmask 64512  }
  0x4a   : > { %3867 = vmatprep.subr.bf16.mxu0 %v4196_v4  ;;  %3875 = vmatprep.subr.mxu1 %v4196_v4  ;;  %s4198_s24 = smov 104   ;;  %s4199_s8 = smov 120   ;;  %vm1898_vm4 = vcmask 1043456   ;;  %vm3259_vm5 = vcmask 523264  }
  0x4b   : > { %3871 = vmatprep.mubr.msk.bf16.mxu0 %vm4197_vm1, %v4196_v4  ;;  %3877 = vmatprep.mubr.msk.f32.mxu1 %vm4197_vm1, %v4196_v4  ;;  %s4200_s30 = smov 96   ;;  %s4201_s5 = smov 112  }
  0x4c   : > { %s4929_s28 = sld [smem:[#allocation14_spill]]  ;;  %s4202_s7 = smov 64  }
  0x4d   : > { %s4930_s3 = sld [smem:[#allocation18_spill]]  ;;  %s4938_s27 = scalar_lea.vmem %s4849_s13, %s4375_s0 }
  0x4e   : > { %s4939_s26 = scalar_lea.vmem %s4847_s11, %s4375_s0 }
  0x4f   : > { %v4106_v3 = vld [vmem:[%s4926_s17] sm:$0xff]   ;;  %v4107_v5 = vld [vmem:[%s4926_s17 + $0x8] sm:$0xff]   ;;  %s4928_s1 = scalar_lea.vmem %s4927_s25, %s4375_s0  ;;  %s4932_s17 = sld [smem:[#allocation13_spill]] }
  0x50   : > { %3868 = vmatpush3.bf16.msra.mxu0 %v4106_v3  ;;  %v4490_v6 = vld [vmem:[#allocation2] sm:$0xff]  ;;  %s4934_s25 = sld [smem:[#allocation19_spill]] }
  0x51   : > { %3869 = vmatprep.subr.bf16.mxu0 %v4196_v4  ;;  %v1151_v7 = vpack.c.bf16 %v4490_v6, %v4490_v6  ;;  %v3723_v8 = vld [vmem:[%s4928_s1] ss:$0 sm:$0xff] }
  0x52   : > { %v1150_v22 = vld [vmem:[%s4929_s28] sm:$0xff]  ;;  %s4936_s28 = sld [smem:[#allocation20_spill]] }
  0x53   : > { %s4931_s14 = scalar_lea.vmem %s4930_s3, %s4375_s0 }
  0x54   : > { %3870 = vmatpush3.bf16.msra.mxu0 %v4107_v5 }
  0x55   : > { %3900 = vmatprep.subr.mxu0 %v4196_v4  ;;  %s4933_s18 = scalar_lea.vmem %s4932_s17, %s4377_s9 }
  0x56   : > { %s4935_s1 = scalar_lea.vmem %s4934_s25, %s4375_s0 }
  0x57   : > { %3872 = vmatmul.mubr.msk.bf16.vlgmr.msra.gmra.mrb[0].mxu0 %vm1175_vm2, %v1151_v7 }
  0x58   : > { %3902 = vmatprep.mubr.msk.f32.mxu0 %vm4197_vm1, %v4196_v4 }
 0x12a   : > { %v1213_v9 = vpop.f32.mrb[0].mxu0 }
 0x12b   : > { %v4506_v10 = vadd.f32 %v3723_v8, %v1213_v9  ;;  %v3873_v11 = vpop.f32.mrb[1].mxu0 }
 0x12c   : > { %v1216_v12 = vpop.f32.mrb[2].mxu0 }
 0x12d   : > { %1224 = vrot.lane.b32.xlu1 %v4506_v10, %s4198_s24  ;;  %1220 = vrot.lane.b32.xlu0 %v4506_v10, %s4199_s8  ;;  %v3874_v13 = vpop.f32.mrb[3].mxu0  ;;  %v1887_v12 = vld [vmem:[%s4400_s22] sm:$0xf] }
 0x131   : > { %1226 = vrot.lane.b32.xlu1 %v4506_v10, %s4200_s30  ;;  %1222 = vrot.lane.b32.xlu0 %v4506_v10, %s4201_s5 }
 0x19f   : > { %v4516_v14 = vpop.permute.xlu1 %1224  ;;  %v1221_v15 = vpop.permute.xlu0 %1220 }
 0x1a0   : > { %1303 = vrot.lane.b32.xlu0 %v1221_v15, %s4200_s30 }
 0x1a3   : > { %v1227_v16 = vpop.permute.xlu1 %1226  ;;  %v4519_v17 = vpop.permute.xlu0 %1222 }
 0x1a4   : > { %3876 = vmatpush3.xpose.msk.msra.mxu1 %vm1228_vm3, %v1227_v16  ;;  %1455 = vrot.lane.b32.xlu0 %v4516_v14, %s4200_s30 }
 0x1a5   : > { %1379 = vrot.lane.b32.xlu1 %v4519_v17, %s4200_s30  ;;  %3880 = vmatprep.subr.mxu1 %v4196_v4 }
 0x1a7   : > { %3878 = vmatmul.mubr.msk.f32.vlgmr.msra.gmra.mrb[0].mxu1 %vm1228_vm3, %v4506_v10 }
 0x1a8   : > { %3882 = vmatprep.mubr.msk.f32.mxu1 %vm4197_vm1, %v4196_v4 }
 0x212   : > { %v1304_v18 = vpop.permute.xlu0 %1303 }
 0x213   : > { %3881 = vmatpush3.xpose.msk.msra.mxu1 %vm1228_vm3, %v1304_v18  ;;  %v1888_v18 = vld [vmem:[%s4400_s22 + $0x4] sm:$0xf] }
 0x214   : > { %3885 = vmatprep.subr.mxu1 %v4196_v4 }
 0x216   : > { %3883 = vmatmul.mubr.msk.f32.vlgmr.msra.gmra.mrb[2].mxu1 %vm1228_vm3, %v1221_v15  ;;  %v1456_v20 = vpop.permute.xlu0 %1455 }
 0x217   : > { %v1380_v19 = vpop.permute.xlu1 %1379  ;;  %3887 = vmatprep.mubr.msk.f32.mxu1 %vm4197_vm1, %v4196_v4 }
 0x218   : > { %3886 = vmatpush3.xpose.msk.msra.mxu1 %vm1228_vm3, %v1380_v19  ;;  %v1946_v19 = vsel %vm1898_vm4, %v1888_v18, 0 }
 0x219   : > { %3890 = vmatprep.subr.mxu1 %v4196_v4 }
 0x21b   : > { %3888 = vmatmul.mubr.msk.f32.vlgmr.msra.gmra.mrb[4].mxu1 %vm1228_vm3, %v4519_v17 }
 0x21c   : > { %3891 = vmatpush3.xpose.msk.msra.mxu1 %vm1228_vm3, %v1456_v20  ;;  %3892 = vmatprep.mubr.msk.f32.mxu1 %vm4197_vm1, %v4196_v4  ;;  %v1889_v20 = vld [vmem:[%s4400_s22 + $0x8] sm:$0xf] }
 0x21d   : > { %3895 = vmatprep.subr.mxu1 %v4196_v4 }
 0x21f   : > { %3893 = vmatmul.mubr.msk.f32.vlgmr.msra.gmra.mrb[6].mxu1 %vm1228_vm3, %v4516_v14 }
 0x220   : > { %3897 = vmatprep.mubr.msk.f32.mxu1 %vm4197_vm1, %v4196_v4 }
 0x27a   : > { %v1299_v21 = vpop.f32.mrb[0].mxu1 }
 0x27b   : > { %v1531_v23 = vmul.f32 0.35355338, %v1299_v21  ;;  %v3879_v24 = vpop.f32.mrb[1].mxu1 }
 0x27c   : > { %v1992_v24 = vsel %vm1898_vm4, %v1889_v20, 0 }
 0x27d   : > { %v1535_v25 = vadd.f32 %v1531_v23, %v1150_v22 }
 0x27f   : > { %v1539_v26 = vsel %vm1228_vm3, %v1535_v25, -inf }
 0x280   : > { %1540 = vmax.xlane.f32.xlu1 %v1539_v26 }
 0x2e9   : > { %v1375_v27 = vpop.f32.mrb[2].mxu1 }
 0x2ea   : > { %v1532_v28 = vmul.f32 0.35355338, %v1375_v27  ;;  %v3884_v29 = vpop.f32.mrb[3].mxu1 }
 0x2ec   : > { %v1536_v30 = vadd.f32 %v1532_v28, %v1150_v22 }
 0x2ee   : > { %v1451_v31 = vpop.f32.mrb[4].mxu1  ;;  %v1542_v32 = vsel %vm1228_vm3, %v1536_v30, -inf }
 0x2ef   : > { %v1533_v33 = vmul.f32 0.35355338, %v1451_v31  ;;  %v3889_v34 = vpop.f32.mrb[5].mxu1  ;;  %1543 = vmax.xlane.f32.xlu0 %v1542_v32 }
 0x2f1   : > { %v1537_v35 = vadd.f32 %v1533_v33, %v1150_v22 }
 0x2f2   : > { %v1527_v36 = vpop.f32.mrb[6].mxu1 }
 0x2f3   : > { %v1534_v37 = vmul.f32 0.35355338, %v1527_v36  ;;  %v3894_v38 = vpop.f32.mrb[7].mxu1  ;;  %v1545_v39 = vsel %vm1228_vm3, %v1537_v35, -inf }
 0x2f4   : > { %1546 = vmax.xlane.f32.xlu0 %v1545_v39 }
 0x2f5   : > { %v1538_v40 = vadd.f32 %v1534_v37, %v1150_v22 }
 0x2f7   : > { %v1548_v41 = vsel %vm1228_vm3, %v1538_v40, -inf }
 0x2f8   : > { %1549 = vmax.xlane.f32.xlu1 %v1548_v41 }
 0x309   : > { %1659 = vrot.lane.b32.xlu1 %v1221_v15, %s4202_s7  ;;  %v1900_v15 = vsel %vm1898_vm4, %v1887_v12, 0 }
 0x30d   : > { %v1541_v42 = vpop.xlane.xlu1 %1540 }
 0x30e   : > { %v1551_v43 = vsub.f32 %v1535_v25, %v1541_v42  ;;  %v1890_v25 = vld [vmem:[%s4400_s22 + $0xc] sm:$0xf] }
 0x30f   : > { %v2038_v29 = vsel %vm1898_vm4, %v1890_v25, 0 }
 0x310   : > { %v1555_v44 = vmul.f32 1.442695, %v1551_v43 }
 0x312   : > { %4118 = vpow2.f32 %v1555_v44 }
 0x31c   : > { %v4119_v45 = vpop.eup %4118 }
 0x31d   : > { %v1563_v46 = vsel %vm1228_vm3, %v4119_v45, 0.0 }
 0x31e   : > { %1564 = vadd.xlane.f32.xlu0 %v1563_v46 }
 0x334   : > { %1583 = vrot.lane.b32.xlu0 %v4506_v10, %s4202_s7 }
 0x37c   : > { %v1544_v47 = vpop.xlane.xlu0 %1543 }
 0x37d   : > { %v1552_v48 = vsub.f32 %v1536_v30, %v1544_v47 }
 0x37f   : > { %v1557_v49 = vmul.f32 1.442695, %v1552_v48 }
 0x381   : > { %4120 = vpow2.f32 %v1557_v49  ;;  %v1547_v50 = vpop.xlane.xlu0 %1546 }
 0x382   : > { %v1553_v51 = vsub.f32 %v1537_v35, %v1547_v50 }
 0x384   : > { %v1559_v52 = vmul.f32 1.442695, %v1553_v51  ;;  %v3743_v51 = vld [vmem:[%s4931_s14] ss:$0 sm:$0xff] }
 0x385   : > { %v1550_v53 = vpop.xlane.xlu1 %1549 }
 0x386   : > { %4122 = vpow2.f32 %v1559_v52  ;;  %v1554_v54 = vsub.f32 %v1538_v40, %v1550_v53 }
 0x388   : > { %v1561_v55 = vmul.f32 1.442695, %v1554_v54 }
 0x389   : > { %v1660_v56 = vpop.permute.xlu1 %1659 }
 0x38a   : > { %4124 = vpow2.f32 %v1561_v55  ;;  %3901 = vmatpush3.msra.mxu0 %v1660_v56 }
 0x38b   : > { %v4121_v57 = vpop.eup %4120  ;;  %3910 = vmatprep.subr.mxu0 %v4196_v4 }
 0x38c   : > { %v1566_v58 = vsel %vm1228_vm3, %v4121_v57, 0.0 }
 0x38d   : > { %1567 = vadd.xlane.f32.xlu1 %v1566_v58 }
 0x390   : > { %v4123_v59 = vpop.eup %4122 }
 0x391   : > { %v1569_v60 = vsel %vm1228_vm3, %v4123_v59, 0.0 }
 0x392   : > { %1570 = vadd.xlane.f32.xlu0 %v1569_v60 }
 0x394   : > { %v4125_v61 = vpop.eup %4124 }
 0x395   : > { %v1572_v62 = vsel %vm1228_vm3, %v4125_v61, 0.0 }
 0x396   : > { %1573 = vadd.xlane.f32.xlu1 %v1572_v62 }
 0x3a7   : > { %1735 = vrot.lane.b32.xlu1 %v4519_v17, %s4202_s7 }
 0x3a8   : > { %1811 = vrot.lane.b32.xlu0 %v4516_v14, %s4202_s7  ;;  %s4937_s7 = scalar_lea.vmem %s4936_s28, %s4375_s0 }
 0x3ab   : > { %v1565_v63 = vpop.xlane.xlu0 %1564 }
 0x3ac   : > { %4126 = vrcp.f32 %v1565_v63 }
 0x3af   : > { %v1584_v0 = vpop.permute.xlu0 %1583 }
 0x3b0   : > { %3896 = vmatpush3.msra.mxu1 %v1584_v0  ;;  %v4108_v0 = vld [vmem:[%s4426_s21] sm:$0xff]  }
 0x3b1   : > { %3905 = vmatprep.subr.mxu1 %v4196_v4 }
 0x3b6   : > { %v4127_v1 = vpop.eup %4126 }
 0x3b7   : > { %v1576_v2 = vmul.f32 %v4127_v1, %v4119_v45  ;;  %v4109_v1 = vld [vmem:[%s4426_s21 + $0x8] sm:$0xff]  }
 0x3b9   : > { %3898 = vmatmul.mubr.msk.f32.vlgmr.msra.gmra.mrb[8].mxu1 %vm1228_vm3, %v1576_v2 }
 0x3ba   : > { %3907 = vmatprep.mubr.msk.f32.mxu1 %vm4197_vm1, %v4196_v4 }
 0x41a   : > { %v1568_v3 = vpop.xlane.xlu1 %1567 }
 0x41b   : > { %4128 = vrcp.f32 %v1568_v3  ;;  %v4110_v3 = vld [vmem:[%s4417_s2] sm:$0xff]  }
 0x41f   : > { %v1571_v5 = vpop.xlane.xlu0 %1570 }
 0x420   : > { %4130 = vrcp.f32 %v1571_v5  ;;  %v4111_v5 = vld [vmem:[%s4417_s2 + $0x8] sm:$0xff]  }
 0x423   : > { %v1574_v7 = vpop.xlane.xlu1 %1573  ;;  %v1812_v11 = vpop.permute.xlu0 %1811 }
 0x424   : > { %4132 = vrcp.f32 %v1574_v7 }
 0x425   : > { %v4129_v8 = vpop.eup %4128 }
 0x426   : > { %v1578_v9 = vmul.f32 %v4129_v8, %v4121_v57 }
 0x427   : > { %v1736_v10 = vpop.permute.xlu1 %1735 }
 0x428   : > { %3906 = vmatpush3.msra.mxu1 %v1736_v10  ;;  %3903 = vmatmul.mubr.msk.f32.vlgmr.msra.gmra.mrb[4].mxu0 %vm1228_vm3, %v1578_v9 }
 0x429   : > { %3911 = vmatpush3.msra.mxu0 %v1812_v11  ;;  %3912 = vmatprep.mubr.msk.f32.mxu0 %vm4197_vm1, %v4196_v4  ;;  %v3744_v11 = vld [vmem:[%s4935_s1] ss:$0 sm:$0xff]  ;;  %s4945_s1 = sld [smem:[#allocation26_spill]] }
 0x42a   : > { %v4131_v13 = vpop.eup %4130  ;;  %3915 = vmatprep.subr.bf16.mxu1 %v4196_v4  ;;  %3921 = vmatprep.subr.bf16.mxu0 %v4196_v4 }
 0x42b   : > { %v1580_v14 = vmul.f32 %v4131_v13, %v4123_v59  ;;  %v3745_v13 = vld [vmem:[%s4937_s7] ss:$0 sm:$0xff]  ;;  %s4947_s7 = sld [smem:[#allocation28_spill]] }
 0x42d   : > { %3908 = vmatmul.mubr.msk.f32.vlgmr.msra.gmra.mrb[10].mxu1 %vm1228_vm3, %v1580_v14 }
 0x42e   : > { %v4133_v16 = vpop.eup %4132  ;;  %3916 = vmatpush3.bf16.msra.mxu1 %v1900_v15  ;;  %3917 = vmatprep.mubr.msk.bf16.mxu1 %vm4197_vm1, %v4196_v4 }
 0x42f   : > { %v1582_v17 = vmul.f32 %v4133_v16, %v4125_v61  ;;  %3927 = vmatprep.subr.bf16.mxu1 %v4196_v4  ;;  %s4946_s6 = scalar_lea.vmem %s4945_s1, %s4375_s0 }
 0x431   : > { %3913 = vmatmul.mubr.msk.f32.vlgmr.msra.gmra.mrb[6].mxu0 %vm1228_vm3, %v1582_v17  ;;  %v3750_v17 = vld [vmem:[%s4938_s27] ss:$0 sm:$0xff]  ;;  %s4948_s2 = scalar_lea.vmem %s4947_s7, %s4375_s0 }
 0x432   : > { %3923 = vmatprep.mubr.msk.bf16.mxu0 %vm4197_vm1, %v4196_v4  ;;  %3922 = vmatpush3.bf16.msra.mxu0 %v1946_v19 }
 0x433   : > { %3933 = vmatprep.subr.bf16.mxu0 %v4196_v4 }
 0x48c   : > { %v1655_v21 = vpop.f32.mrb[8].mxu1 }
 0x48d   : > { %v1891_v22 = vpack.c.bf16 %v1655_v21, %v1655_v21  ;;  %v3899_v23 = vpop.f32.mrb[9].mxu1 }
 0x48f   : > { %3918 = vmatmul.mubr.msk.bf16.vlgmr.msra.gmra.mrb[12].mxu1 %vm1228_vm3, %v1891_v22 }
 0x490   : > { %3928 = vmatpush3.bf16.msra.mxu1 %v1992_v24  ;;  %3929 = vmatprep.mubr.msk.bf16.mxu1 %vm4197_vm1, %v4196_v4  ;;  %v3746_v24 = vld [vmem:[%s4939_s26] ss:$0 sm:$0xff] }
 0x491   : > { %3939 = vmatprep.subr.bf16.mxu1 %v4196_v4 }
 0x4fb   : > { %v1731_v26 = vpop.f32.mrb[4].mxu0 }
 0x4fc   : > { %v1892_v27 = vpack.c.bf16 %v1731_v26, %v1731_v26  ;;  %v3904_v28 = vpop.f32.mrb[5].mxu0 }
 0x4fe   : > { %3924 = vmatmul.mubr.msk.bf16.vlgmr.msra.gmra.mrb[8].mxu0 %vm1228_vm3, %v1892_v27 }
 0x4ff   : > { %3934 = vmatpush3.bf16.msra.mxu0 %v2038_v29  ;;  %3935 = vmatprep.mubr.msk.bf16.mxu0 %vm4197_vm1, %v4196_v4 }
 0x500   : > { %v1807_v30 = vpop.f32.mrb[10].mxu1  ;;  %3947 = vmatprep.subr.bf16.mxu0 %v4196_v4 }
 0x501   : > { %v1893_v31 = vpack.c.bf16 %v1807_v30, %v1807_v30  ;;  %v3909_v32 = vpop.f32.mrb[11].mxu1 }
 0x503   : > { %3930 = vmatmul.mubr.msk.bf16.vlgmr.msra.gmra.mrb[16].mxu1 %vm1228_vm3, %v1893_v31 }
 0x504   : > { %v1883_v33 = vpop.f32.mrb[6].mxu0  ;;  %3943 = vmatprep.mubr.msk.bf16.mxu1 %vm4197_vm1, %v4196_v4  ;;  %3940 = vmatpush3.bf16.msra.mxu1 %v4110_v3 }
 0x505   : > { %v1894_v34 = vpack.c.bf16 %v1883_v33, %v1883_v33  ;;  %v3914_v35 = vpop.f32.mrb[7].mxu0  ;;  %3941 = vmatprep.subr.bf16.mxu1 %v4196_v4 }
 0x507   : > { %3936 = vmatmul.mubr.msk.bf16.vlgmr.msra.gmra.mrb[12].mxu0 %vm1228_vm3, %v1894_v34 }
 0x508   : > { %3951 = vmatprep.mubr.msk.bf16.mxu0 %vm4197_vm1, %v4196_v4  ;;  %3948 = vmatpush3.bf16.msra.mxu0 %v4108_v0 }
 0x509   : > { %3949 = vmatprep.subr.bf16.mxu0 %v4196_v4  ;;  %3942 = vmatpush3.bf16.msra.mxu1 %v4111_v5 }
 0x50a   : > { %3955 = vmatprep.subr.mxu1 %v4196_v4 }
 0x50c   : > { %3950 = vmatpush3.bf16.msra.mxu0 %v4109_v1 }
 0x50d   : > { %3960 = vmatprep.subr.mxu0 %v4196_v4 }
 0x562   : > { %v1936_v36 = vpop.f32.mrb[12].mxu1 }
 0x563   : > { %v3919_v37 = vpop.f32.mrb[13].mxu1 }
 0x564   : > { %v1939_v38 = vpop.f32.mrb[14].mxu1 }
 0x565   : > { %v3920_v39 = vpop.f32.mrb[15].mxu1 }
 0x5d1   : > { %v1982_v40 = vpop.f32.mrb[8].mxu0 }
 0x5d2   : > { %v2080_v41 = vadd.f32 %v1982_v40, %v1936_v36  ;;  %v3925_v42 = vpop.f32.mrb[9].mxu0 }
 0x5d3   : > { %v1985_v43 = vpop.f32.mrb[10].mxu0 }
 0x5d4   : > { %v3926_v44 = vpop.f32.mrb[11].mxu0 }
 0x5d6   : > { %v2028_v45 = vpop.f32.mrb[16].mxu1 }
 0x5d7   : > { %v2081_v46 = vadd.f32 %v2080_v41, %v2028_v45  ;;  %v3931_v47 = vpop.f32.mrb[17].mxu1 }
 0x5d8   : > { %v2031_v48 = vpop.f32.mrb[18].mxu1 }
 0x5d9   : > { %v3932_v49 = vpop.f32.mrb[19].mxu1 }
 0x5da   : > { %v2074_v50 = vpop.f32.mrb[12].mxu0 }
 0x5db   : > { %v2082_v52 = vadd.f32 %v2081_v46, %v2074_v50  ;;  %v3937_v53 = vpop.f32.mrb[13].mxu0 }
 0x5dc   : > { %v2077_v54 = vpop.f32.mrb[14].mxu0 }
 0x5dd   : > { %v2090_v55 = vadd.f32 %v3743_v51, %v2082_v52  ;;  %v3938_v56 = vpop.f32.mrb[15].mxu0 }
 0x5df   : > { %v2091_v57 = vadd.f32 %v2090_v55, %v4490_v6  ;;  %v1149_v6 = vld [vmem:[%s4933_s18] sm:$0xff]  ;;  %s4943_s18 = sld [smem:[#allocation25_spill]] }
 0x5e0   : > { %v2189_v2 = vpack.c.bf16 %v1149_v6, %v1149_v6 }
 0x5e1   : > { %v2094_v58 = vsel %vm1175_vm2, %v2091_v57, 0.0 }
 0x5e2   : > { %2095 = vadd.xlane.f32.xlu1 %v2094_v58  ;;  %3952 = vmatmul.mubr.msk.bf16.vlgmr.msra.gmra.mrb[16].mxu0 %vm1175_vm2, %v2189_v2 }
 0x5e3   : > { %3962 = vmatprep.mubr.msk.f32.mxu0 %vm4197_vm1, %v4196_v4 }
 0x5e5   : > { %s4944_s21 = scalar_lea.vmem %s4943_s18, %s4375_s0 }
 0x66f   : > { %v2096_v59 = vpop.xlane.xlu1 %2095 }
 0x670   : > { %v2098_v60 = vmul.f32 0.03125, %v2096_v59 }
 0x672   : > { %v2099_v61 = vsub.f32 %v2091_v57, %v2098_v60 }
 0x674   : > { %v2100_v62 = vmul.f32 %v2099_v61, %v2099_v61 }
 0x676   : > { %v2101_v63 = vsel %vm1175_vm2, %v2100_v62, 0.0 }
 0x677   : > { %2102 = vadd.xlane.f32.xlu0 %v2101_v63 }
 0x6b5   : > { %v2250_v18 = vpop.f32.mrb[16].mxu0 }
 0x6b6   : > { %v4652_v19 = vadd.f32 %v3750_v17, %v2250_v18  ;;  %v3953_v20 = vpop.f32.mrb[17].mxu0 }
 0x6b7   : > { %v2253_v21 = vpop.f32.mrb[18].mxu0 }
 0x6b8   : > { %2264 = vrot.lane.b32.xlu0 %v4652_v19, %s4199_s8  ;;  %v3954_v22 = vpop.f32.mrb[19].mxu0 }
 0x6bc   : > { %2268 = vrot.lane.b32.xlu0 %v4652_v19, %s4198_s24 }
 0x704   : > { %v2103_v7 = vpop.xlane.xlu0 %2102 }
 0x705   : > { %v2104_v8 = vmul.f32 0.03125, %v2103_v7 }
 0x707   : > { %v2105_v9 = vadd.f32 1e-05, %v2104_v8 }
 0x709   : > { %4134 = vrsqrt.f32 %v2105_v9 }
 0x713   : > { %v4135_v10 = vpop.eup %4134 }
 0x714   : > { %v2107_v12 = vmul.f32 %v4135_v10, %v2099_v61 }
 0x716   : > { %v2114_v14 = vmul.f32 %v3744_v11, %v2107_v12 }
 0x718   : > { %v4640_v15 = vadd.f32 %v3745_v13, %v2114_v14 }
 0x71a   : > { %v2122_v16 = vpack.c.bf16 %v4640_v15, %v4640_v15 }
 0x71c   : > { %3944 = vmatmul.mubr.msk.bf16.vlgmr.msra.gmra.mrb[20].mxu1 %vm1175_vm2, %v2122_v16 }
 0x71d   : > { %3957 = vmatprep.mubr.msk.f32.mxu1 %vm4197_vm1, %v4196_v4  ;;  %3956 = vmatpush3.xpose.msk.msra.mxu1 %vm1228_vm3, %v4652_v19 }
 0x71e   : > { %3965 = vmatprep.subr.mxu1 %v4196_v4 }
 0x72a   : > { %v2265_v23 = vpop.permute.xlu0 %2264 }
 0x72b   : > { %3961 = vmatpush3.xpose.msk.msra.mxu0 %vm1228_vm3, %v2265_v23 }
 0x72c   : > { %3970 = vmatprep.subr.mxu0 %v4196_v4 }
 0x72e   : > { %v4676_v30 = vpop.permute.xlu0 %2268 }
 0x7ef   : > { %v2183_v25 = vpop.f32.mrb[20].mxu1 }
 0x7f0   : > { %v2184_v26 = vadd.f32 %v3746_v24, %v2183_v25  ;;  %v3945_v27 = vpop.f32.mrb[21].mxu1 }
 0x7f1   : > { %v2186_v28 = vpop.f32.mrb[22].mxu1  ;;  %v2919_v27 = vld [vmem:[%s4435_s20 + $0x4] sm:$0xf] }
 0x7f2   : > { %2257 = vrot.lane.b32.xlu1 %v2184_v26, %s4199_s8  ;;  %v3946_v29 = vpop.f32.mrb[23].mxu1  ;;  %2261 = vrot.lane.b32.xlu0 %v2184_v26, %s4198_s24  ;;  %v2976_v28 = vsel %vm1898_vm4, %v2919_v27, 0  ;;  %s4940_s8 = sld [smem:[#allocation24_spill]] }
 0x7f3   : > { %3958 = vmatmul.mubr.msk.f32.vlgmr.msra.gmra.mrb[24].mxu1 %vm1228_vm3, %v2184_v26  ;;  %v2920_v29 = vld [vmem:[%s4435_s20 + $0x8] sm:$0xf] }
 0x7f4   : > { %3967 = vmatprep.mubr.msk.f32.mxu1 %vm4197_vm1, %v4196_v4 }
 0x7f6   : > { %2266 = vrot.lane.b32.xlu1 %v4652_v19, %s4201_s5 }
 0x7fa   : > { %2259 = vrot.lane.b32.xlu1 %v2184_v26, %s4201_s5  ;;  %s4942_s5 = sld [smem:[#allocation10_spill]] }
 0x864   : > { %v2258_v31 = vpop.permute.xlu1 %2257  ;;  %v2262_v32 = vpop.permute.xlu0 %2261 }
 0x865   : > { %3963 = vmatmul.mubr.msk.f32.vlgmr.msra.gmra.mrb[20].mxu0 %vm1228_vm3, %v2258_v31 }
 0x866   : > { %3971 = vmatpush3.xpose.msk.msra.mxu0 %vm1228_vm3, %v4676_v30  ;;  %3972 = vmatprep.mubr.msk.f32.mxu0 %vm4197_vm1, %v4196_v4 }
 0x867   : > { %3980 = vmatprep.subr.mxu0 %v4196_v4 }
 0x868   : > { %v2267_v33 = vpop.permute.xlu1 %2266 }
 0x869   : > { %3966 = vmatpush3.xpose.msk.msra.mxu1 %vm1228_vm3, %v2267_v33  ;;  %3973 = vmatmul.mubr.msk.f32.vlgmr.msra.gmra.mrb[22].mxu0 %vm1228_vm3, %v2262_v32 }
 0x86a   : > { %3975 = vmatprep.subr.mxu1 %v4196_v4  ;;  %3982 = vmatprep.mubr.msk.f32.mxu0 %vm4197_vm1, %v4196_v4 }
 0x86c   : > { %v2260_v34 = vpop.permute.xlu1 %2259 }
 0x86d   : > { %3968 = vmatmul.mubr.msk.f32.vlgmr.msra.gmra.mrb[26].mxu1 %vm1228_vm3, %v2260_v34  ;;  %v2921_v34 = vld [vmem:[%s4435_s20 + $0xc] sm:$0xf] }
 0x86e   : > { %3977 = vmatprep.mubr.msk.f32.mxu1 %vm4197_vm1, %v4196_v4 }
 0x8c6   : > { %v2340_v35 = vpop.f32.mrb[24].mxu1 }
 0x8c7   : > { %v2566_v36 = vmul.f32 0.35355338, %v2340_v35  ;;  %v3959_v37 = vpop.f32.mrb[25].mxu1 }
 0x8c9   : > { %v2570_v38 = vsel %vm1228_vm3, %v2566_v36, -inf }
 0x8ca   : > { %2571 = vmax.xlane.f32.xlu1 %v2570_v38  ;;  %v3068_v38 = vsel %vm1898_vm4, %v2921_v34, 0 }
 0x938   : > { %v2414_v39 = vpop.f32.mrb[20].mxu0 }
 0x939   : > { %v2567_v40 = vmul.f32 0.35355338, %v2414_v39  ;;  %v3964_v41 = vpop.f32.mrb[21].mxu0 }
 0x93b   : > { %v2573_v42 = vsel %vm1228_vm3, %v2567_v40, -inf }
 0x93c   : > { %2574 = vmax.xlane.f32.xlu0 %v2573_v42  ;;  %v2562_v43 = vpop.f32.mrb[22].mxu0 }
 0x93d   : > { %v2569_v44 = vmul.f32 0.35355338, %v2562_v43  ;;  %v3974_v45 = vpop.f32.mrb[23].mxu0 }
 0x93f   : > { %v2579_v46 = vsel %vm1228_vm3, %v2569_v44, -inf }
 0x940   : > { %v2488_v47 = vpop.f32.mrb[26].mxu1  ;;  %2580 = vmax.xlane.f32.xlu1 %v2579_v46 }
 0x941   : > { %v2568_v48 = vmul.f32 0.35355338, %v2488_v47  ;;  %v3969_v49 = vpop.f32.mrb[27].mxu1 }
 0x943   : > { %v2576_v50 = vsel %vm1228_vm3, %v2568_v48, -inf }
 0x944   : > { %2577 = vmax.xlane.f32.xlu0 %v2576_v50 }
 0x951   : > { %2690 = vrot.lane.b32.xlu1 %v2265_v23, %s4200_s30  ;;  %v2918_v23 = vld [vmem:[%s4435_s20] sm:$0xf] }
 0x952   : > { %v2930_v26 = vsel %vm1898_vm4, %v2918_v23, 0 }
 0x957   : > { %v2572_v51 = vpop.xlane.xlu1 %2571 }
 0x958   : > { %v2582_v52 = vsub.f32 %v2566_v36, %v2572_v51 }
 0x95a   : > { %v2586_v53 = vmul.f32 1.442695, %v2582_v52 }
 0x95c   : > { %4136 = vpow2.f32 %v2586_v53 }
 0x966   : > { %v4137_v54 = vpop.eup %4136 }
 0x967   : > { %v2594_v55 = vsel %vm1228_vm3, %v4137_v54, 0.0 }
 0x968   : > { %2595 = vadd.xlane.f32.xlu0 %v2594_v55 }
 0x97e   : > { %2614 = vrot.lane.b32.xlu0 %v4652_v19, %s4200_s30 }
 0x9c9   : > { %v2575_v56 = vpop.xlane.xlu0 %2574 }
 0x9ca   : > { %v2583_v57 = vsub.f32 %v2567_v40, %v2575_v56 }
 0x9cc   : > { %v2588_v58 = vmul.f32 1.442695, %v2583_v57 }
 0x9cd   : > { %v2581_v59 = vpop.xlane.xlu1 %2580 }
 0x9ce   : > { %4138 = vpow2.f32 %v2588_v58  ;;  %v2585_v60 = vsub.f32 %v2569_v44, %v2581_v59 }
 0x9d0   : > { %v2592_v61 = vmul.f32 1.442695, %v2585_v60 }
 0x9d1   : > { %v2578_v62 = vpop.xlane.xlu0 %2577  ;;  %v2691_v63 = vpop.permute.xlu1 %2690 }
 0x9d2   : > { %4140 = vpow2.f32 %v2592_v61  ;;  %v2584_v0 = vsub.f32 %v2568_v48, %v2578_v62  ;;  %3981 = vmatpush3.msra.mxu0 %v2691_v63 }
 0x9d3   : > { %3990 = vmatprep.subr.mxu0 %v4196_v4 }
 0x9d4   : > { %v2590_v1 = vmul.f32 1.442695, %v2584_v0 }
 0x9d6   : > { %4142 = vpow2.f32 %v2590_v1 }
 0x9d8   : > { %v4139_v6 = vpop.eup %4138 }
 0x9d9   : > { %v2597_v2 = vsel %vm1228_vm3, %v4139_v6, 0.0 }
 0x9da   : > { %2598 = vadd.xlane.f32.xlu1 %v2597_v2 }
 0x9dc   : > { %v4141_v3 = vpop.eup %4140 }
 0x9dd   : > { %v2603_v5 = vsel %vm1228_vm3, %v4141_v3, 0.0 }
 0x9de   : > { %2604 = vadd.xlane.f32.xlu1 %v2603_v5 }
 0x9e0   : > { %v4143_v7 = vpop.eup %4142 }
 0x9e1   : > { %v2600_v8 = vsel %vm1228_vm3, %v4143_v7, 0.0 }
 0x9e2   : > { %2601 = vadd.xlane.f32.xlu0 %v2600_v8 }
 0x9ef   : > { %2766 = vrot.lane.b32.xlu1 %v2267_v33, %s4200_s30  ;;  %v3022_v33 = vsel %vm1898_vm4, %v2920_v29, 0 }
 0x9f5   : > { %v2596_v9 = vpop.xlane.xlu0 %2595 }
 0x9f6   : > { %4144 = vrcp.f32 %v2596_v9 }
 0x9f8   : > { %2842 = vrot.lane.b32.xlu0 %v4676_v30, %s4200_s30  ;;  %s4941_s30 = scalar_lea.vmem %s4940_s8, %s4375_s0  ;;  %s4952_s8 = sld [smem:[#allocation3_spill]] }
 0x9f9   : > { %v2615_v10 = vpop.permute.xlu0 %2614  ;;  %v3770_v59 = vld [vmem:[%s4941_s30] ss:$0 sm:$0xff] }
 0x9fa   : > { %3976 = vmatpush3.msra.mxu1 %v2615_v10  ;;  %v4112_v10 = vld [vmem:[%s4942_s5] sm:$0xff]  }
 0x9fb   : > { %3985 = vmatprep.subr.mxu1 %v4196_v4 }
 0x9fe   : > { %p3785_p8 = scmp.ne.s32.totalorder %s4952_s8, 1 }
 0x9ff   : > { %s4953_s23 = sld [smem:[#allocation33_spill]] (!%p3785_p8)  ;;  %vm4204_vm6 = vmmov (!%p3785_p8), 0   ;;  %s4954_s1 = sld [smem:[#allocation34_spill]] (!%p3785_p8) }
 0xa00   : > { %v4145_v11 = vpop.eup %4144 }
 0xa01   : > { %v2607_v12 = vmul.f32 %v4145_v11, %v4137_v54  ;;  %v4113_v11 = vld [vmem:[%s4942_s5 + $0x8] sm:$0xff]  }
 0xa03   : > { %3978 = vmatmul.mubr.msk.f32.vlgmr.msra.gmra.mrb[28].mxu1 %vm1228_vm3, %v2607_v12  ;;  %v4115_v12 = vld [vmem:[%s4462_s15 + $0x8] sm:$0xff]  }
 0xa04   : > { %3987 = vmatprep.mubr.msk.f32.mxu1 %vm4197_vm1, %v4196_v4 }
 0xa67   : > { %v2599_v13 = vpop.xlane.xlu1 %2598 }
 0xa68   : > { %4146 = vrcp.f32 %v2599_v13 }
 0xa6b   : > { %v2605_v14 = vpop.xlane.xlu1 %2604 }
 0xa6c   : > { %4148 = vrcp.f32 %v2605_v14 }
 0xa6f   : > { %v2602_v16 = vpop.xlane.xlu0 %2601  ;;  %v2767_v17 = vpop.permute.xlu1 %2766 }
 0xa70   : > { %4150 = vrcp.f32 %v2602_v16  ;;  %3986 = vmatpush3.msra.mxu1 %v2767_v17 }
 0xa71   : > { %3995 = vmatprep.subr.bf16.mxu1 %v4196_v4 }
 0xa72   : > { %v4147_v18 = vpop.eup %4146 }
 0xa73   : > { %v2609_v19 = vmul.f32 %v4147_v18, %v4139_v6  ;;  %v2843_v20 = vpop.permute.xlu0 %2842  ;;  %v3771_v18 = vld [vmem:[%s4944_s21] ss:$0 sm:$0xff] }
 0xa75   : > { %3983 = vmatmul.mubr.msk.f32.vlgmr.msra.gmra.mrb[24].mxu0 %vm1228_vm3, %v2609_v19 }
 0xa76   : > { %v4149_v21 = vpop.eup %4148  ;;  %3991 = vmatpush3.msra.mxu0 %v2843_v20  ;;  %3992 = vmatprep.mubr.msk.f32.mxu0 %vm4197_vm1, %v4196_v4  ;;  %v3772_v20 = vld [vmem:[%s4946_s6] ss:$0 sm:$0xff] }
 0xa77   : > { %v2613_v22 = vmul.f32 %v4149_v21, %v4141_v3  ;;  %4001 = vmatprep.subr.bf16.mxu0 %v4196_v4 }
 0xa79   : > { %3993 = vmatmul.mubr.msk.f32.vlgmr.msra.gmra.mrb[26].mxu0 %vm1228_vm3, %v2613_v22 }
 0xa7a   : > { %v4151_v24 = vpop.eup %4150  ;;  %4003 = vmatprep.mubr.msk.bf16.mxu0 %vm4197_vm1, %v4196_v4  ;;  %4002 = vmatpush3.bf16.msra.mxu0 %v2976_v28 }
 0xa7b   : > { %v2611_v25 = vmul.f32 %v4151_v24, %v4143_v7  ;;  %4013 = vmatprep.subr.bf16.mxu0 %v4196_v4  ;;  %v4116_v24 = vld [vmem:[%s4462_s15 + $0x10] sm:$0xff]  }
 0xa7d   : > { %3988 = vmatmul.mubr.msk.f32.vlgmr.msra.gmra.mrb[30].mxu1 %vm1228_vm3, %v2611_v25  ;;  %v4117_v25 = vld [vmem:[%s4462_s15 + $0x18] sm:$0xff]  }
 0xa7e   : > { %3996 = vmatpush3.bf16.msra.mxu1 %v2930_v26  ;;  %3997 = vmatprep.mubr.msk.bf16.mxu1 %vm4197_vm1, %v4196_v4  ;;  %v3773_v26 = vld [vmem:[%s4948_s2] ss:$0 sm:$0xff] }
 0xa7f   : > { %4007 = vmatprep.subr.bf16.mxu1 %v4196_v4 }
 0xad6   : > { %v2686_v30 = vpop.f32.mrb[28].mxu1 }
 0xad7   : > { %v2922_v31 = vpack.c.bf16 %v2686_v30, %v2686_v30  ;;  %v3979_v32 = vpop.f32.mrb[29].mxu1 }
 0xad9   : > { %3998 = vmatmul.mubr.msk.bf16.vlgmr.msra.gmra.mrb[32].mxu1 %vm1228_vm3, %v2922_v31 }
 0xada   : > { %4008 = vmatpush3.bf16.msra.mxu1 %v3022_v33  ;;  %4009 = vmatprep.mubr.msk.bf16.mxu1 %vm4197_vm1, %v4196_v4 }
 0xadb   : > { %4019 = vmatprep.subr.bf16.mxu1 %v4196_v4 }
 0xb48   : > { %v2762_v35 = vpop.f32.mrb[24].mxu0 }
 0xb49   : > { %v2923_v36 = vpack.c.bf16 %v2762_v35, %v2762_v35  ;;  %v3984_v37 = vpop.f32.mrb[25].mxu0 }
 0xb4b   : > { %4004 = vmatmul.mubr.msk.bf16.vlgmr.msra.gmra.mrb[28].mxu0 %vm1228_vm3, %v2923_v36 }
 0xb4c   : > { %v2914_v39 = vpop.f32.mrb[26].mxu0  ;;  %4014 = vmatpush3.bf16.msra.mxu0 %v3068_v38  ;;  %4015 = vmatprep.mubr.msk.bf16.mxu0 %vm4197_vm1, %v4196_v4 }
 0xb4d   : > { %v3994_v40 = vpop.f32.mrb[27].mxu0  ;;  %4027 = vmatprep.subr.bf16.mxu0 %v4196_v4  ;;  %v2925_v42 = vpack.c.bf16 %v2914_v39, %v2914_v39 }
 0xb50   : > { %v2838_v41 = vpop.f32.mrb[30].mxu1 }
 0xb51   : > { %v2924_v43 = vpack.c.bf16 %v2838_v41, %v2838_v41  ;;  %v3989_v44 = vpop.f32.mrb[31].mxu1 }
 0xb53   : > { %4010 = vmatmul.mubr.msk.bf16.vlgmr.msra.gmra.mrb[36].mxu1 %vm1228_vm3, %v2924_v43  ;;  %4016 = vmatmul.mubr.msk.bf16.vlgmr.msra.gmra.mrb[32].mxu0 %vm1228_vm3, %v2925_v42 }
 0xb54   : > { %4023 = vmatprep.mubr.msk.bf16.mxu1 %vm4197_vm1, %v4196_v4  ;;  %4035 = vmatprep.mubr.msk.bf16.mxu0 %vm4197_vm1, %v4196_v4 }
 0xb55   : > { %4020 = vmatpush3.bf16.msra.mxu1 %v4112_v10 }
 0xb56   : > { %4021 = vmatprep.subr.bf16.mxu1 %v4196_v4 }
 0xb59   : > { %4022 = vmatpush3.bf16.msra.mxu1 %v4113_v11 }
 0xbac   : > { %v2966_v45 = vpop.f32.mrb[32].mxu1 }
 0xbad   : > { %v3999_v46 = vpop.f32.mrb[33].mxu1 }
 0xbae   : > { %v2969_v47 = vpop.f32.mrb[34].mxu1 }
 0xbaf   : > { %v4000_v48 = vpop.f32.mrb[35].mxu1 }
 0xc1e   : > { %v3012_v49 = vpop.f32.mrb[28].mxu0 }
 0xc1f   : > { %v3110_v50 = vadd.f32 %v3012_v49, %v2966_v45  ;;  %v4005_v51 = vpop.f32.mrb[29].mxu0 }
 0xc20   : > { %v3015_v52 = vpop.f32.mrb[30].mxu0 }
 0xc21   : > { %v4006_v53 = vpop.f32.mrb[31].mxu0  ;;  %v3784_v52 = vld [vmem:[%s1133_s16] ss:$0 sm:$0xff] }
 0xc26   : > { %v3058_v54 = vpop.f32.mrb[36].mxu1  ;;  %v3104_v55 = vpop.f32.mrb[32].mxu0 }
 0xc27   : > { %v3111_v56 = vadd.f32 %v3110_v50, %v3058_v54  ;;  %v4011_v57 = vpop.f32.mrb[37].mxu1  ;;  %v4017_v58 = vpop.f32.mrb[33].mxu0  ;;  %v3783_v50 = vld [vmem:[%s1130_s12] ss:$0 sm:$0xff] }
 0xc28   : > { %v3061_v60 = vpop.f32.mrb[38].mxu1  ;;  %v3107_v61 = vpop.f32.mrb[34].mxu0  ;;  %v3340_v57 = vld [vmem:[%s4953_s23 + $0x10] sm:$0xff] (!%p3785_p8)  ;;  %v4203_v58 = vmov (!%p3785_p8), 0.0|0.0  }
 0xc29   : > { %v3112_v62 = vadd.f32 %v3111_v56, %v3104_v55  ;;  %v4012_v63 = vpop.f32.mrb[39].mxu1  ;;  %v4018_v0 = vpop.f32.mrb[35].mxu0  ;;  %v3338_v55 = vld [vmem:[%s4953_s23] sm:$0xff] (!%p3785_p8)  ;;  %v3339_v56 = vld [vmem:[%s4953_s23 + $0x8] sm:$0xff] (!%p3785_p8)  ;;  %v3341_v60 = vld [vmem:[%s4953_s23 + $0x18] sm:$0xff] (!%p3785_p8)  ;;  %v4205_v61 = vmov (!%p3785_p8), 0.0  }
 0xc2a   : > { %v3786_v63 = vld [vmem:[%s4954_s1] ss:$0 sm:$0xff] (!%p3785_p8) }
 0xc2b   : > { %v3120_v1 = vadd.f32 %v3770_v59, %v3112_v62  ;;  %v4051_v59 = vpack.c.bf16 (!%p3785_p8), %v3339_v56, %v3338_v55  ;;  %v4054_v62 = vpack.c.bf16 (!%p3785_p8), %v3341_v60, %v3340_v57 }
 0xc2d   : > { %v3121_v6 = vadd.f32 %v3120_v1, %v4640_v15  ;;  %v4114_v15 = vld [vmem:[%s4462_s15] sm:$0xff]  }
 0xc2e   : > { %4028 = vmatpush3.bf16.msra.mxu0 %v4114_v15 }
 0xc2f   : > { %v3124_v2 = vsel %vm1175_vm2, %v3121_v6, 0.0  ;;  %4029 = vmatprep.subr.bf16.mxu0 %v4196_v4 }
 0xc30   : > { %3125 = vadd.xlane.f32.xlu1 %v3124_v2 }
 0xc32   : > { %4030 = vmatpush3.bf16.msra.mxu0 %v4115_v12 }
 0xc33   : > { %4031 = vmatprep.subr.bf16.mxu0 %v4196_v4 }
 0xc36   : > { %4032 = vmatpush3.bf16.msra.mxu0 %v4116_v24 }
 0xc37   : > { %4033 = vmatprep.subr.bf16.mxu0 %v4196_v4  ;;  %v3777_v4 = vld [vmem:[%s1127_s4] ss:$0 sm:$0xff] }
 0xc3a   : > { %4034 = vmatpush3.bf16.msra.mxu0 %v4117_v25 }
 0xc3b   : > { %4050 = vmatprep.subr.bf16.mxu0 (!%p3785_p8), %v4203_v58 }
 0xcbd   : > { %v3126_v3 = vpop.xlane.xlu1 %3125 }
 0xcbe   : > { %v3127_v5 = vmul.f32 0.03125, %v3126_v3 }
 0xcc0   : > { %v3128_v7 = vsub.f32 %v3121_v6, %v3127_v5 }
 0xcc2   : > { %v3129_v8 = vmul.f32 %v3128_v7, %v3128_v7 }
 0xcc4   : > { %v3130_v9 = vsel %vm1175_vm2, %v3129_v8, 0.0 }
 0xcc5   : > { %3131 = vadd.xlane.f32.xlu0 %v3130_v9 }
 0xd52   : > { %v3132_v13 = vpop.xlane.xlu0 %3131 }
 0xd53   : > { %v3133_v14 = vmul.f32 0.03125, %v3132_v13 }
 0xd55   : > { %v3134_v16 = vadd.f32 1e-05, %v3133_v14 }
 0xd57   : > { %4152 = vrsqrt.f32 %v3134_v16 }
 0xd61   : > { %v4153_v17 = vpop.eup %4152 }
 0xd62   : > { %v3136_v19 = vmul.f32 %v4153_v17, %v3128_v7 }
 0xd64   : > { %v3143_v21 = vmul.f32 %v3771_v18, %v3136_v19 }
 0xd66   : > { %v3150_v22 = vadd.f32 %v3772_v20, %v3143_v21 }
 0xd68   : > { %v3151_v23 = vpack.c.bf16 %v3150_v22, %v3150_v22 }
 0xd6a   : > { %4024 = vmatmul.mubr.msk.bf16.vlgmr.msra.gmra.mrb[40].mxu1 %vm1175_vm2, %v3151_v23 }
 0xe3d   : > { %v3212_v27 = vpop.f32.mrb[40].mxu1 }
 0xe3e   : > { %v3213_v28 = vadd.f32 %v3773_v26, %v3212_v27  ;;  %v4025_v29 = vpop.f32.mrb[41].mxu1 }
 0xe3f   : > { %v3215_v30 = vpop.f32.mrb[42].mxu1 }
 0xe40   : > { %v3218_v31 = vmax.f32 %v3213_v28, 0.0  ;;  %v4026_v32 = vpop.f32.mrb[43].mxu1 }
 0xe42   : > { %v3219_v33 = vpack.c.bf16 %v3218_v31, %v3218_v31 }
 0xe44   : > { %4036 = vmatmul.mubr.msk.bf16.vlgmr.msra.gmra.mrb[36].mxu0 %vm3259_vm5, %v3219_v33 }
 0xe45   : > { %4047 = vmatprep.mubr.msk.f32.mxu0 (!%p3785_p8), %vm4204_vm6, %v4205_v61  ;;  %4052 = vmatpush3.bf16.msra.mxu0 (!%p3785_p8), %v4051_v59 }
 0xe46   : > { %4053 = vmatprep.subr.bf16.mxu0 (!%p3785_p8), %v4203_v58 }
 0xe49   : > { %4055 = vmatpush3.bf16.msra.mxu0 (!%p3785_p8), %v4054_v62 }
 0xf17   : > { %v3297_v34 = vpop.f32.mrb[36].mxu0 }
 0xf18   : > { %v3298_v35 = vadd.f32 %v3777_v4, %v3297_v34  ;;  %v4037_v36 = vpop.f32.mrb[37].mxu0 }
 0xf19   : > { %v3300_v37 = vpop.f32.mrb[38].mxu0 }
 0xf1a   : > { %v4038_v38 = vpop.f32.mrb[39].mxu0  ;;  %v3303_v39 = vadd.f32 %v3298_v35, %v3150_v22 }
 0xf1c   : > { %v3306_v40 = vsel %vm1175_vm2, %v3303_v39, 0.0 }
 0xf1d   : > { %3307 = vadd.xlane.f32.xlu0 %v3306_v40 }
 0xfaa   : > { %v3308_v41 = vpop.xlane.xlu0 %3307 }
 0xfab   : > { %v3309_v42 = vmul.f32 0.03125, %v3308_v41 }
 0xfad   : > { %v3310_v43 = vsub.f32 %v3303_v39, %v3309_v42 }
 0xfaf   : > { %v3311_v44 = vmul.f32 %v3310_v43, %v3310_v43 }
 0xfb1   : > { %v3312_v45 = vsel %vm1175_vm2, %v3311_v44, 0.0 }
 0xfb2   : > { %3313 = vadd.xlane.f32.xlu1 %v3312_v45 }
0x103f   : > { %v3314_v46 = vpop.xlane.xlu1 %3313 }
0x1040   : > { %v3315_v47 = vmul.f32 0.03125, %v3314_v46 }
0x1042   : > { %v3316_v48 = vadd.f32 1e-05, %v3315_v47 }
0x1044   : > { %4154 = vrsqrt.f32 %v3316_v48 }
0x104e   : > { %v4155_v49 = vpop.eup %4154 }
0x104f   : > { %v3318_v51 = vmul.f32 %v4155_v49, %v3310_v43  ;;  %3337 = sbr.rel (%p3785_p8) target bundleno = 4396 (0x112c), region = 132 }
0x1051   : > { %v3325_v53 = vmul.f32 %v3783_v50, %v3318_v51 }
0x1053   : > { %v3332_v54 = vadd.f32 %v3784_v52, %v3325_v53 }
0x1055   : > { %3333 = vst.msk [vmem:[#allocation2] sm:$0xff] %vm1175_vm2, %v3332_v54  ;;  %4048 = vmatmul.mubr.msk.f32.vlgmr.msra.gmra.mrb[0].mxu0 (!%p3785_p8), %vm1175_vm2, %v3332_v54 }
0x1128   : > { %v3418_v0 = vpop.f32.mrb[0].mxu0 }
0x1129   : > { %v3419_v1 = vadd.f32 %v3786_v63, %v3418_v0  ;;  %v4049_v6 = vpop.f32.mrb[1].mxu0 }
0x112b   : > { %3422 = vst.msk [vmem:[%s1137_s19] sm:$0xff] %vm1175_vm2, %v3419_v1 }
0x112c PF: > { %s4956_s7 = sld [smem:[#allocation6_spill]]  ;;  %s4957_s27 = sld [smem:[#allocation4_spill]] }
0x112d   : > { %s4958_s3 = sld [smem:[#allocation5_spill]]  ;;  %s4960_s28 = sld [smem:[#allocation8_spill]] }
0x1132   : > { %s36_s8 = sadd.s32 1, %s4956_s7   ;;  %s4959_s7 = sld [smem:[#allocation7_spill]] }
0x1133   : > { %p33_p9 = scmp.ge.s32.totalorder %s36_s8, 6  }
0x1135   :  { %35 = sbr.rel (!%p33_p9) target bundleno = 26 (0x1a), region = 225 }

</bundles_post_ra>
